<compile_context>
chip_gen: v5e
topology: v5e:2x2
jax: 0.10.0
libtpu: 0.0.40
codegen_flags: <defaults>
</compile_context>

<pallas_src>
import functools
import random as _pyrandom

import numpy as np

import jax
import jax.numpy as jnp
from jax.experimental import pallas as pl
from jax.experimental.pallas import tpu as pltpu


# ------------------------------------------------------------------ host side
def _interp_matrix_np(n_out: int, n_in: int) -> np.ndarray:
    """1-D bilinear interpolation matrix, align_corners=True semantics."""
    idx = np.arange(n_out)
    if n_out == 1:
        src = np.zeros((1,), np.float64)
    else:
        src = idx.astype(np.float64) * (float(n_in - 1) / float(n_out - 1))
    i0 = np.clip(np.floor(src).astype(np.int64), 0, n_in - 1)
    i1 = np.minimum(i0 + 1, n_in - 1)
    frac = (src - i0).astype(np.float32)
    w = np.zeros((n_out, n_in), np.float32)
    np.add.at(w, (idx, i0), 1.0 - frac)
    np.add.at(w, (idx, i1), frac)
    return w


def _block_diag_np(w: np.ndarray, b: int) -> np.ndarray:
    """Block-diagonal stack of `b` copies of w: (b*out, b*in)."""
    n_out, n_in = w.shape
    out = np.zeros((b * n_out, b * n_in), np.float32)
    for i in range(b):
        out[i * n_out:(i + 1) * n_out, i * n_in:(i + 1) * n_in] = w
    return out


# --------------------------------------------------------------------- kernel
def _resize_kernel(x_ref, wwt_ref, whb_ref, o_ref):
    # x_ref:   (B*Hin, Win)        -- B images of this grid step, rows stacked
    # wwt_ref: (Win, Wout)         -- width interp matrix, pre-transposed
    # whb_ref: (B*Hout, B*Hin)     -- block-diagonal height interp matrix
    # o_ref:   (B*Hout, Wout)
    x = x_ref[...].astype(jnp.float32)
    tmp = jnp.dot(x, wwt_ref[...], preferred_element_type=jnp.float32)    # (B*Hin, Wout)
    out = jnp.dot(whb_ref[...], tmp, preferred_element_type=jnp.float32)  # (B*Hout, Wout)
    o_ref[...] = out.astype(o_ref.dtype)


# -------------------------------------------------------------------- wrapper
@functools.partial(jax.jit, static_argnums=(1,))
def _bilinear_resize_flat(x_flat, out_size: int):
    """Resize a (NC, Hin, Win) stack to (NC, out_size, out_size), bilinear,
    align_corners=True."""
    NC, Hin, Win = x_flat.shape
    Hout = Wout = out_size

    # Pick the grid: 2 parallel steps when possible (v7x dual TensorCores),
    # keeping the per-step batch modest so the block-diag weight stays small.
    G = 1
    if NC % 2 == 0 and ((NC // 2) * Hin) % 8 == 0 and ((NC // 2) * Hout) % 8 == 0:
        G = 2
        B = NC // 2
        while (B % 2 == 0 and B > 8
               and ((B // 2) * Hin) % 8 == 0 and ((B // 2) * Hout) % 8 == 0):
            G *= 2
            B //= 2
    B = NC // G

    # Interpolation matrices built on host at trace time (constants in HLO).
    wh = _interp_matrix_np(Hout, Hin)                 # (Hout, Hin)
    ww = _interp_matrix_np(Wout, Win)                 # (Wout, Win)
    wwt = jnp.asarray(ww.T)                           # (Win, Wout)
    whb = jnp.asarray(_block_diag_np(wh, B))          # (B*Hout, B*Hin)

    x_2d = x_flat.reshape(NC * Hin, Win)

    out_2d = pl.pallas_call(
        _resize_kernel,
        out_shape=jax.ShapeDtypeStruct((NC * Hout, Wout), x_flat.dtype),
        grid_spec=pltpu.PrefetchScalarGridSpec(
            num_scalar_prefetch=0,
            grid=(G,),
            in_specs=[
                pl.BlockSpec((B * Hin, Win), lambda i: (i, 0)),
                pl.BlockSpec((Win, Wout), lambda i: (0, 0)),
                pl.BlockSpec((B * Hout, B * Hin), lambda i: (0, 0)),
            ],
            out_specs=pl.BlockSpec((B * Hout, Wout), lambda i: (i, 0)),
        ),
        compiler_params=pltpu.CompilerParams(
            dimension_semantics=("parallel",),
            vmem_limit_bytes=32 * 1024 * 1024,
        ),
    )(x_2d, wwt, whb)

    return out_2d.reshape(NC, Hout, Wout)


def _bilinear_resize_nchw(x: jnp.ndarray, out_size: int) -> jnp.ndarray:
    N, C, Hin, Win = x.shape
    out = _bilinear_resize_flat(x.reshape(N * C, Hin, Win), int(out_size))
    return out.reshape(N, C, out_size, out_size)


class Resize:
    """JAX/Pallas equivalent of the PyTorch Resize module."""

    def __init__(self):
        self.sizes = [i for i in range(192, 296, 8)]

    def __call__(self, input_tensor, other_tensor=None):
        # TODO(synk): output size is chosen with host-side Python random at call
        # time (matches the PyTorch module); each size compiles once via jit.
        output_size = int(_pyrandom.choice(self.sizes))

        if other_tensor is None:
            return _bilinear_resize_nchw(input_tensor, output_size)

        same_spatial = (input_tensor.shape[2:] == other_tensor.shape[2:]
                        and input_tensor.dtype == other_tensor.dtype)
        if same_spatial:
            # Fuse both tensors into one pallas_call (shared Wh/Ww, one launch).
            N1, C1, Hin, Win = input_tensor.shape
            N2, C2, _, _ = other_tensor.shape
            fused = jnp.concatenate(
                [input_tensor.reshape(N1 * C1, Hin, Win),
                 other_tensor.reshape(N2 * C2, Hin, Win)], axis=0)
            out = _bilinear_resize_flat(fused, output_size)
            o1 = out[: N1 * C1].reshape(N1, C1, output_size, output_size)
            o2 = out[N1 * C1:].reshape(N2, C2, output_size, output_size)
            return (o1, o2)

        return (_bilinear_resize_nchw(input_tensor, output_size),
                _bilinear_resize_nchw(other_tensor, output_size))


if __name__ == "__main__":
    # Deterministic choice of output size.
    _pyrandom.seed(0)

    key = jax.random.PRNGKey(0)
    k1, k2 = jax.random.split(key)
    x = jax.random.normal(k1, (2, 4, 16, 16), dtype=jnp.float32)
    other = jax.random.normal(k2, (2, 4, 16, 16), dtype=jnp.float32)

    module = Resize()
    out_x, out_other = module(x, other)
    jax.block_until_ready(out_x)
    jax.block_until_ready(out_other)

    # Sanity checks: square output size from the list, same N/C.
    assert out_x.shape[0] == 2 and out_x.shape[1] == 4
    assert out_x.shape[2] == out_x.shape[3]
    assert out_x.shape[2] in module.sizes
    assert out_other.shape == out_x.shape

    # Corner-value check (align_corners=True preserves corner pixels exactly).
    assert jnp.allclose(out_x[:, :, 0, 0], x[:, :, 0, 0], atol=1e-5)
    assert jnp.allclose(out_x[:, :, -1, -1], x[:, :, -1, -1], atol=1e-5)
    assert jnp.allclose(out_other[:, :, 0, 0], other[:, :, 0, 0], atol=1e-5)
    assert jnp.allclose(out_other[:, :, -1, -1], other[:, :, -1, -1], atol=1e-5)

    # Single-tensor path also works.
    out_single = module(x)
    jax.block_until_ready(out_single)
    assert out_single.shape[2] in module.sizes

    print("KERNEL_OK")
</pallas_src>

<mosaic_0001>
module attributes {stable_mosaic.version = 11 : i64} {
  func.func @_resize_kernel(%arg0: i32, %arg1: memref<128x16xf32, #tpu.memory_space<vmem>>, %arg2: memref<16x240xf32, #tpu.memory_space<vmem>>, %arg3: memref<1920x128xf32, #tpu.memory_space<vmem>>, %arg4: memref<1920x240xf32, #tpu.memory_space<vmem>>) attributes {dimension_semantics = [#tpu.dimension_semantics<parallel>], iteration_bounds = array<i64: 2>, scalar_prefetch = 0 : i64, scratch_operands = 0 : i64, tpu.core_type = #tpu.core_type<tc>, window_params = [{transform_indices = @transform_0, window_bounds = array<i64: 128, 16>}, {pipeline_mode = #tpu.pipeline_mode<synchronous>, transform_indices = @transform_1, window_bounds = array<i64: 16, 240>}, {pipeline_mode = #tpu.pipeline_mode<synchronous>, transform_indices = @transform_2, window_bounds = array<i64: 1920, 128>}, {transform_indices = @transform_3, window_bounds = array<i64: 1920, 240>}]} {
    %c0 = arith.constant 0 : index
    %c0_0 = arith.constant 0 : index
    %0 = vector.load %arg1[%c0, %c0_0] : memref<128x16xf32, #tpu.memory_space<vmem>>, vector<128x16xf32>
    %c0_1 = arith.constant 0 : index
    %c0_2 = arith.constant 0 : index
    %1 = vector.load %arg2[%c0_1, %c0_2] : memref<16x240xf32, #tpu.memory_space<vmem>>, vector<16x240xf32>
    %cst = arith.constant dense<0.000000e+00> : vector<128x240xf32>
    %2 = tpu.matmul %0, %1, %cst {dimension_numbers = #tpu.dot_dimension_numbers<[1], [0], [0], [1], [0, 0, 1, 1], [], []>} : vector<128x16xf32>, vector<16x240xf32>, vector<128x240xf32> -> vector<128x240xf32>
    %c0_3 = arith.constant 0 : index
    %c0_4 = arith.constant 0 : index
    %3 = vector.load %arg3[%c0_3, %c0_4] : memref<1920x128xf32, #tpu.memory_space<vmem>>, vector<1920x128xf32>
    %cst_5 = arith.constant dense<0.000000e+00> : vector<1920x240xf32>
    %4 = tpu.matmul %3, %2, %cst_5 {dimension_numbers = #tpu.dot_dimension_numbers<[1], [0], [0], [1], [0, 0, 1, 1], [], []>} : vector<1920x128xf32>, vector<128x240xf32>, vector<1920x240xf32> -> vector<1920x240xf32>
    %c0_6 = arith.constant 0 : index
    %c0_7 = arith.constant 0 : index
    %5 = vector.load %arg4[%c0_6, %c0_7] : memref<1920x240xf32, #tpu.memory_space<vmem>>, vector<1920x240xf32>
    tpu.vector_store %arg4[%c0_6, %c0_7], %4 {strides = array<i32>} : memref<1920x240xf32, #tpu.memory_space<vmem>>, vector<1920x240xf32>,
    return
  }
  func.func @transform_0(%arg0: i32) -> (i32, i32) {
    %c0_i32 = arith.constant 0 : i32
    %c0_i32_0 = arith.constant 0 : i32
    return %arg0, %c0_i32 : i32, i32
  }
  func.func @transform_1(%arg0: i32) -> (i32, i32) {
    %c0_i32 = arith.constant 0 : i32
    %c0_i32_0 = arith.constant 0 : i32
    %c0_i32_1 = arith.constant 0 : i32
    return %c0_i32, %c0_i32_0 : i32, i32
  }
  func.func @transform_2(%arg0: i32) -> (i32, i32) {
    %c0_i32 = arith.constant 0 : i32
    %c0_i32_0 = arith.constant 0 : i32
    %c0_i32_1 = arith.constant 0 : i32
    return %c0_i32, %c0_i32_0 : i32, i32
  }
  func.func @transform_3(%arg0: i32) -> (i32, i32) {
    %c0_i32 = arith.constant 0 : i32
    %c0_i32_0 = arith.constant 0 : i32
    return %arg0, %c0_i32 : i32, i32
  }
}

</mosaic_0001>

<bundles_post_ra>
// kernel: _bilinear_resize_flat.1
= control target key start
LH: loop header
LB: loop body
LE: loop exit
PB: predicated region body
PF: predicated region fallthrough
CT: control target
= control target key end

     0   :  { %8 = vsyncpa [#allocation3], 0  ;;  %s4042_s0 = inlined_call_operand.hbm [shape: f32[256,16], index: 0, kind: input, shape index: {}]   ;;  %s4043_s1 = inlined_call_operand.hbm [shape: f32[16,240], index: 1, kind: input, shape index: {}]   ;;  %s4044_s2 = inlined_call_operand.hbm [shape: f32[1920,128], index: 2, kind: input, shape index: {}]   ;;  %s4045_s3 = inlined_call_operand.hbm [shape: f32[3840,240], index: 3, kind: output, shape index: {}]  }
   0x1   :  { %10 = vsyncpa [#allocation3 + $0x1], 0 }
   0x2   :  { %11 = vsyncpa [#allocation6], 0 }
   0x3   :  { %12 = vsyncpa [#allocation4], 0 }
   0x4   :  { %14 = vsyncpa [#allocation4 + $0x1], 0  ;;  %s3077_s12 = smov 0   ;;  %s3079_s13 = smov 0  }
   0x5   :  { %s3081_s14 = smov 0   ;;  %s3083_s15 = smov 0  }
   0x6 LB: > { %s3098_s16 = sadd.s32 4294967295, %s3047_s15   ;;  %s2729_s17 = sadd.s32 4294967294, %s3047_s15   ;;  %s3047_s15 = sphi %s3083_s15, %s4055_s15   ;;  %s3043_s14 = sphi %s3081_s14, %s4054_s14   ;;  %s3039_s13 = sphi %s3079_s13, %s4053_s13   ;;  %s3035_s12 = sphi %s3077_s12, %s4052_s12  }
   0x7   : > { %p40_p0 = scmp.ne.s32.totalorder %s3039_s13, %s3035_s12  ;;  %p41_p1 = scmp.eq.s32.totalorder %s3098_s16, 0 }
   0x8   : > { %p106_p2 = scmp.eq.s32.totalorder %s3098_s16, 1  ;;  %p112_p3 = scmp.eq.s32.totalorder %s2729_s17, 1 }
   0x9   : > { %p3107_p4 = por %p41_p1, %p40_p0  ;;  %p2730_p5 = scmp.ge.s32.totalorder %s3047_s15, 1 }
   0xa   : > { %p3112_p6 = por %p112_p3, %p40_p0  ;;  %p119_p7 = scmp.lt.s32.totalorder %s3047_s15, 3 }
   0xb   : > { %s130_s22 = sshll.u32 %s4043_s1, 4  ;;  %s3049_s24 = smov [#allocation5]   ;;  %s131_s22 = int_to_ptr.hbm [resolvable:$true] %s130_s22 }
   0xc   : > { %p3120_p8 = pnand %p2730_p5, %p119_p7  ;;  %s132_s25 = sshll.u32 %s3049_s24, 4  ;;  %s133_s25 = int_to_ptr.vmem [resolvable:$true] %s132_s25 }
   0xd   : > { %s144_s28 = sshll.u32 %s4044_s2, 4  ;;  %s3050_s29 = smov 256   ;;  %s145_s28 = int_to_ptr.hbm [resolvable:$true] %s144_s28 }
   0xe   : > { %p2826_p9 = pneg %p3120_p8  ;;  %s3051_s30 = smov 16  }
   0xf   : > { %s3052_s4 = smov [#allocation7]   ;;  %s3053_s6 = smov 128  }
  0x10   : > { %p2827_p10 = pnand %p2826_p9, %p41_p1  ;;  %s146_s5 = sshll.u32 %s3052_s4, 4  ;;  %s147_s5 = int_to_ptr.vmem [resolvable:$true] %s146_s5 }
  0x11   : > { %s3054_s7 = smov 8   ;;  %s3136_s8 = sadd.s32 1, %s3047_s15  }
  0x12   : > { %2829 = dma.hbm_to_vmem [thread:$0]  (!%p2827_p10), %s131_s22, 512, %s133_s25, [#allocation6], %s3050_s29, %s3050_s29, %s3051_s30  }
  0x13   : > { %2832 = dma.hbm_to_vmem [thread:$0]  (!%p2827_p10), %s145_s28, 30720, %s147_s5, [#allocation6], %s3053_s6, %s3053_s6, %s3054_s7  }
  0x14   : > { %s24_s9 = ssub.s32 %s3047_s15, %s3136_s8  ;;  %s27_s10 = sadd.s32 1, %s3043_s14 }
  0x15   : > { %p25_p12 = scmp.eq.s32.totalorder %s24_s9, 0  ;;  %p34_p13 = scmp.ne.s32.totalorder %s3043_s14, %s3039_s13 }
  0x16   : > { %p35_p0 = scmp.eq.s32.totalorder %s3047_s15, 0  ;;  %p2843_p7 = scmp.lt.s32.totalorder %s3047_s15, 2 }
  0x17   : > { %s3145_s11 = scalar_select %p25_p12, %s3043_s14, %s27_s10  }
  0x18   : > { %p36_p3 = por %p35_p0, %p34_p13  ;;  %p3149_p5 = por %p106_p2, %p34_p13 }
  0x19   : > { %s160_s20 = sand.u32 1, %s3043_s14   ;;  %s2777_s22 = sshll.u32 %s3047_s15, 7 }
  0x1a   : > { %s2734_s21 = sshll.u32 %s160_s20, 7  ;;  %s169_s26 = scalar_lea.hbm %s4042_s0, %s2777_s22 }
  0x1b   : > { %s164_s27 = scalar_lea.vmem [#allocation2], %s2734_s21  ;;  %s170_s29 = sshll.u32 %s169_s26, 4  ;;  %s171_s29 = int_to_ptr.hbm [resolvable:$true] %s170_s29 }
  0x1c   : > { %s172_s28 = sshll.u32 %s164_s27, 4  ;;  %p3159_p9 = pnand %p2843_p7, %p36_p3  ;;  %s173_s28 = int_to_ptr.vmem [resolvable:$true] %s172_s28 }
  0x1d   : > { %s161_s4 = scalar_lea.sflag [#allocation3], %s160_s20  ;;  %s2947_s5 = sshra.s32 %s171_s29, 4  ;;  %s2948_s5 = int_to_ptr.hbm [resolvable:$true] %s2947_s5 }
  0x1e   : > { %s2949_s9 = scalar_lea.hbm %s2948_s5, 128  ;;  %p2951_p10 = pneg %p3159_p9 }
  0x1f   : > { %p2950_p2 = scmp.ne.s32.totalorder %s2948_s5, %s2949_s9  ;;  %s2954_s22 = scalar_lea.hbm %s4042_s0, 256 }
  0x20   : > { %p2955_p0 = scmp.lt.s32.totalorder %s2948_s5, %s4042_s0  ;;  %p2956_p3 = scmp.lt.s32.totalorder %s2954_s22, %s2949_s9 }
  0x21   : > { %p2952_p12 = pnand %p2951_p10, %p2950_p2 }
  0x22   : > { %p2957_p7 = por %p2956_p3, %p2955_p0 }
  0x23   : > { %p2953_p13 = pneg %p2952_p12 }
  0x25   : > { %p2958_p11 = pnand %p2957_p7, %p2953_p13 }
  0x27   : > { %2961 = shalt.err (!%p2958_p11)
}
  0x28   : > { %2836 = dma.hbm_to_vmem [thread:$0]  (!%p3159_p9), %s171_s29, 2048, %s173_s28, %s161_s4, %s3053_s6, %s3053_s6, %s3054_s7  }
  0x29   : > { %184 = sbr.rel (%p3120_p8) target bundleno = 1476 (0x5c4), region = 32  ;;  %s3179_s20 = sand.u32 (!%p3120_p8), 1, %s3039_s13  }
  0x2a   : > { %s2738_s26 = sshll.u32 (!%p3120_p8), %s3179_s20, 7  ;;  %s187_s27 = scalar_lea.sflag (!%p3120_p8), [#allocation3], %s3179_s20 }
  0x2b   : > { %s3183_s5 = scalar_lea.vmem (!%p3120_p8), [#allocation2], %s2738_s26 }
  0x2e   : > { %3022 = dma.done.wait (%p3107_p4), %s187_s27, 2048  }
  0x2f   : > { %3024 = vsyncadd (%p3107_p4), %s187_s27, 4294965248 }
  0x30   : > { %3026 = dma.done.wait (%p41_p1), [#allocation6], 31232  }
  0x31   : > { %3028 = vsyncadd (%p41_p1), [#allocation6], 4294936064  ;;  %v244_v0 = vld [vmem:[#allocation5 + $0x10] sm:$0xff]  ;;  %v245_v1 = vld [vmem:[#allocation5 + $0x18] sm:$0xff]  ;;  %vm246_vm0 = vcmask 130048   ;;  %s2813_s18 = smul.u32 3840, %s3179_s20 }
  0x32   : > { %v242_v2 = vld [vmem:[#allocation5] sm:$0xff]  ;;  %309 = vmatpush.msra.mxu0 %v244_v0  ;;  %374 = vmatpush.msra.mxu1 %v245_v1  ;;  %v243_v3 = vld [vmem:[#allocation5 + $0x8] sm:$0xff]  ;;  %v228_v6 = vld [vmem:[%s3183_s5 + $0x10] sm:$0xff]  ;;  %vm2140_vm1 = vcmask 916480   ;;  %s2780_s6 = smul.u32 3840, %s3098_s16  ;;  %s2621_s16 = scalar_lea.sflag [#allocation4], %s3179_s20 }
  0x33   : > { %v226_v4 = vld [vmem:[%s3183_s5] sm:$0xff]  ;;  %v227_v5 = vld [vmem:[%s3183_s5 + $0x8] sm:$0xff]  ;;  %v229_v7 = vld [vmem:[%s3183_s5 + $0x18] sm:$0xff]  ;;  %s3286_s23 = scalar_lea.vmem [#allocation8], %s2813_s18  ;;  %s2997_s24 = scalar_lea.hbm %s4045_s3, 7680 }
  0x34   : > { %310 = vmatpush.msra.mxu0 %v242_v2  ;;  %375 = vmatpush.msra.mxu1 %v243_v3  ;;  %v230_v8 = vld [vmem:[%s3183_s5 + $0x20] sm:$0xff]  ;;  %v231_v9 = vld [vmem:[%s3183_s5 + $0x28] sm:$0xff]  ;;  %v232_v10 = vld [vmem:[%s3183_s5 + $0x30] sm:$0xff]  ;;  %s2633_s29 = scalar_lea.hbm %s4045_s3, %s2780_s6  ;;  %s2634_s30 = sshll.u32 %s3286_s23, 4  ;;  %s2635_s30 = int_to_ptr.vmem [resolvable:$true] %s2634_s30 }
  0x35   : > { %2741 = vmatmul.msk.f32.vlgmr.msra.gmra.mxu0 %vm246_vm0, %v226_v4  ;;  %2757 = vmatmul.msk.f32.vlgmr.msra.gmra.mxu1 %vm246_vm0, %v226_v4  ;;  %v233_v11 = vld [vmem:[%s3183_s5 + $0x38] sm:$0xff]  ;;  %v234_v12 = vld [vmem:[%s3183_s5 + $0x40] sm:$0xff]  ;;  %v235_v13 = vld [vmem:[%s3183_s5 + $0x48] sm:$0xff]  ;;  %s2636_s4 = sshll.u32 %s2633_s29, 4  ;;  %s2637_s4 = int_to_ptr.hbm [resolvable:$true] %s2636_s4 }
  0x36   : > { %v236_v14 = vld [vmem:[%s3183_s5 + $0x50] sm:$0xff]  ;;  %v237_v15 = vld [vmem:[%s3183_s5 + $0x58] sm:$0xff]  ;;  %v238_v16 = vld [vmem:[%s3183_s5 + $0x60] sm:$0xff]  ;;  %s2991_s9 = sshra.s32 %s2637_s4, 4  ;;  %s2992_s9 = int_to_ptr.hbm [resolvable:$true] %s2991_s9 }
  0x37   : > { %v239_v17 = vld [vmem:[%s3183_s5 + $0x68] sm:$0xff]  ;;  %v240_v18 = vld [vmem:[%s3183_s5 + $0x70] sm:$0xff]  ;;  %v241_v19 = vld [vmem:[%s3183_s5 + $0x78] sm:$0xff]  ;;  %s2993_s10 = scalar_lea.hbm %s2992_s9, 3840  ;;  %p2998_p11 = scmp.lt.s32.totalorder %s2992_s9, %s4045_s3 }
  0x38   : > { %v538_v52 = vld [vmem:[#allocation7 + $0x388] sm:$0xff]  ;;  %v539_v53 = vld [vmem:[#allocation7 + $0x390] sm:$0xff]  ;;  %v540_v54 = vld [vmem:[#allocation7 + $0x398] sm:$0xff]  ;;  %p2994_p1 = scmp.ne.s32.totalorder %s2992_s9, %s2993_s10  ;;  %p2999_p9 = scmp.lt.s32.totalorder %s2997_s24, %s2993_s10 }
  0x39   : > { %v541_v55 = vld [vmem:[#allocation7 + $0x3a0] sm:$0xff]  ;;  %v542_v56 = vld [vmem:[#allocation7 + $0x3a8] sm:$0xff]  ;;  %v543_v57 = vld [vmem:[#allocation7 + $0x3b0] sm:$0xff] }
  0x3a   : > { %v544_v58 = vld [vmem:[#allocation7 + $0x3b8] sm:$0xff]  ;;  %v545_v59 = vld [vmem:[#allocation7 + $0x3c0] sm:$0xff]  ;;  %v546_v60 = vld [vmem:[#allocation7 + $0x3c8] sm:$0xff]  ;;  %p2995_p4 = pnand %p2994_p1, %p3149_p5  ;;  %p3000_p2 = por %p2999_p9, %p2998_p11 }
  0x3b   : > { %v547_v61 = vld [vmem:[#allocation7 + $0x3d0] sm:$0xff]  ;;  %v548_v62 = vld [vmem:[#allocation7 + $0x3d8] sm:$0xff]  ;;  %v425_v63 = vld [vmem:[#allocation7] sm:$0xff] }
  0x3c   : > { %v549_v0 = vld [vmem:[#allocation7 + $0x3e0] sm:$0xff]  ;;  %v426_v1 = vld [vmem:[#allocation7 + $0x8] sm:$0xff]  ;;  %v551_v3 = vld [vmem:[#allocation7 + $0x3f0] sm:$0xff]  ;;  %p2996_p8 = pneg %p2995_p4 }
  0x3d   : > { %2742 = vmatmul.msk.f32.gmra.mxu0 %vm246_vm0, %v227_v5  ;;  %2758 = vmatmul.msk.f32.gmra.mxu1 %vm246_vm0, %v227_v5  ;;  %v550_v2 = vld [vmem:[#allocation7 + $0x3e8] sm:$0xff]  ;;  %v427_v4 = vld [vmem:[#allocation7 + $0x10] sm:$0xff]  ;;  %v552_v5 = vld [vmem:[#allocation7 + $0x3f8] sm:$0xff] }
  0x3e   : > { %p3001_p10 = pnand %p3000_p2, %p2996_p8 }
  0x45   : > { %2743 = vmatmul.msk.f32.gmra.mxu0 %vm246_vm0, %v228_v6  ;;  %2759 = vmatmul.msk.f32.gmra.mxu1 %vm246_vm0, %v228_v6  ;;  %v428_v6 = vld [vmem:[#allocation7 + $0x18] sm:$0xff] }
  0x4d   : > { %2744 = vmatmul.msk.f32.gmra.mxu0 %vm246_vm0, %v229_v7  ;;  %2760 = vmatmul.msk.f32.gmra.mxu1 %vm246_vm0, %v229_v7  ;;  %v553_v7 = vld [vmem:[#allocation7 + $0x400] sm:$0xff] }
  0x55   : > { %2745 = vmatmul.msk.f32.gmra.mxu0 %vm246_vm0, %v230_v8  ;;  %2761 = vmatmul.msk.f32.gmra.mxu1 %vm246_vm0, %v230_v8  ;;  %v429_v8 = vld [vmem:[#allocation7 + $0x20] sm:$0xff] }
  0x5d   : > { %2746 = vmatmul.msk.f32.gmra.mxu0 %vm246_vm0, %v231_v9  ;;  %2762 = vmatmul.msk.f32.gmra.mxu1 %vm246_vm0, %v231_v9  ;;  %v554_v9 = vld [vmem:[#allocation7 + $0x408] sm:$0xff] }
  0x65   : > { %2747 = vmatmul.msk.f32.gmra.mxu0 %vm246_vm0, %v232_v10  ;;  %2763 = vmatmul.msk.f32.gmra.mxu1 %vm246_vm0, %v232_v10  ;;  %v430_v10 = vld [vmem:[#allocation7 + $0x28] sm:$0xff] }
  0x6d   : > { %2748 = vmatmul.msk.f32.gmra.mxu0 %vm246_vm0, %v233_v11  ;;  %2764 = vmatmul.msk.f32.gmra.mxu1 %vm246_vm0, %v233_v11 }
  0x75   : > { %2749 = vmatmul.msk.f32.gmra.mxu0 %vm246_vm0, %v234_v12  ;;  %2765 = vmatmul.msk.f32.gmra.mxu1 %vm246_vm0, %v234_v12 }
  0x7d   : > { %2750 = vmatmul.msk.f32.gmra.mxu0 %vm246_vm0, %v235_v13  ;;  %2766 = vmatmul.msk.f32.gmra.mxu1 %vm246_vm0, %v235_v13  ;;  %v555_v13 = vld [vmem:[#allocation7 + $0x410] sm:$0xff] }
  0x85   : > { %2751 = vmatmul.msk.f32.gmra.mxu0 %vm246_vm0, %v236_v14  ;;  %2767 = vmatmul.msk.f32.gmra.mxu1 %vm246_vm0, %v236_v14  ;;  %v431_v14 = vld [vmem:[#allocation7 + $0x30] sm:$0xff] }
  0x8d   : > { %2752 = vmatmul.msk.f32.gmra.mxu0 %vm246_vm0, %v237_v15  ;;  %2768 = vmatmul.msk.f32.gmra.mxu1 %vm246_vm0, %v237_v15 }
  0x95   : > { %2753 = vmatmul.msk.f32.gmra.mxu0 %vm246_vm0, %v238_v16  ;;  %2769 = vmatmul.msk.f32.gmra.mxu1 %vm246_vm0, %v238_v16 }
  0x9d   : > { %2754 = vmatmul.msk.f32.gmra.mxu0 %vm246_vm0, %v239_v17  ;;  %2770 = vmatmul.msk.f32.gmra.mxu1 %vm246_vm0, %v239_v17  ;;  %v556_v17 = vld [vmem:[#allocation7 + $0x418] sm:$0xff] }
  0xa5   : > { %2755 = vmatmul.msk.f32.gmra.mxu0 %vm246_vm0, %v240_v18  ;;  %2771 = vmatmul.msk.f32.gmra.mxu1 %vm246_vm0, %v240_v18  ;;  %v432_v18 = vld [vmem:[#allocation7 + $0x38] sm:$0xff] }
  0xad   : > { %2756 = vmatmul.msk.f32.gmra.mxu0 %vm246_vm0, %v241_v19  ;;  %2772 = vmatmul.msk.f32.gmra.mxu1 %vm246_vm0, %v241_v19 }
  0xb2   : > { %v3241_v20 = vpop.f32.mrf.mxu0  ;;  %v3243_v21 = vpop.f32.mrf.mxu1 }
  0xba   : > { %v3245_v22 = vpop.f32.mrf.mxu0  ;;  %v3247_v23 = vpop.f32.mrf.mxu1 }
  0xc2   : > { %v3249_v24 = vpop.f32.mrf.mxu0  ;;  %v3251_v25 = vpop.f32.mrf.mxu1 }
  0xca   : > { %v3253_v26 = vpop.f32.mrf.mxu0  ;;  %v3255_v27 = vpop.f32.mrf.mxu1 }
  0xd2   : > { %v3257_v28 = vpop.f32.mrf.mxu0  ;;  %v3259_v29 = vpop.f32.mrf.mxu1 }
  0xda   : > { %v327_v30 = vpop.f32.mrf.mxu0  ;;  %v3261_v31 = vpop.f32.mrf.mxu1 }
  0xe2   : > { %v330_v32 = vpop.f32.mrf.mxu0  ;;  %v395_v33 = vpop.f32.mrf.mxu1 }
  0xea   : > { %v333_v34 = vpop.f32.mrf.mxu0  ;;  %v398_v35 = vpop.f32.mrf.mxu1 }
  0xf2   : > { %v336_v36 = vpop.f32.mrf.mxu0  ;;  %v401_v37 = vpop.f32.mrf.mxu1 }
  0xfa   : > { %v339_v38 = vpop.f32.mrf.mxu0  ;;  %v404_v39 = vpop.f32.mrf.mxu1 }
 0x102   : > { %v342_v40 = vpop.f32.mrf.mxu0  ;;  %v407_v41 = vpop.f32.mrf.mxu1 }
 0x10a   : > { %v345_v42 = vpop.f32.mrf.mxu0  ;;  %v410_v43 = vpop.f32.mrf.mxu1 }
 0x112   : > { %v348_v44 = vpop.f32.mrf.mxu0  ;;  %v413_v45 = vpop.f32.mrf.mxu1 }
 0x11a   : > { %v351_v46 = vpop.f32.mrf.mxu0  ;;  %v416_v47 = vpop.f32.mrf.mxu1 }
 0x122   : > { %v354_v48 = vpop.f32.mrf.mxu0  ;;  %v419_v49 = vpop.f32.mrf.mxu1 }
 0x12a   : > { %v357_v50 = vpop.f32.mrf.mxu0  ;;  %v422_v51 = vpop.f32.mrf.mxu1 }
 0x12b   : > { %665 = vmatpush.msrb.mxu0 %v357_v50  ;;  %2781 = vmatpush.msra.mxu2 %v357_v50  ;;  %v440_v50 = vld [vmem:[#allocation7 + $0x78] sm:$0xff] }
 0x12c   : > { %1402 = vmatpush.msrb.mxu1 %v422_v51  ;;  %2797 = vmatpush.msra.mxu3 %v422_v51 }
 0x12d   : > { %666 = vmatpush.msrb.mxu0 %v354_v48  ;;  %2782 = vmatpush.msra.mxu2 %v354_v48 }
 0x12e   : > { %1403 = vmatpush.msrb.mxu1 %v419_v49  ;;  %2798 = vmatpush.msra.mxu3 %v419_v49  ;;  %v564_v49 = vld [vmem:[#allocation7 + $0x458] sm:$0xff] }
 0x12f   : > { %667 = vmatpush.msrb.mxu0 %v351_v46  ;;  %2783 = vmatpush.msra.mxu2 %v351_v46  ;;  %v439_v46 = vld [vmem:[#allocation7 + $0x70] sm:$0xff] }
 0x130   : > { %1404 = vmatpush.msrb.mxu1 %v416_v47  ;;  %2799 = vmatpush.msra.mxu3 %v416_v47 }
 0x131   : > { %668 = vmatpush.msrb.mxu0 %v348_v44  ;;  %2784 = vmatpush.msra.mxu2 %v348_v44 }
 0x132   : > { %1405 = vmatpush.msrb.mxu1 %v413_v45  ;;  %2800 = vmatpush.msra.mxu3 %v413_v45  ;;  %v563_v45 = vld [vmem:[#allocation7 + $0x450] sm:$0xff] }
 0x133   : > { %669 = vmatpush.msrb.mxu0 %v345_v42  ;;  %2785 = vmatpush.msra.mxu2 %v345_v42  ;;  %v438_v42 = vld [vmem:[#allocation7 + $0x68] sm:$0xff] }
 0x134   : > { %1406 = vmatpush.msrb.mxu1 %v410_v43  ;;  %2801 = vmatpush.msra.mxu3 %v410_v43 }
 0x135   : > { %670 = vmatpush.msrb.mxu0 %v342_v40  ;;  %2786 = vmatpush.msra.mxu2 %v342_v40 }
 0x136   : > { %1407 = vmatpush.msrb.mxu1 %v407_v41  ;;  %2802 = vmatpush.msra.mxu3 %v407_v41  ;;  %v562_v41 = vld [vmem:[#allocation7 + $0x448] sm:$0xff] }
 0x137   : > { %671 = vmatpush.msrb.mxu0 %v339_v38  ;;  %2787 = vmatpush.msra.mxu2 %v339_v38  ;;  %v437_v38 = vld [vmem:[#allocation7 + $0x60] sm:$0xff] }
 0x138   : > { %1408 = vmatpush.msrb.mxu1 %v404_v39  ;;  %2803 = vmatpush.msra.mxu3 %v404_v39 }
 0x139   : > { %672 = vmatpush.msrb.mxu0 %v336_v36  ;;  %2788 = vmatpush.msra.mxu2 %v336_v36 }
 0x13a   : > { %1409 = vmatpush.msrb.mxu1 %v401_v37  ;;  %2804 = vmatpush.msra.mxu3 %v401_v37  ;;  %v561_v37 = vld [vmem:[#allocation7 + $0x440] sm:$0xff] }
 0x13b   : > { %673 = vmatpush.msrb.mxu0 %v333_v34  ;;  %2789 = vmatpush.msra.mxu2 %v333_v34  ;;  %v436_v34 = vld [vmem:[#allocation7 + $0x58] sm:$0xff] }
 0x13c   : > { %1410 = vmatpush.msrb.mxu1 %v398_v35  ;;  %2805 = vmatpush.msra.mxu3 %v398_v35 }
 0x13d   : > { %674 = vmatpush.msrb.mxu0 %v330_v32  ;;  %2790 = vmatpush.msra.mxu2 %v330_v32 }
 0x13e   : > { %1411 = vmatpush.msrb.mxu1 %v395_v33  ;;  %2806 = vmatpush.msra.mxu3 %v395_v33  ;;  %v560_v33 = vld [vmem:[#allocation7 + $0x438] sm:$0xff] }
 0x13f   : > { %675 = vmatpush.msrb.mxu0 %v327_v30  ;;  %2791 = vmatpush.msra.mxu2 %v327_v30  ;;  %v435_v30 = vld [vmem:[#allocation7 + $0x50] sm:$0xff] }
 0x140   : > { %1412 = vmatpush.msrb.mxu1 %v3261_v31  ;;  %2807 = vmatpush.msra.mxu3 %v3261_v31 }
 0x141   : > { %676 = vmatpush.msrb.mxu0 %v3257_v28  ;;  %2792 = vmatpush.msra.mxu2 %v3257_v28 }
 0x142   : > { %1413 = vmatpush.msrb.mxu1 %v3259_v29  ;;  %2808 = vmatpush.msra.mxu3 %v3259_v29  ;;  %v559_v29 = vld [vmem:[#allocation7 + $0x430] sm:$0xff] }
 0x143   : > { %677 = vmatpush.msrb.mxu0 %v3253_v26  ;;  %2793 = vmatpush.msra.mxu2 %v3253_v26  ;;  %v434_v26 = vld [vmem:[#allocation7 + $0x48] sm:$0xff] }
 0x144   : > { %1414 = vmatpush.msrb.mxu1 %v3255_v27  ;;  %2809 = vmatpush.msra.mxu3 %v3255_v27 }
 0x145   : > { %678 = vmatpush.msrb.mxu0 %v3249_v24  ;;  %2794 = vmatpush.msra.mxu2 %v3249_v24 }
 0x146   : > { %1415 = vmatpush.msrb.mxu1 %v3251_v25  ;;  %2810 = vmatpush.msra.mxu3 %v3251_v25  ;;  %v558_v25 = vld [vmem:[#allocation7 + $0x428] sm:$0xff] }
 0x147   : > { %679 = vmatpush.msrb.mxu0 %v3245_v22  ;;  %2795 = vmatpush.msra.mxu2 %v3245_v22  ;;  %v433_v22 = vld [vmem:[#allocation7 + $0x40] sm:$0xff] }
 0x148   : > { %1416 = vmatpush.msrb.mxu1 %v3247_v23  ;;  %2811 = vmatpush.msra.mxu3 %v3247_v23 }
 0x149   : > { %680 = vmatpush.msrb.mxu0 %v3241_v20  ;;  %2796 = vmatpush.msra.mxu2 %v3241_v20 }
 0x14a   : > { %1417 = vmatpush.msrb.mxu1 %v3243_v21  ;;  %2812 = vmatpush.msra.mxu3 %v3243_v21  ;;  %v557_v21 = vld [vmem:[#allocation7 + $0x420] sm:$0xff] }
 0x14b   : > { %1020 = vmatmul.f32.vlgmr.msra.gmra.mxu2 %v538_v52  ;;  %1757 = vmatmul.f32.vlgmr.msra.gmra.mxu3 %v538_v52 }
 0x14c   : > { %681 = vmatmul.f32.vlgmr.msrb.gmra.mxu0 %v425_v63  ;;  %1418 = vmatmul.f32.vlgmr.msrb.gmra.mxu1 %v425_v63 }
 0x153   : > { %1023 = vmatmul.f32.gmra.mxu2 %v539_v53  ;;  %1760 = vmatmul.f32.gmra.mxu3 %v539_v53 }
 0x154   : > { %684 = vmatmul.f32.gmra.mxu0 %v426_v1  ;;  %1421 = vmatmul.f32.gmra.mxu1 %v426_v1 }
 0x15b   : > { %1026 = vmatmul.f32.gmra.mxu2 %v540_v54  ;;  %1763 = vmatmul.f32.gmra.mxu3 %v540_v54 }
 0x15c   : > { %687 = vmatmul.f32.gmra.mxu0 %v427_v4  ;;  %1424 = vmatmul.f32.gmra.mxu1 %v427_v4  ;;  %v443_v4 = vld [vmem:[#allocation7 + $0x90] sm:$0xff] }
 0x163   : > { %1029 = vmatmul.f32.gmra.mxu2 %v541_v55  ;;  %1766 = vmatmul.f32.gmra.mxu3 %v541_v55  ;;  %v565_v55 = vld [vmem:[#allocation7 + $0x460] sm:$0xff] }
 0x164   : > { %690 = vmatmul.f32.gmra.mxu0 %v428_v6  ;;  %1427 = vmatmul.f32.gmra.mxu1 %v428_v6 }
 0x16b   : > { %1032 = vmatmul.f32.gmra.mxu2 %v542_v56  ;;  %1769 = vmatmul.f32.gmra.mxu3 %v542_v56  ;;  %v441_v56 = vld [vmem:[#allocation7 + $0x80] sm:$0xff] }
 0x16c   : > { %693 = vmatmul.f32.gmra.mxu0 %v429_v8  ;;  %1430 = vmatmul.f32.gmra.mxu1 %v429_v8 }
 0x173   : > { %1035 = vmatmul.f32.gmra.mxu2 %v543_v57  ;;  %1772 = vmatmul.f32.gmra.mxu3 %v543_v57 }
 0x174   : > { %696 = vmatmul.f32.gmra.mxu0 %v430_v10  ;;  %1433 = vmatmul.f32.gmra.mxu1 %v430_v10  ;;  %v444_v10 = vld [vmem:[#allocation7 + $0x98] sm:$0xff] }
 0x17b   : > { %1038 = vmatmul.f32.gmra.mxu2 %v544_v58  ;;  %1775 = vmatmul.f32.gmra.mxu3 %v544_v58 }
 0x17c   : > { %699 = vmatmul.f32.gmra.mxu0 %v431_v14  ;;  %1436 = vmatmul.f32.gmra.mxu1 %v431_v14 }
 0x183   : > { %1041 = vmatmul.f32.gmra.mxu2 %v545_v59  ;;  %1778 = vmatmul.f32.gmra.mxu3 %v545_v59 }
 0x184   : > { %702 = vmatmul.f32.gmra.mxu0 %v432_v18  ;;  %1439 = vmatmul.f32.gmra.mxu1 %v432_v18 }
 0x18b   : > { %1044 = vmatmul.f32.gmra.mxu2 %v546_v60  ;;  %1781 = vmatmul.f32.gmra.mxu3 %v546_v60 }
 0x18c   : > { %705 = vmatmul.f32.gmra.mxu0 %v433_v22  ;;  %1442 = vmatmul.f32.gmra.mxu1 %v433_v22  ;;  %v446_v22 = vld [vmem:[#allocation7 + $0xa8] sm:$0xff] }
 0x193   : > { %1047 = vmatmul.f32.gmra.mxu2 %v547_v61  ;;  %1784 = vmatmul.f32.gmra.mxu3 %v547_v61  ;;  %v566_v61 = vld [vmem:[#allocation7 + $0x468] sm:$0xff] }
 0x194   : > { %708 = vmatmul.f32.gmra.mxu0 %v434_v26  ;;  %1445 = vmatmul.f32.gmra.mxu1 %v434_v26 }
 0x19b   : > { %1050 = vmatmul.f32.gmra.mxu2 %v548_v62  ;;  %1787 = vmatmul.f32.gmra.mxu3 %v548_v62  ;;  %v442_v62 = vld [vmem:[#allocation7 + $0x88] sm:$0xff] }
 0x19c   : > { %711 = vmatmul.f32.gmra.mxu0 %v435_v30  ;;  %1448 = vmatmul.f32.gmra.mxu1 %v435_v30 }
 0x1a3   : > { %1053 = vmatmul.f32.gmra.mxu2 %v549_v0  ;;  %1790 = vmatmul.f32.gmra.mxu3 %v549_v0 }
 0x1a4   : > { %714 = vmatmul.f32.gmra.mxu0 %v436_v34  ;;  %1451 = vmatmul.f32.gmra.mxu1 %v436_v34  ;;  %v448_v34 = vld [vmem:[#allocation7 + $0xb8] sm:$0xff] }
 0x1ab   : > { %1056 = vmatmul.f32.gmra.mxu2 %v550_v2  ;;  %1793 = vmatmul.f32.gmra.mxu3 %v550_v2 }
 0x1ac   : > { %717 = vmatmul.f32.gmra.mxu0 %v437_v38  ;;  %1454 = vmatmul.f32.gmra.mxu1 %v437_v38 }
 0x1b3   : > { %1059 = vmatmul.f32.gmra.mxu2 %v551_v3  ;;  %1796 = vmatmul.f32.gmra.mxu3 %v551_v3  ;;  %v567_v3 = vld [vmem:[#allocation7 + $0x470] sm:$0xff] }
 0x1b4   : > { %720 = vmatmul.f32.gmra.mxu0 %v438_v42  ;;  %1457 = vmatmul.f32.gmra.mxu1 %v438_v42 }
 0x1bb   : > { %1062 = vmatmul.f32.gmra.mxu2 %v552_v5  ;;  %1799 = vmatmul.f32.gmra.mxu3 %v552_v5 }
 0x1bc   : > { %723 = vmatmul.f32.gmra.mxu0 %v439_v46  ;;  %1460 = vmatmul.f32.gmra.mxu1 %v439_v46  ;;  %v450_v46 = vld [vmem:[#allocation7 + $0xc8] sm:$0xff] }
 0x1c3   : > { %1065 = vmatmul.f32.gmra.mxu2 %v553_v7  ;;  %1802 = vmatmul.f32.gmra.mxu3 %v553_v7 }
 0x1c4   : > { %726 = vmatmul.f32.gmra.mxu0 %v440_v50  ;;  %1463 = vmatmul.f32.gmra.mxu1 %v440_v50 }
 0x1c9   : > { %v682_v51 = vpop.f32.mrf.mxu0  ;;  %v1419_v54 = vpop.f32.mrf.mxu1 }
 0x1ca   : > { %2139 = vst [vmem:[%s3286_s23] sm:$0xff] %v682_v51  ;;  %v575_v51 = vld [vmem:[#allocation7 + $0x4b0] sm:$0xff] }
 0x1cb   : > { %1068 = vmatmul.f32.gmra.mxu2 %v554_v9  ;;  %1805 = vmatmul.f32.gmra.mxu3 %v554_v9  ;;  %2141 = vst.msk [vmem:[%s3286_s23 + $0x8] sm:$0xff] %vm2140_vm1, %v1419_v54  ;;  %v568_v9 = vld [vmem:[#allocation7 + $0x478] sm:$0xff] }
 0x1cc   : > { %729 = vmatmul.f32.gmra.mxu0 %v441_v56  ;;  %1466 = vmatmul.f32.gmra.mxu1 %v441_v56 }
 0x1ce   : > { %v1021_v11 = vpop.f32.mrf.mxu2  ;;  %v1758_v12 = vpop.f32.mrf.mxu3 }
 0x1cf   : > { %2366 = vst [vmem:[%s3286_s23 + $0x710] sm:$0xff] %v1021_v11 }
 0x1d0   : > { %2367 = vst.msk [vmem:[%s3286_s23 + $0x718] sm:$0xff] %vm2140_vm1, %v1758_v12 }
 0x1d1   : > { %v685_v57 = vpop.f32.mrf.mxu0  ;;  %v1422_v60 = vpop.f32.mrf.mxu1 }
 0x1d2   : > { %2142 = vst [vmem:[%s3286_s23 + $0x10] sm:$0xff] %v685_v57  ;;  %v576_v57 = vld [vmem:[#allocation7 + $0x4b8] sm:$0xff] }
 0x1d3   : > { %1071 = vmatmul.f32.gmra.mxu2 %v555_v13  ;;  %1808 = vmatmul.f32.gmra.mxu3 %v555_v13  ;;  %2143 = vst.msk [vmem:[%s3286_s23 + $0x18] sm:$0xff] %vm2140_vm1, %v1422_v60 }
 0x1d4   : > { %732 = vmatmul.f32.gmra.mxu0 %v442_v62  ;;  %1469 = vmatmul.f32.gmra.mxu1 %v442_v62 }
 0x1d6   : > { %v1024_v15 = vpop.f32.mrf.mxu2  ;;  %v1761_v16 = vpop.f32.mrf.mxu3 }
 0x1d7   : > { %2368 = vst [vmem:[%s3286_s23 + $0x720] sm:$0xff] %v1024_v15  ;;  %v569_v15 = vld [vmem:[#allocation7 + $0x480] sm:$0xff] }
 0x1d8   : > { %2369 = vst.msk [vmem:[%s3286_s23 + $0x728] sm:$0xff] %vm2140_vm1, %v1761_v16  ;;  %v445_v16 = vld [vmem:[#allocation7 + $0xa0] sm:$0xff] }
 0x1d9   : > { %v688_v1 = vpop.f32.mrf.mxu0  ;;  %v1425_v2 = vpop.f32.mrf.mxu1 }
 0x1da   : > { %2144 = vst [vmem:[%s3286_s23 + $0x20] sm:$0xff] %v688_v1 }
 0x1db   : > { %1074 = vmatmul.f32.gmra.mxu2 %v556_v17  ;;  %1811 = vmatmul.f32.gmra.mxu3 %v556_v17  ;;  %2145 = vst.msk [vmem:[%s3286_s23 + $0x28] sm:$0xff] %vm2140_vm1, %v1425_v2 }
 0x1dc   : > { %735 = vmatmul.f32.gmra.mxu0 %v443_v4  ;;  %1472 = vmatmul.f32.gmra.mxu1 %v443_v4 }
 0x1de   : > { %v1027_v19 = vpop.f32.mrf.mxu2  ;;  %v1764_v20 = vpop.f32.mrf.mxu3 }
 0x1df   : > { %2370 = vst [vmem:[%s3286_s23 + $0x730] sm:$0xff] %v1027_v19 }
 0x1e0   : > { %2371 = vst.msk [vmem:[%s3286_s23 + $0x738] sm:$0xff] %vm2140_vm1, %v1764_v20 }
 0x1e1   : > { %v691_v7 = vpop.f32.mrf.mxu0  ;;  %v1428_v8 = vpop.f32.mrf.mxu1 }
 0x1e2   : > { %2146 = vst [vmem:[%s3286_s23 + $0x30] sm:$0xff] %v691_v7 }
 0x1e3   : > { %1077 = vmatmul.f32.gmra.mxu2 %v557_v21  ;;  %1814 = vmatmul.f32.gmra.mxu3 %v557_v21  ;;  %2147 = vst.msk [vmem:[%s3286_s23 + $0x38] sm:$0xff] %vm2140_vm1, %v1428_v8  ;;  %v570_v21 = vld [vmem:[#allocation7 + $0x488] sm:$0xff] }
 0x1e4   : > { %738 = vmatmul.f32.gmra.mxu0 %v444_v10  ;;  %1475 = vmatmul.f32.gmra.mxu1 %v444_v10 }
 0x1e6   : > { %v1030_v23 = vpop.f32.mrf.mxu2  ;;  %v1767_v24 = vpop.f32.mrf.mxu3 }
 0x1e7   : > { %2372 = vst [vmem:[%s3286_s23 + $0x740] sm:$0xff] %v1030_v23 }
 0x1e8   : > { %2373 = vst.msk [vmem:[%s3286_s23 + $0x748] sm:$0xff] %vm2140_vm1, %v1767_v24 }
 0x1e9   : > { %v694_v13 = vpop.f32.mrf.mxu0  ;;  %v1431_v14 = vpop.f32.mrf.mxu1 }
 0x1ea   : > { %2148 = vst [vmem:[%s3286_s23 + $0x40] sm:$0xff] %v694_v13 }
 0x1eb   : > { %1080 = vmatmul.f32.gmra.mxu2 %v558_v25  ;;  %1817 = vmatmul.f32.gmra.mxu3 %v558_v25  ;;  %2149 = vst.msk [vmem:[%s3286_s23 + $0x48] sm:$0xff] %vm2140_vm1, %v1431_v14 }
 0x1ec   : > { %741 = vmatmul.f32.gmra.mxu0 %v445_v16  ;;  %1478 = vmatmul.f32.gmra.mxu1 %v445_v16 }
 0x1ee   : > { %v1033_v27 = vpop.f32.mrf.mxu2  ;;  %v1770_v28 = vpop.f32.mrf.mxu3 }
 0x1ef   : > { %2374 = vst [vmem:[%s3286_s23 + $0x750] sm:$0xff] %v1033_v27  ;;  %v571_v27 = vld [vmem:[#allocation7 + $0x490] sm:$0xff] }
 0x1f0   : > { %2375 = vst.msk [vmem:[%s3286_s23 + $0x758] sm:$0xff] %vm2140_vm1, %v1770_v28  ;;  %v447_v28 = vld [vmem:[#allocation7 + $0xb0] sm:$0xff] }
 0x1f1   : > { %v697_v19 = vpop.f32.mrf.mxu0  ;;  %v1434_v20 = vpop.f32.mrf.mxu1 }
 0x1f2   : > { %2150 = vst [vmem:[%s3286_s23 + $0x50] sm:$0xff] %v697_v19 }
 0x1f3   : > { %1083 = vmatmul.f32.gmra.mxu2 %v559_v29  ;;  %1820 = vmatmul.f32.gmra.mxu3 %v559_v29  ;;  %2151 = vst.msk [vmem:[%s3286_s23 + $0x58] sm:$0xff] %vm2140_vm1, %v1434_v20 }
 0x1f4   : > { %744 = vmatmul.f32.gmra.mxu0 %v446_v22  ;;  %1481 = vmatmul.f32.gmra.mxu1 %v446_v22 }
 0x1f6   : > { %v1036_v31 = vpop.f32.mrf.mxu2  ;;  %v1773_v32 = vpop.f32.mrf.mxu3 }
 0x1f7   : > { %2376 = vst [vmem:[%s3286_s23 + $0x760] sm:$0xff] %v1036_v31 }
 0x1f8   : > { %2377 = vst.msk [vmem:[%s3286_s23 + $0x768] sm:$0xff] %vm2140_vm1, %v1773_v32 }
 0x1f9   : > { %v700_v25 = vpop.f32.mrf.mxu0  ;;  %v1437_v26 = vpop.f32.mrf.mxu1 }
 0x1fa   : > { %2152 = vst [vmem:[%s3286_s23 + $0x60] sm:$0xff] %v700_v25 }
 0x1fb   : > { %1086 = vmatmul.f32.gmra.mxu2 %v560_v33  ;;  %1823 = vmatmul.f32.gmra.mxu3 %v560_v33  ;;  %2153 = vst.msk [vmem:[%s3286_s23 + $0x68] sm:$0xff] %vm2140_vm1, %v1437_v26  ;;  %v572_v33 = vld [vmem:[#allocation7 + $0x498] sm:$0xff] }
 0x1fc   : > { %747 = vmatmul.f32.gmra.mxu0 %v447_v28  ;;  %1484 = vmatmul.f32.gmra.mxu1 %v447_v28 }
 0x1fe   : > { %v1039_v35 = vpop.f32.mrf.mxu2  ;;  %v1776_v36 = vpop.f32.mrf.mxu3 }
 0x1ff   : > { %2378 = vst [vmem:[%s3286_s23 + $0x770] sm:$0xff] %v1039_v35 }
 0x200   : > { %2379 = vst.msk [vmem:[%s3286_s23 + $0x778] sm:$0xff] %vm2140_vm1, %v1776_v36 }
 0x201   : > { %v703_v31 = vpop.f32.mrf.mxu0  ;;  %v1440_v32 = vpop.f32.mrf.mxu1 }
 0x202   : > { %2154 = vst [vmem:[%s3286_s23 + $0x70] sm:$0xff] %v703_v31 }
 0x203   : > { %1089 = vmatmul.f32.gmra.mxu2 %v561_v37  ;;  %1826 = vmatmul.f32.gmra.mxu3 %v561_v37  ;;  %2155 = vst.msk [vmem:[%s3286_s23 + $0x78] sm:$0xff] %vm2140_vm1, %v1440_v32 }
 0x204   : > { %750 = vmatmul.f32.gmra.mxu0 %v448_v34  ;;  %1487 = vmatmul.f32.gmra.mxu1 %v448_v34 }
 0x206   : > { %v1042_v39 = vpop.f32.mrf.mxu2  ;;  %v1779_v40 = vpop.f32.mrf.mxu3 }
 0x207   : > { %2380 = vst [vmem:[%s3286_s23 + $0x780] sm:$0xff] %v1042_v39  ;;  %v573_v39 = vld [vmem:[#allocation7 + $0x4a0] sm:$0xff] }
 0x208   : > { %2381 = vst.msk [vmem:[%s3286_s23 + $0x788] sm:$0xff] %vm2140_vm1, %v1779_v40  ;;  %v449_v40 = vld [vmem:[#allocation7 + $0xc0] sm:$0xff] }
 0x209   : > { %v706_v37 = vpop.f32.mrf.mxu0  ;;  %v1443_v38 = vpop.f32.mrf.mxu1 }
 0x20a   : > { %2156 = vst [vmem:[%s3286_s23 + $0x80] sm:$0xff] %v706_v37 }
 0x20b   : > { %1092 = vmatmul.f32.gmra.mxu2 %v562_v41  ;;  %1829 = vmatmul.f32.gmra.mxu3 %v562_v41  ;;  %2157 = vst.msk [vmem:[%s3286_s23 + $0x88] sm:$0xff] %vm2140_vm1, %v1443_v38 }
 0x20c   : > { %753 = vmatmul.f32.gmra.mxu0 %v449_v40  ;;  %1490 = vmatmul.f32.gmra.mxu1 %v449_v40 }
 0x20e   : > { %v1045_v43 = vpop.f32.mrf.mxu2  ;;  %v1782_v44 = vpop.f32.mrf.mxu3 }
 0x20f   : > { %2382 = vst [vmem:[%s3286_s23 + $0x790] sm:$0xff] %v1045_v43 }
 0x210   : > { %2383 = vst.msk [vmem:[%s3286_s23 + $0x798] sm:$0xff] %vm2140_vm1, %v1782_v44 }
 0x211   : > { %v709_v43 = vpop.f32.mrf.mxu0  ;;  %v1446_v44 = vpop.f32.mrf.mxu1 }
 0x212   : > { %2158 = vst [vmem:[%s3286_s23 + $0x90] sm:$0xff] %v709_v43 }
 0x213   : > { %1095 = vmatmul.f32.gmra.mxu2 %v563_v45  ;;  %1832 = vmatmul.f32.gmra.mxu3 %v563_v45  ;;  %v574_v45 = vld [vmem:[#allocation7 + $0x4a8] sm:$0xff]  ;;  %2159 = vst.msk [vmem:[%s3286_s23 + $0x98] sm:$0xff] %vm2140_vm1, %v1446_v44 }
 0x214   : > { %756 = vmatmul.f32.gmra.mxu0 %v450_v46  ;;  %1493 = vmatmul.f32.gmra.mxu1 %v450_v46 }
 0x216   : > { %v1048_v47 = vpop.f32.mrf.mxu2  ;;  %v1785_v48 = vpop.f32.mrf.mxu3 }
 0x217   : > { %2384 = vst [vmem:[%s3286_s23 + $0x7a0] sm:$0xff] %v1048_v47 }
 0x218   : > { %2385 = vst.msk [vmem:[%s3286_s23 + $0x7a8] sm:$0xff] %vm2140_vm1, %v1785_v48 }
 0x219   : > { %v1449_v50 = vpop.f32.mrf.mxu1 }
 0x21a   : > { %2161 = vst.msk [vmem:[%s3286_s23 + $0xa8] sm:$0xff] %vm2140_vm1, %v1449_v50 }
 0x21b   : > { %1098 = vmatmul.f32.gmra.mxu2 %v564_v49  ;;  %1835 = vmatmul.f32.gmra.mxu3 %v564_v49  ;;  %v712_v49 = vpop.f32.mrf.mxu0 }
 0x21c   : > { %2160 = vst [vmem:[%s3286_s23 + $0xa0] sm:$0xff] %v712_v49 }
 0x21e   : > { %v1051_v52 = vpop.f32.mrf.mxu2  ;;  %v1788_v53 = vpop.f32.mrf.mxu3 }
 0x21f   : > { %2386 = vst [vmem:[%s3286_s23 + $0x7b0] sm:$0xff] %v1051_v52  ;;  %v451_v52 = vld [vmem:[#allocation7 + $0xd0] sm:$0xff] }
 0x220   : > { %2387 = vst.msk [vmem:[%s3286_s23 + $0x7b8] sm:$0xff] %vm2140_vm1, %v1788_v53  ;;  %759 = vmatmul.f32.gmra.mxu0 %v451_v52  ;;  %1496 = vmatmul.f32.gmra.mxu1 %v451_v52 }
 0x221   : > { %v1452_v56 = vpop.f32.mrf.mxu1 }
 0x222   : > { %2163 = vst.msk [vmem:[%s3286_s23 + $0xb8] sm:$0xff] %vm2140_vm1, %v1452_v56 }
 0x223   : > { %1101 = vmatmul.f32.gmra.mxu2 %v565_v55  ;;  %1838 = vmatmul.f32.gmra.mxu3 %v565_v55  ;;  %v715_v55 = vpop.f32.mrf.mxu0 }
 0x224   : > { %2162 = vst [vmem:[%s3286_s23 + $0xb0] sm:$0xff] %v715_v55 }
 0x226   : > { %v1054_v58 = vpop.f32.mrf.mxu2  ;;  %v1791_v59 = vpop.f32.mrf.mxu3 }
 0x227   : > { %2388 = vst [vmem:[%s3286_s23 + $0x7c0] sm:$0xff] %v1054_v58  ;;  %v452_v58 = vld [vmem:[#allocation7 + $0xd8] sm:$0xff] }
 0x228   : > { %2389 = vst.msk [vmem:[%s3286_s23 + $0x7c8] sm:$0xff] %vm2140_vm1, %v1791_v59  ;;  %762 = vmatmul.f32.gmra.mxu0 %v452_v58  ;;  %1499 = vmatmul.f32.gmra.mxu1 %v452_v58 }
 0x229   : > { %v1455_v62 = vpop.f32.mrf.mxu1 }
 0x22a   : > { %2165 = vst.msk [vmem:[%s3286_s23 + $0xc8] sm:$0xff] %vm2140_vm1, %v1455_v62 }
 0x22b   : > { %1104 = vmatmul.f32.gmra.mxu2 %v566_v61  ;;  %1841 = vmatmul.f32.gmra.mxu3 %v566_v61  ;;  %v718_v61 = vpop.f32.mrf.mxu0 }
 0x22c   : > { %2164 = vst [vmem:[%s3286_s23 + $0xc0] sm:$0xff] %v718_v61 }
 0x22e   : > { %v1057_v63 = vpop.f32.mrf.mxu2  ;;  %v1794_v0 = vpop.f32.mrf.mxu3 }
 0x22f   : > { %2390 = vst [vmem:[%s3286_s23 + $0x7d0] sm:$0xff] %v1057_v63  ;;  %v577_v63 = vld [vmem:[#allocation7 + $0x4c0] sm:$0xff] }
 0x230   : > { %2391 = vst.msk [vmem:[%s3286_s23 + $0x7d8] sm:$0xff] %vm2140_vm1, %v1794_v0  ;;  %v453_v0 = vld [vmem:[#allocation7 + $0xe0] sm:$0xff] }
 0x231   : > { %765 = vmatmul.f32.gmra.mxu0 %v453_v0  ;;  %1502 = vmatmul.f32.gmra.mxu1 %v453_v0  ;;  %v1458_v4 = vpop.f32.mrf.mxu1 }
 0x232   : > { %2167 = vst.msk [vmem:[%s3286_s23 + $0xd8] sm:$0xff] %vm2140_vm1, %v1458_v4 }
 0x233   : > { %1107 = vmatmul.f32.gmra.mxu2 %v567_v3  ;;  %1844 = vmatmul.f32.gmra.mxu3 %v567_v3  ;;  %v721_v3 = vpop.f32.mrf.mxu0 }
 0x234   : > { %2166 = vst [vmem:[%s3286_s23 + $0xd0] sm:$0xff] %v721_v3 }
 0x236   : > { %v1060_v5 = vpop.f32.mrf.mxu2  ;;  %v1797_v6 = vpop.f32.mrf.mxu3 }
 0x237   : > { %2392 = vst [vmem:[%s3286_s23 + $0x7e0] sm:$0xff] %v1060_v5  ;;  %v578_v5 = vld [vmem:[#allocation7 + $0x4c8] sm:$0xff] }
 0x238   : > { %2393 = vst.msk [vmem:[%s3286_s23 + $0x7e8] sm:$0xff] %vm2140_vm1, %v1797_v6  ;;  %v454_v6 = vld [vmem:[#allocation7 + $0xe8] sm:$0xff] }
 0x239   : > { %768 = vmatmul.f32.gmra.mxu0 %v454_v6  ;;  %1505 = vmatmul.f32.gmra.mxu1 %v454_v6  ;;  %v1461_v10 = vpop.f32.mrf.mxu1 }
 0x23a   : > { %2169 = vst.msk [vmem:[%s3286_s23 + $0xe8] sm:$0xff] %vm2140_vm1, %v1461_v10 }
 0x23b   : > { %1110 = vmatmul.f32.gmra.mxu2 %v568_v9  ;;  %1847 = vmatmul.f32.gmra.mxu3 %v568_v9  ;;  %v724_v9 = vpop.f32.mrf.mxu0 }
 0x23c   : > { %2168 = vst [vmem:[%s3286_s23 + $0xe0] sm:$0xff] %v724_v9 }
 0x23e   : > { %v1063_v11 = vpop.f32.mrf.mxu2  ;;  %v1800_v12 = vpop.f32.mrf.mxu3 }
 0x23f   : > { %2394 = vst [vmem:[%s3286_s23 + $0x7f0] sm:$0xff] %v1063_v11  ;;  %v579_v11 = vld [vmem:[#allocation7 + $0x4d0] sm:$0xff] }
 0x240   : > { %2395 = vst.msk [vmem:[%s3286_s23 + $0x7f8] sm:$0xff] %vm2140_vm1, %v1800_v12  ;;  %v455_v12 = vld [vmem:[#allocation7 + $0xf0] sm:$0xff] }
 0x241   : > { %771 = vmatmul.f32.gmra.mxu0 %v455_v12  ;;  %1508 = vmatmul.f32.gmra.mxu1 %v455_v12  ;;  %v1464_v16 = vpop.f32.mrf.mxu1 }
 0x242   : > { %2171 = vst.msk [vmem:[%s3286_s23 + $0xf8] sm:$0xff] %vm2140_vm1, %v1464_v16 }
 0x243   : > { %1113 = vmatmul.f32.gmra.mxu2 %v569_v15  ;;  %1850 = vmatmul.f32.gmra.mxu3 %v569_v15  ;;  %v727_v15 = vpop.f32.mrf.mxu0 }
 0x244   : > { %2170 = vst [vmem:[%s3286_s23 + $0xf0] sm:$0xff] %v727_v15 }
 0x246   : > { %v1066_v17 = vpop.f32.mrf.mxu2  ;;  %v1803_v18 = vpop.f32.mrf.mxu3 }
 0x247   : > { %2396 = vst [vmem:[%s3286_s23 + $0x800] sm:$0xff] %v1066_v17  ;;  %v580_v17 = vld [vmem:[#allocation7 + $0x4d8] sm:$0xff] }
 0x248   : > { %2397 = vst.msk [vmem:[%s3286_s23 + $0x808] sm:$0xff] %vm2140_vm1, %v1803_v18  ;;  %v456_v18 = vld [vmem:[#allocation7 + $0xf8] sm:$0xff] }
 0x249   : > { %774 = vmatmul.f32.gmra.mxu0 %v456_v18  ;;  %1511 = vmatmul.f32.gmra.mxu1 %v456_v18  ;;  %v1467_v22 = vpop.f32.mrf.mxu1 }
 0x24a   : > { %2173 = vst.msk [vmem:[%s3286_s23 + $0x108] sm:$0xff] %vm2140_vm1, %v1467_v22 }
 0x24b   : > { %1116 = vmatmul.f32.gmra.mxu2 %v570_v21  ;;  %1853 = vmatmul.f32.gmra.mxu3 %v570_v21  ;;  %v730_v21 = vpop.f32.mrf.mxu0 }
 0x24c   : > { %2172 = vst [vmem:[%s3286_s23 + $0x100] sm:$0xff] %v730_v21 }
 0x24e   : > { %v1069_v23 = vpop.f32.mrf.mxu2  ;;  %v1806_v24 = vpop.f32.mrf.mxu3 }
 0x24f   : > { %2398 = vst [vmem:[%s3286_s23 + $0x810] sm:$0xff] %v1069_v23  ;;  %v581_v23 = vld [vmem:[#allocation7 + $0x4e0] sm:$0xff] }
 0x250   : > { %2399 = vst.msk [vmem:[%s3286_s23 + $0x818] sm:$0xff] %vm2140_vm1, %v1806_v24  ;;  %v457_v24 = vld [vmem:[#allocation7 + $0x100] sm:$0xff] }
 0x251   : > { %777 = vmatmul.f32.gmra.mxu0 %v457_v24  ;;  %1514 = vmatmul.f32.gmra.mxu1 %v457_v24  ;;  %v1470_v28 = vpop.f32.mrf.mxu1 }
 0x252   : > { %2175 = vst.msk [vmem:[%s3286_s23 + $0x118] sm:$0xff] %vm2140_vm1, %v1470_v28 }
 0x253   : > { %1119 = vmatmul.f32.gmra.mxu2 %v571_v27  ;;  %1856 = vmatmul.f32.gmra.mxu3 %v571_v27  ;;  %v733_v27 = vpop.f32.mrf.mxu0 }
 0x254   : > { %2174 = vst [vmem:[%s3286_s23 + $0x110] sm:$0xff] %v733_v27 }
 0x256   : > { %v1072_v29 = vpop.f32.mrf.mxu2  ;;  %v1809_v30 = vpop.f32.mrf.mxu3 }
 0x257   : > { %2400 = vst [vmem:[%s3286_s23 + $0x820] sm:$0xff] %v1072_v29  ;;  %v582_v29 = vld [vmem:[#allocation7 + $0x4e8] sm:$0xff] }
 0x258   : > { %2401 = vst.msk [vmem:[%s3286_s23 + $0x828] sm:$0xff] %vm2140_vm1, %v1809_v30  ;;  %v458_v30 = vld [vmem:[#allocation7 + $0x108] sm:$0xff] }
 0x259   : > { %780 = vmatmul.f32.gmra.mxu0 %v458_v30  ;;  %1517 = vmatmul.f32.gmra.mxu1 %v458_v30  ;;  %v1473_v34 = vpop.f32.mrf.mxu1 }
 0x25a   : > { %2177 = vst.msk [vmem:[%s3286_s23 + $0x128] sm:$0xff] %vm2140_vm1, %v1473_v34 }
 0x25b   : > { %1122 = vmatmul.f32.gmra.mxu2 %v572_v33  ;;  %1859 = vmatmul.f32.gmra.mxu3 %v572_v33  ;;  %v736_v33 = vpop.f32.mrf.mxu0 }
 0x25c   : > { %2176 = vst [vmem:[%s3286_s23 + $0x120] sm:$0xff] %v736_v33 }
 0x25e   : > { %v1075_v35 = vpop.f32.mrf.mxu2  ;;  %v1812_v36 = vpop.f32.mrf.mxu3 }
 0x25f   : > { %2402 = vst [vmem:[%s3286_s23 + $0x830] sm:$0xff] %v1075_v35  ;;  %v583_v35 = vld [vmem:[#allocation7 + $0x4f0] sm:$0xff] }
 0x260   : > { %2403 = vst.msk [vmem:[%s3286_s23 + $0x838] sm:$0xff] %vm2140_vm1, %v1812_v36  ;;  %v459_v36 = vld [vmem:[#allocation7 + $0x110] sm:$0xff] }
 0x261   : > { %783 = vmatmul.f32.gmra.mxu0 %v459_v36  ;;  %1520 = vmatmul.f32.gmra.mxu1 %v459_v36  ;;  %v1476_v40 = vpop.f32.mrf.mxu1 }
 0x262   : > { %2179 = vst.msk [vmem:[%s3286_s23 + $0x138] sm:$0xff] %vm2140_vm1, %v1476_v40 }
 0x263   : > { %1125 = vmatmul.f32.gmra.mxu2 %v573_v39  ;;  %1862 = vmatmul.f32.gmra.mxu3 %v573_v39  ;;  %v739_v39 = vpop.f32.mrf.mxu0 }
 0x264   : > { %2178 = vst [vmem:[%s3286_s23 + $0x130] sm:$0xff] %v739_v39 }
 0x266   : > { %v1078_v41 = vpop.f32.mrf.mxu2  ;;  %v1815_v42 = vpop.f32.mrf.mxu3 }
 0x267   : > { %2404 = vst [vmem:[%s3286_s23 + $0x840] sm:$0xff] %v1078_v41  ;;  %v584_v41 = vld [vmem:[#allocation7 + $0x4f8] sm:$0xff] }
 0x268   : > { %2405 = vst.msk [vmem:[%s3286_s23 + $0x848] sm:$0xff] %vm2140_vm1, %v1815_v42  ;;  %v460_v42 = vld [vmem:[#allocation7 + $0x118] sm:$0xff] }
 0x269   : > { %786 = vmatmul.f32.gmra.mxu0 %v460_v42  ;;  %1523 = vmatmul.f32.gmra.mxu1 %v460_v42  ;;  %v1479_v46 = vpop.f32.mrf.mxu1 }
 0x26a   : > { %2181 = vst.msk [vmem:[%s3286_s23 + $0x148] sm:$0xff] %vm2140_vm1, %v1479_v46 }
 0x26b   : > { %1128 = vmatmul.f32.gmra.mxu2 %v574_v45  ;;  %1865 = vmatmul.f32.gmra.mxu3 %v574_v45  ;;  %v742_v45 = vpop.f32.mrf.mxu0 }
 0x26c   : > { %2180 = vst [vmem:[%s3286_s23 + $0x140] sm:$0xff] %v742_v45 }
 0x26e   : > { %v1081_v47 = vpop.f32.mrf.mxu2  ;;  %v1818_v48 = vpop.f32.mrf.mxu3 }
 0x26f   : > { %2406 = vst [vmem:[%s3286_s23 + $0x850] sm:$0xff] %v1081_v47  ;;  %v585_v47 = vld [vmem:[#allocation7 + $0x500] sm:$0xff] }
 0x270   : > { %2407 = vst.msk [vmem:[%s3286_s23 + $0x858] sm:$0xff] %vm2140_vm1, %v1818_v48  ;;  %v461_v48 = vld [vmem:[#allocation7 + $0x120] sm:$0xff] }
 0x271   : > { %789 = vmatmul.f32.gmra.mxu0 %v461_v48  ;;  %1526 = vmatmul.f32.gmra.mxu1 %v461_v48  ;;  %v1482_v52 = vpop.f32.mrf.mxu1 }
 0x272   : > { %2183 = vst.msk [vmem:[%s3286_s23 + $0x158] sm:$0xff] %vm2140_vm1, %v1482_v52 }
 0x273   : > { %1131 = vmatmul.f32.gmra.mxu2 %v575_v51  ;;  %1868 = vmatmul.f32.gmra.mxu3 %v575_v51  ;;  %v745_v51 = vpop.f32.mrf.mxu0 }
 0x274   : > { %2182 = vst [vmem:[%s3286_s23 + $0x150] sm:$0xff] %v745_v51 }
 0x276   : > { %v1084_v53 = vpop.f32.mrf.mxu2  ;;  %v1821_v54 = vpop.f32.mrf.mxu3 }
 0x277   : > { %2408 = vst [vmem:[%s3286_s23 + $0x860] sm:$0xff] %v1084_v53  ;;  %v586_v53 = vld [vmem:[#allocation7 + $0x508] sm:$0xff] }
 0x278   : > { %2409 = vst.msk [vmem:[%s3286_s23 + $0x868] sm:$0xff] %vm2140_vm1, %v1821_v54  ;;  %v462_v54 = vld [vmem:[#allocation7 + $0x128] sm:$0xff] }
 0x279   : > { %792 = vmatmul.f32.gmra.mxu0 %v462_v54  ;;  %1529 = vmatmul.f32.gmra.mxu1 %v462_v54  ;;  %v1485_v58 = vpop.f32.mrf.mxu1 }
 0x27a   : > { %2185 = vst.msk [vmem:[%s3286_s23 + $0x168] sm:$0xff] %vm2140_vm1, %v1485_v58 }
 0x27b   : > { %1134 = vmatmul.f32.gmra.mxu2 %v576_v57  ;;  %1871 = vmatmul.f32.gmra.mxu3 %v576_v57  ;;  %v748_v57 = vpop.f32.mrf.mxu0 }
 0x27c   : > { %2184 = vst [vmem:[%s3286_s23 + $0x160] sm:$0xff] %v748_v57 }
 0x27e   : > { %v1087_v59 = vpop.f32.mrf.mxu2  ;;  %v1824_v60 = vpop.f32.mrf.mxu3 }
 0x27f   : > { %2410 = vst [vmem:[%s3286_s23 + $0x870] sm:$0xff] %v1087_v59  ;;  %v587_v59 = vld [vmem:[#allocation7 + $0x510] sm:$0xff] }
 0x280   : > { %2411 = vst.msk [vmem:[%s3286_s23 + $0x878] sm:$0xff] %vm2140_vm1, %v1824_v60  ;;  %v463_v60 = vld [vmem:[#allocation7 + $0x130] sm:$0xff] }
 0x281   : > { %795 = vmatmul.f32.gmra.mxu0 %v463_v60  ;;  %1532 = vmatmul.f32.gmra.mxu1 %v463_v60  ;;  %v1488_v0 = vpop.f32.mrf.mxu1 }
 0x282   : > { %2187 = vst.msk [vmem:[%s3286_s23 + $0x178] sm:$0xff] %vm2140_vm1, %v1488_v0 }
 0x283   : > { %1137 = vmatmul.f32.gmra.mxu2 %v577_v63  ;;  %1874 = vmatmul.f32.gmra.mxu3 %v577_v63  ;;  %v751_v63 = vpop.f32.mrf.mxu0 }
 0x284   : > { %2186 = vst [vmem:[%s3286_s23 + $0x170] sm:$0xff] %v751_v63 }
 0x286   : > { %v1090_v1 = vpop.f32.mrf.mxu2  ;;  %v1827_v2 = vpop.f32.mrf.mxu3 }
 0x287   : > { %2412 = vst [vmem:[%s3286_s23 + $0x880] sm:$0xff] %v1090_v1  ;;  %v588_v1 = vld [vmem:[#allocation7 + $0x518] sm:$0xff] }
 0x288   : > { %2413 = vst.msk [vmem:[%s3286_s23 + $0x888] sm:$0xff] %vm2140_vm1, %v1827_v2  ;;  %v464_v2 = vld [vmem:[#allocation7 + $0x138] sm:$0xff] }
 0x289   : > { %798 = vmatmul.f32.gmra.mxu0 %v464_v2  ;;  %1535 = vmatmul.f32.gmra.mxu1 %v464_v2  ;;  %v1491_v6 = vpop.f32.mrf.mxu1 }
 0x28a   : > { %2189 = vst.msk [vmem:[%s3286_s23 + $0x188] sm:$0xff] %vm2140_vm1, %v1491_v6 }
 0x28b   : > { %1140 = vmatmul.f32.gmra.mxu2 %v578_v5  ;;  %1877 = vmatmul.f32.gmra.mxu3 %v578_v5  ;;  %v754_v5 = vpop.f32.mrf.mxu0 }
 0x28c   : > { %2188 = vst [vmem:[%s3286_s23 + $0x180] sm:$0xff] %v754_v5 }
 0x28e   : > { %v1093_v7 = vpop.f32.mrf.mxu2  ;;  %v1830_v8 = vpop.f32.mrf.mxu3 }
 0x28f   : > { %2414 = vst [vmem:[%s3286_s23 + $0x890] sm:$0xff] %v1093_v7  ;;  %v589_v7 = vld [vmem:[#allocation7 + $0x520] sm:$0xff] }
 0x290   : > { %2415 = vst.msk [vmem:[%s3286_s23 + $0x898] sm:$0xff] %vm2140_vm1, %v1830_v8  ;;  %v465_v8 = vld [vmem:[#allocation7 + $0x140] sm:$0xff] }
 0x291   : > { %801 = vmatmul.f32.gmra.mxu0 %v465_v8  ;;  %1538 = vmatmul.f32.gmra.mxu1 %v465_v8  ;;  %v1494_v12 = vpop.f32.mrf.mxu1 }
 0x292   : > { %2191 = vst.msk [vmem:[%s3286_s23 + $0x198] sm:$0xff] %vm2140_vm1, %v1494_v12 }
 0x293   : > { %1143 = vmatmul.f32.gmra.mxu2 %v579_v11  ;;  %1880 = vmatmul.f32.gmra.mxu3 %v579_v11  ;;  %v757_v11 = vpop.f32.mrf.mxu0 }
 0x294   : > { %2190 = vst [vmem:[%s3286_s23 + $0x190] sm:$0xff] %v757_v11 }
 0x296   : > { %v1096_v13 = vpop.f32.mrf.mxu2  ;;  %v1833_v14 = vpop.f32.mrf.mxu3 }
 0x297   : > { %2416 = vst [vmem:[%s3286_s23 + $0x8a0] sm:$0xff] %v1096_v13  ;;  %v590_v13 = vld [vmem:[#allocation7 + $0x528] sm:$0xff] }
 0x298   : > { %2417 = vst.msk [vmem:[%s3286_s23 + $0x8a8] sm:$0xff] %vm2140_vm1, %v1833_v14  ;;  %v466_v14 = vld [vmem:[#allocation7 + $0x148] sm:$0xff] }
 0x299   : > { %804 = vmatmul.f32.gmra.mxu0 %v466_v14  ;;  %1541 = vmatmul.f32.gmra.mxu1 %v466_v14 }
 0x29b   : > { %1146 = vmatmul.f32.gmra.mxu2 %v580_v17  ;;  %1883 = vmatmul.f32.gmra.mxu3 %v580_v17 }
 0x29d   : > { %v760_v17 = vpop.f32.mrf.mxu0  ;;  %v1497_v18 = vpop.f32.mrf.mxu1 }
 0x29e   : > { %v1099_v19 = vpop.f32.mrf.mxu2  ;;  %v1836_v20 = vpop.f32.mrf.mxu3  ;;  %2192 = vst [vmem:[%s3286_s23 + $0x1a0] sm:$0xff] %v760_v17 }
 0x29f   : > { %2418 = vst [vmem:[%s3286_s23 + $0x8b0] sm:$0xff] %v1099_v19  ;;  %v591_v19 = vld [vmem:[#allocation7 + $0x530] sm:$0xff] }
 0x2a0   : > { %2419 = vst.msk [vmem:[%s3286_s23 + $0x8b8] sm:$0xff] %vm2140_vm1, %v1836_v20  ;;  %v467_v20 = vld [vmem:[#allocation7 + $0x150] sm:$0xff] }
 0x2a1   : > { %807 = vmatmul.f32.gmra.mxu0 %v467_v20  ;;  %1544 = vmatmul.f32.gmra.mxu1 %v467_v20  ;;  %2193 = vst.msk [vmem:[%s3286_s23 + $0x1a8] sm:$0xff] %vm2140_vm1, %v1497_v18 }
 0x2a3   : > { %1149 = vmatmul.f32.gmra.mxu2 %v581_v23  ;;  %1886 = vmatmul.f32.gmra.mxu3 %v581_v23 }
 0x2a5   : > { %v763_v23 = vpop.f32.mrf.mxu0  ;;  %v1500_v24 = vpop.f32.mrf.mxu1 }
 0x2a6   : > { %v1102_v25 = vpop.f32.mrf.mxu2  ;;  %v1839_v26 = vpop.f32.mrf.mxu3  ;;  %2194 = vst [vmem:[%s3286_s23 + $0x1b0] sm:$0xff] %v763_v23 }
 0x2a7   : > { %2420 = vst [vmem:[%s3286_s23 + $0x8c0] sm:$0xff] %v1102_v25  ;;  %v592_v25 = vld [vmem:[#allocation7 + $0x538] sm:$0xff] }
 0x2a8   : > { %2421 = vst.msk [vmem:[%s3286_s23 + $0x8c8] sm:$0xff] %vm2140_vm1, %v1839_v26  ;;  %v468_v26 = vld [vmem:[#allocation7 + $0x158] sm:$0xff] }
 0x2a9   : > { %810 = vmatmul.f32.gmra.mxu0 %v468_v26  ;;  %1547 = vmatmul.f32.gmra.mxu1 %v468_v26  ;;  %2195 = vst.msk [vmem:[%s3286_s23 + $0x1b8] sm:$0xff] %vm2140_vm1, %v1500_v24 }
 0x2ab   : > { %1152 = vmatmul.f32.gmra.mxu2 %v582_v29  ;;  %1889 = vmatmul.f32.gmra.mxu3 %v582_v29 }
 0x2ae   : > { %v1105_v31 = vpop.f32.mrf.mxu2  ;;  %v1842_v32 = vpop.f32.mrf.mxu3 }
 0x2af   : > { %2422 = vst [vmem:[%s3286_s23 + $0x8d0] sm:$0xff] %v1105_v31  ;;  %v766_v29 = vpop.f32.mrf.mxu0  ;;  %v1503_v30 = vpop.f32.mrf.mxu1  ;;  %v593_v31 = vld [vmem:[#allocation7 + $0x540] sm:$0xff] }
 0x2b0   : > { %2423 = vst.msk [vmem:[%s3286_s23 + $0x8d8] sm:$0xff] %vm2140_vm1, %v1842_v32  ;;  %v469_v32 = vld [vmem:[#allocation7 + $0x160] sm:$0xff] }
 0x2b1   : > { %2196 = vst [vmem:[%s3286_s23 + $0x1c0] sm:$0xff] %v766_v29  ;;  %813 = vmatmul.f32.gmra.mxu0 %v469_v32  ;;  %1550 = vmatmul.f32.gmra.mxu1 %v469_v32 }
 0x2b2   : > { %2197 = vst.msk [vmem:[%s3286_s23 + $0x1c8] sm:$0xff] %vm2140_vm1, %v1503_v30 }
 0x2b3   : > { %1155 = vmatmul.f32.gmra.mxu2 %v583_v35  ;;  %1892 = vmatmul.f32.gmra.mxu3 %v583_v35 }
 0x2b6   : > { %v1108_v37 = vpop.f32.mrf.mxu2  ;;  %v1845_v38 = vpop.f32.mrf.mxu3 }
 0x2b7   : > { %2424 = vst [vmem:[%s3286_s23 + $0x8e0] sm:$0xff] %v1108_v37  ;;  %v769_v35 = vpop.f32.mrf.mxu0  ;;  %v1506_v36 = vpop.f32.mrf.mxu1  ;;  %v594_v37 = vld [vmem:[#allocation7 + $0x548] sm:$0xff] }
 0x2b8   : > { %2425 = vst.msk [vmem:[%s3286_s23 + $0x8e8] sm:$0xff] %vm2140_vm1, %v1845_v38  ;;  %v470_v38 = vld [vmem:[#allocation7 + $0x168] sm:$0xff] }
 0x2b9   : > { %2198 = vst [vmem:[%s3286_s23 + $0x1d0] sm:$0xff] %v769_v35  ;;  %816 = vmatmul.f32.gmra.mxu0 %v470_v38  ;;  %1553 = vmatmul.f32.gmra.mxu1 %v470_v38 }
 0x2ba   : > { %2199 = vst.msk [vmem:[%s3286_s23 + $0x1d8] sm:$0xff] %vm2140_vm1, %v1506_v36 }
 0x2bb   : > { %1158 = vmatmul.f32.gmra.mxu2 %v584_v41  ;;  %1895 = vmatmul.f32.gmra.mxu3 %v584_v41 }
 0x2be   : > { %v1111_v43 = vpop.f32.mrf.mxu2  ;;  %v1848_v44 = vpop.f32.mrf.mxu3 }
 0x2bf   : > { %2426 = vst [vmem:[%s3286_s23 + $0x8f0] sm:$0xff] %v1111_v43  ;;  %v772_v41 = vpop.f32.mrf.mxu0  ;;  %v1509_v42 = vpop.f32.mrf.mxu1  ;;  %v595_v43 = vld [vmem:[#allocation7 + $0x550] sm:$0xff] }
 0x2c0   : > { %2427 = vst.msk [vmem:[%s3286_s23 + $0x8f8] sm:$0xff] %vm2140_vm1, %v1848_v44  ;;  %v471_v44 = vld [vmem:[#allocation7 + $0x170] sm:$0xff] }
 0x2c1   : > { %2200 = vst [vmem:[%s3286_s23 + $0x1e0] sm:$0xff] %v772_v41  ;;  %819 = vmatmul.f32.gmra.mxu0 %v471_v44  ;;  %1556 = vmatmul.f32.gmra.mxu1 %v471_v44 }
 0x2c2   : > { %2201 = vst.msk [vmem:[%s3286_s23 + $0x1e8] sm:$0xff] %vm2140_vm1, %v1509_v42 }
 0x2c3   : > { %1161 = vmatmul.f32.gmra.mxu2 %v585_v47  ;;  %1898 = vmatmul.f32.gmra.mxu3 %v585_v47 }
 0x2c6   : > { %v1114_v49 = vpop.f32.mrf.mxu2  ;;  %v1851_v50 = vpop.f32.mrf.mxu3 }
 0x2c7   : > { %2428 = vst [vmem:[%s3286_s23 + $0x900] sm:$0xff] %v1114_v49  ;;  %v775_v47 = vpop.f32.mrf.mxu0  ;;  %v1512_v48 = vpop.f32.mrf.mxu1  ;;  %v596_v49 = vld [vmem:[#allocation7 + $0x558] sm:$0xff] }
 0x2c8   : > { %2429 = vst.msk [vmem:[%s3286_s23 + $0x908] sm:$0xff] %vm2140_vm1, %v1851_v50  ;;  %v472_v50 = vld [vmem:[#allocation7 + $0x178] sm:$0xff] }
 0x2c9   : > { %2202 = vst [vmem:[%s3286_s23 + $0x1f0] sm:$0xff] %v775_v47  ;;  %822 = vmatmul.f32.gmra.mxu0 %v472_v50  ;;  %1559 = vmatmul.f32.gmra.mxu1 %v472_v50 }
 0x2ca   : > { %2203 = vst.msk [vmem:[%s3286_s23 + $0x1f8] sm:$0xff] %vm2140_vm1, %v1512_v48 }
 0x2cb   : > { %1164 = vmatmul.f32.gmra.mxu2 %v586_v53  ;;  %1901 = vmatmul.f32.gmra.mxu3 %v586_v53 }
 0x2ce   : > { %v1117_v55 = vpop.f32.mrf.mxu2  ;;  %v1854_v56 = vpop.f32.mrf.mxu3 }
 0x2cf   : > { %2430 = vst [vmem:[%s3286_s23 + $0x910] sm:$0xff] %v1117_v55  ;;  %v778_v53 = vpop.f32.mrf.mxu0  ;;  %v1515_v54 = vpop.f32.mrf.mxu1  ;;  %v597_v55 = vld [vmem:[#allocation7 + $0x560] sm:$0xff] }
 0x2d0   : > { %2431 = vst.msk [vmem:[%s3286_s23 + $0x918] sm:$0xff] %vm2140_vm1, %v1854_v56  ;;  %v473_v56 = vld [vmem:[#allocation7 + $0x180] sm:$0xff] }
 0x2d1   : > { %2204 = vst [vmem:[%s3286_s23 + $0x200] sm:$0xff] %v778_v53  ;;  %825 = vmatmul.f32.gmra.mxu0 %v473_v56  ;;  %1562 = vmatmul.f32.gmra.mxu1 %v473_v56 }
 0x2d2   : > { %2205 = vst.msk [vmem:[%s3286_s23 + $0x208] sm:$0xff] %vm2140_vm1, %v1515_v54 }
 0x2d3   : > { %1167 = vmatmul.f32.gmra.mxu2 %v587_v59  ;;  %1904 = vmatmul.f32.gmra.mxu3 %v587_v59 }
 0x2d6   : > { %v1120_v61 = vpop.f32.mrf.mxu2  ;;  %v1857_v62 = vpop.f32.mrf.mxu3 }
 0x2d7   : > { %2432 = vst [vmem:[%s3286_s23 + $0x920] sm:$0xff] %v1120_v61  ;;  %v781_v59 = vpop.f32.mrf.mxu0  ;;  %v1518_v60 = vpop.f32.mrf.mxu1  ;;  %v598_v61 = vld [vmem:[#allocation7 + $0x568] sm:$0xff] }
 0x2d8   : > { %2433 = vst.msk [vmem:[%s3286_s23 + $0x928] sm:$0xff] %vm2140_vm1, %v1857_v62  ;;  %v474_v62 = vld [vmem:[#allocation7 + $0x188] sm:$0xff] }
 0x2d9   : > { %2206 = vst [vmem:[%s3286_s23 + $0x210] sm:$0xff] %v781_v59  ;;  %828 = vmatmul.f32.gmra.mxu0 %v474_v62  ;;  %1565 = vmatmul.f32.gmra.mxu1 %v474_v62 }
 0x2da   : > { %2207 = vst.msk [vmem:[%s3286_s23 + $0x218] sm:$0xff] %vm2140_vm1, %v1518_v60 }
 0x2db   : > { %1170 = vmatmul.f32.gmra.mxu2 %v588_v1  ;;  %1907 = vmatmul.f32.gmra.mxu3 %v588_v1 }
 0x2de   : > { %v1123_v3 = vpop.f32.mrf.mxu2  ;;  %v1860_v4 = vpop.f32.mrf.mxu3 }
 0x2df   : > { %2434 = vst [vmem:[%s3286_s23 + $0x930] sm:$0xff] %v1123_v3  ;;  %v784_v1 = vpop.f32.mrf.mxu0  ;;  %v1521_v2 = vpop.f32.mrf.mxu1  ;;  %v599_v3 = vld [vmem:[#allocation7 + $0x570] sm:$0xff] }
 0x2e0   : > { %2435 = vst.msk [vmem:[%s3286_s23 + $0x938] sm:$0xff] %vm2140_vm1, %v1860_v4  ;;  %v475_v4 = vld [vmem:[#allocation7 + $0x190] sm:$0xff] }
 0x2e1   : > { %2208 = vst [vmem:[%s3286_s23 + $0x220] sm:$0xff] %v784_v1  ;;  %831 = vmatmul.f32.gmra.mxu0 %v475_v4  ;;  %1568 = vmatmul.f32.gmra.mxu1 %v475_v4 }
 0x2e2   : > { %2209 = vst.msk [vmem:[%s3286_s23 + $0x228] sm:$0xff] %vm2140_vm1, %v1521_v2 }
 0x2e3   : > { %1173 = vmatmul.f32.gmra.mxu2 %v589_v7  ;;  %1910 = vmatmul.f32.gmra.mxu3 %v589_v7 }
 0x2e6   : > { %v1126_v9 = vpop.f32.mrf.mxu2  ;;  %v1863_v10 = vpop.f32.mrf.mxu3 }
 0x2e7   : > { %2436 = vst [vmem:[%s3286_s23 + $0x940] sm:$0xff] %v1126_v9  ;;  %v787_v7 = vpop.f32.mrf.mxu0  ;;  %v1524_v8 = vpop.f32.mrf.mxu1  ;;  %v600_v9 = vld [vmem:[#allocation7 + $0x578] sm:$0xff] }
 0x2e8   : > { %2437 = vst.msk [vmem:[%s3286_s23 + $0x948] sm:$0xff] %vm2140_vm1, %v1863_v10  ;;  %v476_v10 = vld [vmem:[#allocation7 + $0x198] sm:$0xff] }
 0x2e9   : > { %2210 = vst [vmem:[%s3286_s23 + $0x230] sm:$0xff] %v787_v7  ;;  %834 = vmatmul.f32.gmra.mxu0 %v476_v10  ;;  %1571 = vmatmul.f32.gmra.mxu1 %v476_v10 }
 0x2ea   : > { %2211 = vst.msk [vmem:[%s3286_s23 + $0x238] sm:$0xff] %vm2140_vm1, %v1524_v8 }
 0x2eb   : > { %1176 = vmatmul.f32.gmra.mxu2 %v590_v13  ;;  %1913 = vmatmul.f32.gmra.mxu3 %v590_v13 }
 0x2ee   : > { %v1129_v15 = vpop.f32.mrf.mxu2  ;;  %v1866_v16 = vpop.f32.mrf.mxu3 }
 0x2ef   : > { %2438 = vst [vmem:[%s3286_s23 + $0x950] sm:$0xff] %v1129_v15  ;;  %v790_v13 = vpop.f32.mrf.mxu0  ;;  %v1527_v14 = vpop.f32.mrf.mxu1  ;;  %v601_v15 = vld [vmem:[#allocation7 + $0x580] sm:$0xff] }
 0x2f0   : > { %2439 = vst.msk [vmem:[%s3286_s23 + $0x958] sm:$0xff] %vm2140_vm1, %v1866_v16  ;;  %v477_v16 = vld [vmem:[#allocation7 + $0x1a0] sm:$0xff] }
 0x2f1   : > { %2212 = vst [vmem:[%s3286_s23 + $0x240] sm:$0xff] %v790_v13  ;;  %837 = vmatmul.f32.gmra.mxu0 %v477_v16  ;;  %1574 = vmatmul.f32.gmra.mxu1 %v477_v16 }
 0x2f2   : > { %2213 = vst.msk [vmem:[%s3286_s23 + $0x248] sm:$0xff] %vm2140_vm1, %v1527_v14 }
 0x2f3   : > { %1179 = vmatmul.f32.gmra.mxu2 %v591_v19  ;;  %1916 = vmatmul.f32.gmra.mxu3 %v591_v19 }
 0x2f6   : > { %v1132_v21 = vpop.f32.mrf.mxu2  ;;  %v1869_v22 = vpop.f32.mrf.mxu3 }
 0x2f7   : > { %2440 = vst [vmem:[%s3286_s23 + $0x960] sm:$0xff] %v1132_v21  ;;  %v793_v19 = vpop.f32.mrf.mxu0  ;;  %v1530_v20 = vpop.f32.mrf.mxu1  ;;  %v602_v21 = vld [vmem:[#allocation7 + $0x588] sm:$0xff] }
 0x2f8   : > { %2441 = vst.msk [vmem:[%s3286_s23 + $0x968] sm:$0xff] %vm2140_vm1, %v1869_v22  ;;  %v478_v22 = vld [vmem:[#allocation7 + $0x1a8] sm:$0xff] }
 0x2f9   : > { %2214 = vst [vmem:[%s3286_s23 + $0x250] sm:$0xff] %v793_v19  ;;  %840 = vmatmul.f32.gmra.mxu0 %v478_v22  ;;  %1577 = vmatmul.f32.gmra.mxu1 %v478_v22 }
 0x2fa   : > { %2215 = vst.msk [vmem:[%s3286_s23 + $0x258] sm:$0xff] %vm2140_vm1, %v1530_v20 }
 0x2fb   : > { %1182 = vmatmul.f32.gmra.mxu2 %v592_v25  ;;  %1919 = vmatmul.f32.gmra.mxu3 %v592_v25 }
 0x2fe   : > { %v1135_v27 = vpop.f32.mrf.mxu2  ;;  %v1872_v28 = vpop.f32.mrf.mxu3 }
 0x2ff   : > { %2442 = vst [vmem:[%s3286_s23 + $0x970] sm:$0xff] %v1135_v27  ;;  %v796_v25 = vpop.f32.mrf.mxu0  ;;  %v1533_v26 = vpop.f32.mrf.mxu1  ;;  %v603_v27 = vld [vmem:[#allocation7 + $0x590] sm:$0xff] }
 0x300   : > { %2443 = vst.msk [vmem:[%s3286_s23 + $0x978] sm:$0xff] %vm2140_vm1, %v1872_v28  ;;  %v479_v28 = vld [vmem:[#allocation7 + $0x1b0] sm:$0xff] }
 0x301   : > { %2216 = vst [vmem:[%s3286_s23 + $0x260] sm:$0xff] %v796_v25  ;;  %843 = vmatmul.f32.gmra.mxu0 %v479_v28  ;;  %1580 = vmatmul.f32.gmra.mxu1 %v479_v28 }
 0x302   : > { %2217 = vst.msk [vmem:[%s3286_s23 + $0x268] sm:$0xff] %vm2140_vm1, %v1533_v26 }
 0x303   : > { %1185 = vmatmul.f32.gmra.mxu2 %v593_v31  ;;  %1922 = vmatmul.f32.gmra.mxu3 %v593_v31 }
 0x306   : > { %v1138_v33 = vpop.f32.mrf.mxu2  ;;  %v1875_v34 = vpop.f32.mrf.mxu3 }
 0x307   : > { %2444 = vst [vmem:[%s3286_s23 + $0x980] sm:$0xff] %v1138_v33  ;;  %v799_v31 = vpop.f32.mrf.mxu0  ;;  %v1536_v32 = vpop.f32.mrf.mxu1  ;;  %v604_v33 = vld [vmem:[#allocation7 + $0x598] sm:$0xff] }
 0x308   : > { %2445 = vst.msk [vmem:[%s3286_s23 + $0x988] sm:$0xff] %vm2140_vm1, %v1875_v34  ;;  %v480_v34 = vld [vmem:[#allocation7 + $0x1b8] sm:$0xff] }
 0x309   : > { %2218 = vst [vmem:[%s3286_s23 + $0x270] sm:$0xff] %v799_v31  ;;  %846 = vmatmul.f32.gmra.mxu0 %v480_v34  ;;  %1583 = vmatmul.f32.gmra.mxu1 %v480_v34 }
 0x30a   : > { %2219 = vst.msk [vmem:[%s3286_s23 + $0x278] sm:$0xff] %vm2140_vm1, %v1536_v32 }
 0x30b   : > { %1188 = vmatmul.f32.gmra.mxu2 %v594_v37  ;;  %1925 = vmatmul.f32.gmra.mxu3 %v594_v37 }
 0x30e   : > { %v1141_v39 = vpop.f32.mrf.mxu2  ;;  %v1878_v40 = vpop.f32.mrf.mxu3 }
 0x30f   : > { %2446 = vst [vmem:[%s3286_s23 + $0x990] sm:$0xff] %v1141_v39  ;;  %v802_v37 = vpop.f32.mrf.mxu0  ;;  %v1539_v38 = vpop.f32.mrf.mxu1  ;;  %v605_v39 = vld [vmem:[#allocation7 + $0x5a0] sm:$0xff] }
 0x310   : > { %2447 = vst.msk [vmem:[%s3286_s23 + $0x998] sm:$0xff] %vm2140_vm1, %v1878_v40  ;;  %v481_v40 = vld [vmem:[#allocation7 + $0x1c0] sm:$0xff] }
 0x311   : > { %2220 = vst [vmem:[%s3286_s23 + $0x280] sm:$0xff] %v802_v37  ;;  %849 = vmatmul.f32.gmra.mxu0 %v481_v40  ;;  %1586 = vmatmul.f32.gmra.mxu1 %v481_v40 }
 0x312   : > { %2221 = vst.msk [vmem:[%s3286_s23 + $0x288] sm:$0xff] %vm2140_vm1, %v1539_v38 }
 0x313   : > { %1191 = vmatmul.f32.gmra.mxu2 %v595_v43  ;;  %1928 = vmatmul.f32.gmra.mxu3 %v595_v43 }
 0x316   : > { %v1144_v45 = vpop.f32.mrf.mxu2  ;;  %v1881_v46 = vpop.f32.mrf.mxu3 }
 0x317   : > { %2448 = vst [vmem:[%s3286_s23 + $0x9a0] sm:$0xff] %v1144_v45  ;;  %v805_v43 = vpop.f32.mrf.mxu0  ;;  %v1542_v44 = vpop.f32.mrf.mxu1  ;;  %v606_v45 = vld [vmem:[#allocation7 + $0x5a8] sm:$0xff] }
 0x318   : > { %2449 = vst.msk [vmem:[%s3286_s23 + $0x9a8] sm:$0xff] %vm2140_vm1, %v1881_v46  ;;  %v482_v46 = vld [vmem:[#allocation7 + $0x1c8] sm:$0xff] }
 0x319   : > { %2222 = vst [vmem:[%s3286_s23 + $0x290] sm:$0xff] %v805_v43  ;;  %852 = vmatmul.f32.gmra.mxu0 %v482_v46  ;;  %1589 = vmatmul.f32.gmra.mxu1 %v482_v46 }
 0x31a   : > { %2223 = vst.msk [vmem:[%s3286_s23 + $0x298] sm:$0xff] %vm2140_vm1, %v1542_v44 }
 0x31b   : > { %1194 = vmatmul.f32.gmra.mxu2 %v596_v49  ;;  %1931 = vmatmul.f32.gmra.mxu3 %v596_v49 }
 0x31e   : > { %v1147_v51 = vpop.f32.mrf.mxu2  ;;  %v1884_v52 = vpop.f32.mrf.mxu3 }
 0x31f   : > { %2450 = vst [vmem:[%s3286_s23 + $0x9b0] sm:$0xff] %v1147_v51  ;;  %v808_v49 = vpop.f32.mrf.mxu0  ;;  %v1545_v50 = vpop.f32.mrf.mxu1  ;;  %v607_v51 = vld [vmem:[#allocation7 + $0x5b0] sm:$0xff] }
 0x320   : > { %2451 = vst.msk [vmem:[%s3286_s23 + $0x9b8] sm:$0xff] %vm2140_vm1, %v1884_v52  ;;  %v483_v52 = vld [vmem:[#allocation7 + $0x1d0] sm:$0xff] }
 0x321   : > { %2224 = vst [vmem:[%s3286_s23 + $0x2a0] sm:$0xff] %v808_v49  ;;  %855 = vmatmul.f32.gmra.mxu0 %v483_v52  ;;  %1592 = vmatmul.f32.gmra.mxu1 %v483_v52 }
 0x322   : > { %2225 = vst.msk [vmem:[%s3286_s23 + $0x2a8] sm:$0xff] %vm2140_vm1, %v1545_v50 }
 0x323   : > { %1197 = vmatmul.f32.gmra.mxu2 %v597_v55  ;;  %1934 = vmatmul.f32.gmra.mxu3 %v597_v55 }
 0x326   : > { %v1150_v57 = vpop.f32.mrf.mxu2  ;;  %v1887_v58 = vpop.f32.mrf.mxu3 }
 0x327   : > { %2452 = vst [vmem:[%s3286_s23 + $0x9c0] sm:$0xff] %v1150_v57  ;;  %v811_v55 = vpop.f32.mrf.mxu0  ;;  %v1548_v56 = vpop.f32.mrf.mxu1  ;;  %v608_v57 = vld [vmem:[#allocation7 + $0x5b8] sm:$0xff] }
 0x328   : > { %2453 = vst.msk [vmem:[%s3286_s23 + $0x9c8] sm:$0xff] %vm2140_vm1, %v1887_v58  ;;  %v484_v58 = vld [vmem:[#allocation7 + $0x1d8] sm:$0xff] }
 0x329   : > { %2226 = vst [vmem:[%s3286_s23 + $0x2b0] sm:$0xff] %v811_v55  ;;  %858 = vmatmul.f32.gmra.mxu0 %v484_v58  ;;  %1595 = vmatmul.f32.gmra.mxu1 %v484_v58 }
 0x32a   : > { %2227 = vst.msk [vmem:[%s3286_s23 + $0x2b8] sm:$0xff] %vm2140_vm1, %v1548_v56 }
 0x32b   : > { %1200 = vmatmul.f32.gmra.mxu2 %v598_v61  ;;  %1937 = vmatmul.f32.gmra.mxu3 %v598_v61 }
 0x32e   : > { %v1153_v63 = vpop.f32.mrf.mxu2  ;;  %v1890_v0 = vpop.f32.mrf.mxu3 }
 0x32f   : > { %2454 = vst [vmem:[%s3286_s23 + $0x9d0] sm:$0xff] %v1153_v63  ;;  %v814_v61 = vpop.f32.mrf.mxu0  ;;  %v1551_v62 = vpop.f32.mrf.mxu1  ;;  %v609_v63 = vld [vmem:[#allocation7 + $0x5c0] sm:$0xff] }
 0x330   : > { %2455 = vst.msk [vmem:[%s3286_s23 + $0x9d8] sm:$0xff] %vm2140_vm1, %v1890_v0  ;;  %v485_v0 = vld [vmem:[#allocation7 + $0x1e0] sm:$0xff] }
 0x331   : > { %2228 = vst [vmem:[%s3286_s23 + $0x2c0] sm:$0xff] %v814_v61  ;;  %861 = vmatmul.f32.gmra.mxu0 %v485_v0  ;;  %1598 = vmatmul.f32.gmra.mxu1 %v485_v0 }
 0x332   : > { %2229 = vst.msk [vmem:[%s3286_s23 + $0x2c8] sm:$0xff] %vm2140_vm1, %v1551_v62 }
 0x333   : > { %1203 = vmatmul.f32.gmra.mxu2 %v599_v3  ;;  %1940 = vmatmul.f32.gmra.mxu3 %v599_v3 }
 0x336   : > { %v1156_v5 = vpop.f32.mrf.mxu2  ;;  %v1893_v6 = vpop.f32.mrf.mxu3 }
 0x337   : > { %2456 = vst [vmem:[%s3286_s23 + $0x9e0] sm:$0xff] %v1156_v5  ;;  %v817_v3 = vpop.f32.mrf.mxu0  ;;  %v1554_v4 = vpop.f32.mrf.mxu1  ;;  %v610_v5 = vld [vmem:[#allocation7 + $0x5c8] sm:$0xff] }
 0x338   : > { %2457 = vst.msk [vmem:[%s3286_s23 + $0x9e8] sm:$0xff] %vm2140_vm1, %v1893_v6  ;;  %v486_v6 = vld [vmem:[#allocation7 + $0x1e8] sm:$0xff] }
 0x339   : > { %2230 = vst [vmem:[%s3286_s23 + $0x2d0] sm:$0xff] %v817_v3  ;;  %864 = vmatmul.f32.gmra.mxu0 %v486_v6  ;;  %1601 = vmatmul.f32.gmra.mxu1 %v486_v6 }
 0x33a   : > { %2231 = vst.msk [vmem:[%s3286_s23 + $0x2d8] sm:$0xff] %vm2140_vm1, %v1554_v4 }
 0x33b   : > { %1206 = vmatmul.f32.gmra.mxu2 %v600_v9  ;;  %1943 = vmatmul.f32.gmra.mxu3 %v600_v9 }
 0x33e   : > { %v1159_v11 = vpop.f32.mrf.mxu2  ;;  %v1896_v12 = vpop.f32.mrf.mxu3 }
 0x33f   : > { %2458 = vst [vmem:[%s3286_s23 + $0x9f0] sm:$0xff] %v1159_v11  ;;  %v820_v9 = vpop.f32.mrf.mxu0  ;;  %v1557_v10 = vpop.f32.mrf.mxu1  ;;  %v611_v11 = vld [vmem:[#allocation7 + $0x5d0] sm:$0xff] }
 0x340   : > { %2459 = vst.msk [vmem:[%s3286_s23 + $0x9f8] sm:$0xff] %vm2140_vm1, %v1896_v12  ;;  %v487_v12 = vld [vmem:[#allocation7 + $0x1f0] sm:$0xff] }
 0x341   : > { %2232 = vst [vmem:[%s3286_s23 + $0x2e0] sm:$0xff] %v820_v9  ;;  %867 = vmatmul.f32.gmra.mxu0 %v487_v12  ;;  %1604 = vmatmul.f32.gmra.mxu1 %v487_v12 }
 0x342   : > { %2233 = vst.msk [vmem:[%s3286_s23 + $0x2e8] sm:$0xff] %vm2140_vm1, %v1557_v10 }
 0x343   : > { %1209 = vmatmul.f32.gmra.mxu2 %v601_v15  ;;  %1946 = vmatmul.f32.gmra.mxu3 %v601_v15 }
 0x346   : > { %v1162_v17 = vpop.f32.mrf.mxu2  ;;  %v1899_v18 = vpop.f32.mrf.mxu3 }
 0x347   : > { %2460 = vst [vmem:[%s3286_s23 + $0xa00] sm:$0xff] %v1162_v17  ;;  %v823_v15 = vpop.f32.mrf.mxu0  ;;  %v1560_v16 = vpop.f32.mrf.mxu1  ;;  %v612_v17 = vld [vmem:[#allocation7 + $0x5d8] sm:$0xff] }
 0x348   : > { %2461 = vst.msk [vmem:[%s3286_s23 + $0xa08] sm:$0xff] %vm2140_vm1, %v1899_v18  ;;  %v488_v18 = vld [vmem:[#allocation7 + $0x1f8] sm:$0xff] }
 0x349   : > { %2234 = vst [vmem:[%s3286_s23 + $0x2f0] sm:$0xff] %v823_v15  ;;  %870 = vmatmul.f32.gmra.mxu0 %v488_v18  ;;  %1607 = vmatmul.f32.gmra.mxu1 %v488_v18 }
 0x34a   : > { %2235 = vst.msk [vmem:[%s3286_s23 + $0x2f8] sm:$0xff] %vm2140_vm1, %v1560_v16 }
 0x34b   : > { %1212 = vmatmul.f32.gmra.mxu2 %v602_v21  ;;  %1949 = vmatmul.f32.gmra.mxu3 %v602_v21 }
 0x34e   : > { %v1165_v23 = vpop.f32.mrf.mxu2  ;;  %v1902_v24 = vpop.f32.mrf.mxu3 }
 0x34f   : > { %2462 = vst [vmem:[%s3286_s23 + $0xa10] sm:$0xff] %v1165_v23  ;;  %v826_v21 = vpop.f32.mrf.mxu0  ;;  %v1563_v22 = vpop.f32.mrf.mxu1  ;;  %v613_v23 = vld [vmem:[#allocation7 + $0x5e0] sm:$0xff] }
 0x350   : > { %2463 = vst.msk [vmem:[%s3286_s23 + $0xa18] sm:$0xff] %vm2140_vm1, %v1902_v24  ;;  %v489_v24 = vld [vmem:[#allocation7 + $0x200] sm:$0xff] }
 0x351   : > { %2236 = vst [vmem:[%s3286_s23 + $0x300] sm:$0xff] %v826_v21  ;;  %873 = vmatmul.f32.gmra.mxu0 %v489_v24  ;;  %1610 = vmatmul.f32.gmra.mxu1 %v489_v24 }
 0x352   : > { %2237 = vst.msk [vmem:[%s3286_s23 + $0x308] sm:$0xff] %vm2140_vm1, %v1563_v22 }
 0x353   : > { %1215 = vmatmul.f32.gmra.mxu2 %v603_v27  ;;  %1952 = vmatmul.f32.gmra.mxu3 %v603_v27 }
 0x356   : > { %v1168_v29 = vpop.f32.mrf.mxu2  ;;  %v1905_v30 = vpop.f32.mrf.mxu3 }
 0x357   : > { %2464 = vst [vmem:[%s3286_s23 + $0xa20] sm:$0xff] %v1168_v29  ;;  %v829_v27 = vpop.f32.mrf.mxu0  ;;  %v1566_v28 = vpop.f32.mrf.mxu1  ;;  %v614_v29 = vld [vmem:[#allocation7 + $0x5e8] sm:$0xff] }
 0x358   : > { %2465 = vst.msk [vmem:[%s3286_s23 + $0xa28] sm:$0xff] %vm2140_vm1, %v1905_v30  ;;  %v490_v30 = vld [vmem:[#allocation7 + $0x208] sm:$0xff] }
 0x359   : > { %2238 = vst [vmem:[%s3286_s23 + $0x310] sm:$0xff] %v829_v27  ;;  %876 = vmatmul.f32.gmra.mxu0 %v490_v30  ;;  %1613 = vmatmul.f32.gmra.mxu1 %v490_v30 }
 0x35a   : > { %2239 = vst.msk [vmem:[%s3286_s23 + $0x318] sm:$0xff] %vm2140_vm1, %v1566_v28 }
 0x35b   : > { %1218 = vmatmul.f32.gmra.mxu2 %v604_v33  ;;  %1955 = vmatmul.f32.gmra.mxu3 %v604_v33 }
 0x35e   : > { %v1171_v35 = vpop.f32.mrf.mxu2  ;;  %v1908_v36 = vpop.f32.mrf.mxu3 }
 0x35f   : > { %2466 = vst [vmem:[%s3286_s23 + $0xa30] sm:$0xff] %v1171_v35  ;;  %v832_v33 = vpop.f32.mrf.mxu0  ;;  %v1569_v34 = vpop.f32.mrf.mxu1  ;;  %v615_v35 = vld [vmem:[#allocation7 + $0x5f0] sm:$0xff] }
 0x360   : > { %2467 = vst.msk [vmem:[%s3286_s23 + $0xa38] sm:$0xff] %vm2140_vm1, %v1908_v36  ;;  %v491_v36 = vld [vmem:[#allocation7 + $0x210] sm:$0xff] }
 0x361   : > { %2240 = vst [vmem:[%s3286_s23 + $0x320] sm:$0xff] %v832_v33  ;;  %879 = vmatmul.f32.gmra.mxu0 %v491_v36  ;;  %1616 = vmatmul.f32.gmra.mxu1 %v491_v36 }
 0x362   : > { %2241 = vst.msk [vmem:[%s3286_s23 + $0x328] sm:$0xff] %vm2140_vm1, %v1569_v34 }
 0x363   : > { %1221 = vmatmul.f32.gmra.mxu2 %v605_v39  ;;  %1958 = vmatmul.f32.gmra.mxu3 %v605_v39 }
 0x366   : > { %v1174_v41 = vpop.f32.mrf.mxu2  ;;  %v1911_v42 = vpop.f32.mrf.mxu3 }
 0x367   : > { %2468 = vst [vmem:[%s3286_s23 + $0xa40] sm:$0xff] %v1174_v41  ;;  %v835_v39 = vpop.f32.mrf.mxu0  ;;  %v1572_v40 = vpop.f32.mrf.mxu1  ;;  %v616_v41 = vld [vmem:[#allocation7 + $0x5f8] sm:$0xff] }
 0x368   : > { %2469 = vst.msk [vmem:[%s3286_s23 + $0xa48] sm:$0xff] %vm2140_vm1, %v1911_v42  ;;  %v492_v42 = vld [vmem:[#allocation7 + $0x218] sm:$0xff] }
 0x369   : > { %2242 = vst [vmem:[%s3286_s23 + $0x330] sm:$0xff] %v835_v39  ;;  %882 = vmatmul.f32.gmra.mxu0 %v492_v42  ;;  %1619 = vmatmul.f32.gmra.mxu1 %v492_v42 }
 0x36a   : > { %2243 = vst.msk [vmem:[%s3286_s23 + $0x338] sm:$0xff] %vm2140_vm1, %v1572_v40 }
 0x36b   : > { %1224 = vmatmul.f32.gmra.mxu2 %v606_v45  ;;  %1961 = vmatmul.f32.gmra.mxu3 %v606_v45 }
 0x36e   : > { %v1177_v47 = vpop.f32.mrf.mxu2  ;;  %v1914_v48 = vpop.f32.mrf.mxu3 }
 0x36f   : > { %2470 = vst [vmem:[%s3286_s23 + $0xa50] sm:$0xff] %v1177_v47  ;;  %v838_v45 = vpop.f32.mrf.mxu0  ;;  %v1575_v46 = vpop.f32.mrf.mxu1  ;;  %v617_v47 = vld [vmem:[#allocation7 + $0x600] sm:$0xff] }
 0x370   : > { %2471 = vst.msk [vmem:[%s3286_s23 + $0xa58] sm:$0xff] %vm2140_vm1, %v1914_v48  ;;  %v493_v48 = vld [vmem:[#allocation7 + $0x220] sm:$0xff] }
 0x371   : > { %2244 = vst [vmem:[%s3286_s23 + $0x340] sm:$0xff] %v838_v45  ;;  %885 = vmatmul.f32.gmra.mxu0 %v493_v48  ;;  %1622 = vmatmul.f32.gmra.mxu1 %v493_v48 }
 0x372   : > { %2245 = vst.msk [vmem:[%s3286_s23 + $0x348] sm:$0xff] %vm2140_vm1, %v1575_v46 }
 0x373   : > { %1227 = vmatmul.f32.gmra.mxu2 %v607_v51  ;;  %1964 = vmatmul.f32.gmra.mxu3 %v607_v51 }
 0x376   : > { %v1180_v53 = vpop.f32.mrf.mxu2  ;;  %v1917_v54 = vpop.f32.mrf.mxu3 }
 0x377   : > { %2472 = vst [vmem:[%s3286_s23 + $0xa60] sm:$0xff] %v1180_v53  ;;  %v841_v51 = vpop.f32.mrf.mxu0  ;;  %v1578_v52 = vpop.f32.mrf.mxu1  ;;  %v618_v53 = vld [vmem:[#allocation7 + $0x608] sm:$0xff] }
 0x378   : > { %2473 = vst.msk [vmem:[%s3286_s23 + $0xa68] sm:$0xff] %vm2140_vm1, %v1917_v54  ;;  %v494_v54 = vld [vmem:[#allocation7 + $0x228] sm:$0xff] }
 0x379   : > { %2246 = vst [vmem:[%s3286_s23 + $0x350] sm:$0xff] %v841_v51  ;;  %888 = vmatmul.f32.gmra.mxu0 %v494_v54  ;;  %1625 = vmatmul.f32.gmra.mxu1 %v494_v54 }
 0x37a   : > { %2247 = vst.msk [vmem:[%s3286_s23 + $0x358] sm:$0xff] %vm2140_vm1, %v1578_v52 }
 0x37b   : > { %1230 = vmatmul.f32.gmra.mxu2 %v608_v57  ;;  %1967 = vmatmul.f32.gmra.mxu3 %v608_v57 }
 0x37e   : > { %v1183_v59 = vpop.f32.mrf.mxu2  ;;  %v1920_v60 = vpop.f32.mrf.mxu3 }
 0x37f   : > { %2474 = vst [vmem:[%s3286_s23 + $0xa70] sm:$0xff] %v1183_v59  ;;  %v844_v57 = vpop.f32.mrf.mxu0  ;;  %v1581_v58 = vpop.f32.mrf.mxu1  ;;  %v619_v59 = vld [vmem:[#allocation7 + $0x610] sm:$0xff] }
 0x380   : > { %2475 = vst.msk [vmem:[%s3286_s23 + $0xa78] sm:$0xff] %vm2140_vm1, %v1920_v60  ;;  %v495_v60 = vld [vmem:[#allocation7 + $0x230] sm:$0xff] }
 0x381   : > { %2248 = vst [vmem:[%s3286_s23 + $0x360] sm:$0xff] %v844_v57  ;;  %891 = vmatmul.f32.gmra.mxu0 %v495_v60  ;;  %1628 = vmatmul.f32.gmra.mxu1 %v495_v60 }
 0x382   : > { %2249 = vst.msk [vmem:[%s3286_s23 + $0x368] sm:$0xff] %vm2140_vm1, %v1581_v58 }
 0x383   : > { %1233 = vmatmul.f32.gmra.mxu2 %v609_v63  ;;  %1970 = vmatmul.f32.gmra.mxu3 %v609_v63 }
 0x386   : > { %v1186_v1 = vpop.f32.mrf.mxu2  ;;  %v1923_v2 = vpop.f32.mrf.mxu3 }
 0x387   : > { %2476 = vst [vmem:[%s3286_s23 + $0xa80] sm:$0xff] %v1186_v1  ;;  %v847_v63 = vpop.f32.mrf.mxu0  ;;  %v1584_v0 = vpop.f32.mrf.mxu1  ;;  %v620_v1 = vld [vmem:[#allocation7 + $0x618] sm:$0xff] }
 0x388   : > { %2477 = vst.msk [vmem:[%s3286_s23 + $0xa88] sm:$0xff] %vm2140_vm1, %v1923_v2  ;;  %v496_v2 = vld [vmem:[#allocation7 + $0x238] sm:$0xff] }
 0x389   : > { %2250 = vst [vmem:[%s3286_s23 + $0x370] sm:$0xff] %v847_v63  ;;  %894 = vmatmul.f32.gmra.mxu0 %v496_v2  ;;  %1631 = vmatmul.f32.gmra.mxu1 %v496_v2 }
 0x38a   : > { %2251 = vst.msk [vmem:[%s3286_s23 + $0x378] sm:$0xff] %vm2140_vm1, %v1584_v0 }
 0x38b   : > { %1236 = vmatmul.f32.gmra.mxu2 %v610_v5  ;;  %1973 = vmatmul.f32.gmra.mxu3 %v610_v5 }
 0x38e   : > { %v1189_v7 = vpop.f32.mrf.mxu2  ;;  %v1926_v8 = vpop.f32.mrf.mxu3 }
 0x38f   : > { %2478 = vst [vmem:[%s3286_s23 + $0xa90] sm:$0xff] %v1189_v7  ;;  %v850_v5 = vpop.f32.mrf.mxu0  ;;  %v1587_v6 = vpop.f32.mrf.mxu1  ;;  %v621_v7 = vld [vmem:[#allocation7 + $0x620] sm:$0xff] }
 0x390   : > { %2479 = vst.msk [vmem:[%s3286_s23 + $0xa98] sm:$0xff] %vm2140_vm1, %v1926_v8  ;;  %v497_v8 = vld [vmem:[#allocation7 + $0x240] sm:$0xff] }
 0x391   : > { %2252 = vst [vmem:[%s3286_s23 + $0x380] sm:$0xff] %v850_v5  ;;  %897 = vmatmul.f32.gmra.mxu0 %v497_v8  ;;  %1634 = vmatmul.f32.gmra.mxu1 %v497_v8 }
 0x392   : > { %2253 = vst.msk [vmem:[%s3286_s23 + $0x388] sm:$0xff] %vm2140_vm1, %v1587_v6 }
 0x393   : > { %1239 = vmatmul.f32.gmra.mxu2 %v611_v11  ;;  %1976 = vmatmul.f32.gmra.mxu3 %v611_v11 }
 0x396   : > { %v1192_v13 = vpop.f32.mrf.mxu2  ;;  %v1929_v14 = vpop.f32.mrf.mxu3 }
 0x397   : > { %2480 = vst [vmem:[%s3286_s23 + $0xaa0] sm:$0xff] %v1192_v13  ;;  %v853_v11 = vpop.f32.mrf.mxu0  ;;  %v1590_v12 = vpop.f32.mrf.mxu1  ;;  %v622_v13 = vld [vmem:[#allocation7 + $0x628] sm:$0xff] }
 0x398   : > { %2481 = vst.msk [vmem:[%s3286_s23 + $0xaa8] sm:$0xff] %vm2140_vm1, %v1929_v14  ;;  %v498_v14 = vld [vmem:[#allocation7 + $0x248] sm:$0xff] }
 0x399   : > { %2254 = vst [vmem:[%s3286_s23 + $0x390] sm:$0xff] %v853_v11  ;;  %900 = vmatmul.f32.gmra.mxu0 %v498_v14  ;;  %1637 = vmatmul.f32.gmra.mxu1 %v498_v14 }
 0x39a   : > { %2255 = vst.msk [vmem:[%s3286_s23 + $0x398] sm:$0xff] %vm2140_vm1, %v1590_v12 }
 0x39b   : > { %1242 = vmatmul.f32.gmra.mxu2 %v612_v17  ;;  %1979 = vmatmul.f32.gmra.mxu3 %v612_v17 }
 0x39e   : > { %v1195_v19 = vpop.f32.mrf.mxu2  ;;  %v1932_v20 = vpop.f32.mrf.mxu3 }
 0x39f   : > { %2482 = vst [vmem:[%s3286_s23 + $0xab0] sm:$0xff] %v1195_v19  ;;  %v856_v17 = vpop.f32.mrf.mxu0  ;;  %v1593_v18 = vpop.f32.mrf.mxu1  ;;  %v623_v19 = vld [vmem:[#allocation7 + $0x630] sm:$0xff] }
 0x3a0   : > { %2483 = vst.msk [vmem:[%s3286_s23 + $0xab8] sm:$0xff] %vm2140_vm1, %v1932_v20  ;;  %v499_v20 = vld [vmem:[#allocation7 + $0x250] sm:$0xff] }
 0x3a1   : > { %2256 = vst [vmem:[%s3286_s23 + $0x3a0] sm:$0xff] %v856_v17  ;;  %903 = vmatmul.f32.gmra.mxu0 %v499_v20  ;;  %1640 = vmatmul.f32.gmra.mxu1 %v499_v20 }
 0x3a2   : > { %2257 = vst.msk [vmem:[%s3286_s23 + $0x3a8] sm:$0xff] %vm2140_vm1, %v1593_v18 }
 0x3a3   : > { %1245 = vmatmul.f32.gmra.mxu2 %v613_v23  ;;  %1982 = vmatmul.f32.gmra.mxu3 %v613_v23 }
 0x3a6   : > { %v1198_v25 = vpop.f32.mrf.mxu2  ;;  %v1935_v26 = vpop.f32.mrf.mxu3 }
 0x3a7   : > { %2484 = vst [vmem:[%s3286_s23 + $0xac0] sm:$0xff] %v1198_v25  ;;  %v859_v23 = vpop.f32.mrf.mxu0  ;;  %v1596_v24 = vpop.f32.mrf.mxu1  ;;  %v624_v25 = vld [vmem:[#allocation7 + $0x638] sm:$0xff] }
 0x3a8   : > { %2485 = vst.msk [vmem:[%s3286_s23 + $0xac8] sm:$0xff] %vm2140_vm1, %v1935_v26  ;;  %v500_v26 = vld [vmem:[#allocation7 + $0x258] sm:$0xff] }
 0x3a9   : > { %2258 = vst [vmem:[%s3286_s23 + $0x3b0] sm:$0xff] %v859_v23  ;;  %906 = vmatmul.f32.gmra.mxu0 %v500_v26  ;;  %1643 = vmatmul.f32.gmra.mxu1 %v500_v26 }
 0x3aa   : > { %2259 = vst.msk [vmem:[%s3286_s23 + $0x3b8] sm:$0xff] %vm2140_vm1, %v1596_v24 }
 0x3ab   : > { %1248 = vmatmul.f32.gmra.mxu2 %v614_v29  ;;  %1985 = vmatmul.f32.gmra.mxu3 %v614_v29 }
 0x3ae   : > { %v1201_v31 = vpop.f32.mrf.mxu2  ;;  %v1938_v32 = vpop.f32.mrf.mxu3 }
 0x3af   : > { %2486 = vst [vmem:[%s3286_s23 + $0xad0] sm:$0xff] %v1201_v31  ;;  %v862_v29 = vpop.f32.mrf.mxu0  ;;  %v1599_v30 = vpop.f32.mrf.mxu1  ;;  %v625_v31 = vld [vmem:[#allocation7 + $0x640] sm:$0xff] }
 0x3b0   : > { %2487 = vst.msk [vmem:[%s3286_s23 + $0xad8] sm:$0xff] %vm2140_vm1, %v1938_v32  ;;  %v501_v32 = vld [vmem:[#allocation7 + $0x260] sm:$0xff] }
 0x3b1   : > { %2260 = vst [vmem:[%s3286_s23 + $0x3c0] sm:$0xff] %v862_v29  ;;  %909 = vmatmul.f32.gmra.mxu0 %v501_v32  ;;  %1646 = vmatmul.f32.gmra.mxu1 %v501_v32 }
 0x3b2   : > { %2261 = vst.msk [vmem:[%s3286_s23 + $0x3c8] sm:$0xff] %vm2140_vm1, %v1599_v30 }
 0x3b3   : > { %1251 = vmatmul.f32.gmra.mxu2 %v615_v35  ;;  %1988 = vmatmul.f32.gmra.mxu3 %v615_v35 }
 0x3b6   : > { %v1204_v37 = vpop.f32.mrf.mxu2  ;;  %v1941_v38 = vpop.f32.mrf.mxu3 }
 0x3b7   : > { %2488 = vst [vmem:[%s3286_s23 + $0xae0] sm:$0xff] %v1204_v37  ;;  %v865_v35 = vpop.f32.mrf.mxu0  ;;  %v1602_v36 = vpop.f32.mrf.mxu1  ;;  %v626_v37 = vld [vmem:[#allocation7 + $0x648] sm:$0xff] }
 0x3b8   : > { %2489 = vst.msk [vmem:[%s3286_s23 + $0xae8] sm:$0xff] %vm2140_vm1, %v1941_v38  ;;  %v502_v38 = vld [vmem:[#allocation7 + $0x268] sm:$0xff] }
 0x3b9   : > { %2262 = vst [vmem:[%s3286_s23 + $0x3d0] sm:$0xff] %v865_v35  ;;  %912 = vmatmul.f32.gmra.mxu0 %v502_v38  ;;  %1649 = vmatmul.f32.gmra.mxu1 %v502_v38 }
 0x3ba   : > { %2263 = vst.msk [vmem:[%s3286_s23 + $0x3d8] sm:$0xff] %vm2140_vm1, %v1602_v36 }
 0x3bb   : > { %1254 = vmatmul.f32.gmra.mxu2 %v616_v41  ;;  %1991 = vmatmul.f32.gmra.mxu3 %v616_v41 }
 0x3be   : > { %v1207_v43 = vpop.f32.mrf.mxu2  ;;  %v1944_v44 = vpop.f32.mrf.mxu3 }
 0x3bf   : > { %2490 = vst [vmem:[%s3286_s23 + $0xaf0] sm:$0xff] %v1207_v43  ;;  %v868_v41 = vpop.f32.mrf.mxu0  ;;  %v1605_v42 = vpop.f32.mrf.mxu1  ;;  %v627_v43 = vld [vmem:[#allocation7 + $0x650] sm:$0xff] }
 0x3c0   : > { %2491 = vst.msk [vmem:[%s3286_s23 + $0xaf8] sm:$0xff] %vm2140_vm1, %v1944_v44  ;;  %v503_v44 = vld [vmem:[#allocation7 + $0x270] sm:$0xff] }
 0x3c1   : > { %2264 = vst [vmem:[%s3286_s23 + $0x3e0] sm:$0xff] %v868_v41  ;;  %915 = vmatmul.f32.gmra.mxu0 %v503_v44  ;;  %1652 = vmatmul.f32.gmra.mxu1 %v503_v44 }
 0x3c2   : > { %2265 = vst.msk [vmem:[%s3286_s23 + $0x3e8] sm:$0xff] %vm2140_vm1, %v1605_v42 }
 0x3c3   : > { %1257 = vmatmul.f32.gmra.mxu2 %v617_v47  ;;  %1994 = vmatmul.f32.gmra.mxu3 %v617_v47 }
 0x3c6   : > { %v1210_v49 = vpop.f32.mrf.mxu2  ;;  %v1947_v50 = vpop.f32.mrf.mxu3 }
 0x3c7   : > { %2492 = vst [vmem:[%s3286_s23 + $0xb00] sm:$0xff] %v1210_v49  ;;  %v871_v47 = vpop.f32.mrf.mxu0  ;;  %v1608_v48 = vpop.f32.mrf.mxu1  ;;  %v628_v49 = vld [vmem:[#allocation7 + $0x658] sm:$0xff] }
 0x3c8   : > { %2493 = vst.msk [vmem:[%s3286_s23 + $0xb08] sm:$0xff] %vm2140_vm1, %v1947_v50  ;;  %v504_v50 = vld [vmem:[#allocation7 + $0x278] sm:$0xff] }
 0x3c9   : > { %2266 = vst [vmem:[%s3286_s23 + $0x3f0] sm:$0xff] %v871_v47  ;;  %918 = vmatmul.f32.gmra.mxu0 %v504_v50  ;;  %1655 = vmatmul.f32.gmra.mxu1 %v504_v50 }
 0x3ca   : > { %2267 = vst.msk [vmem:[%s3286_s23 + $0x3f8] sm:$0xff] %vm2140_vm1, %v1608_v48 }
 0x3cb   : > { %1260 = vmatmul.f32.gmra.mxu2 %v618_v53  ;;  %1997 = vmatmul.f32.gmra.mxu3 %v618_v53 }
 0x3ce   : > { %v1213_v55 = vpop.f32.mrf.mxu2  ;;  %v1950_v56 = vpop.f32.mrf.mxu3 }
 0x3cf   : > { %2494 = vst [vmem:[%s3286_s23 + $0xb10] sm:$0xff] %v1213_v55  ;;  %v874_v53 = vpop.f32.mrf.mxu0  ;;  %v1611_v54 = vpop.f32.mrf.mxu1  ;;  %v629_v55 = vld [vmem:[#allocation7 + $0x660] sm:$0xff] }
 0x3d0   : > { %2495 = vst.msk [vmem:[%s3286_s23 + $0xb18] sm:$0xff] %vm2140_vm1, %v1950_v56  ;;  %v505_v56 = vld [vmem:[#allocation7 + $0x280] sm:$0xff] }
 0x3d1   : > { %2268 = vst [vmem:[%s3286_s23 + $0x400] sm:$0xff] %v874_v53  ;;  %921 = vmatmul.f32.gmra.mxu0 %v505_v56  ;;  %1658 = vmatmul.f32.gmra.mxu1 %v505_v56 }
 0x3d2   : > { %2269 = vst.msk [vmem:[%s3286_s23 + $0x408] sm:$0xff] %vm2140_vm1, %v1611_v54 }
 0x3d3   : > { %1263 = vmatmul.f32.gmra.mxu2 %v619_v59  ;;  %2000 = vmatmul.f32.gmra.mxu3 %v619_v59 }
 0x3d6   : > { %v1216_v61 = vpop.f32.mrf.mxu2  ;;  %v1953_v62 = vpop.f32.mrf.mxu3 }
 0x3d7   : > { %2496 = vst [vmem:[%s3286_s23 + $0xb20] sm:$0xff] %v1216_v61  ;;  %v877_v59 = vpop.f32.mrf.mxu0  ;;  %v1614_v60 = vpop.f32.mrf.mxu1  ;;  %v630_v61 = vld [vmem:[#allocation7 + $0x668] sm:$0xff] }
 0x3d8   : > { %2497 = vst.msk [vmem:[%s3286_s23 + $0xb28] sm:$0xff] %vm2140_vm1, %v1953_v62  ;;  %v506_v62 = vld [vmem:[#allocation7 + $0x288] sm:$0xff] }
 0x3d9   : > { %2270 = vst [vmem:[%s3286_s23 + $0x410] sm:$0xff] %v877_v59  ;;  %924 = vmatmul.f32.gmra.mxu0 %v506_v62  ;;  %1661 = vmatmul.f32.gmra.mxu1 %v506_v62 }
 0x3da   : > { %2271 = vst.msk [vmem:[%s3286_s23 + $0x418] sm:$0xff] %vm2140_vm1, %v1614_v60 }
 0x3db   : > { %1266 = vmatmul.f32.gmra.mxu2 %v620_v1  ;;  %2003 = vmatmul.f32.gmra.mxu3 %v620_v1 }
 0x3de   : > { %v1219_v3 = vpop.f32.mrf.mxu2  ;;  %v1956_v4 = vpop.f32.mrf.mxu3 }
 0x3df   : > { %2498 = vst [vmem:[%s3286_s23 + $0xb30] sm:$0xff] %v1219_v3  ;;  %v880_v1 = vpop.f32.mrf.mxu0  ;;  %v1617_v2 = vpop.f32.mrf.mxu1  ;;  %v631_v3 = vld [vmem:[#allocation7 + $0x670] sm:$0xff] }
 0x3e0   : > { %2499 = vst.msk [vmem:[%s3286_s23 + $0xb38] sm:$0xff] %vm2140_vm1, %v1956_v4  ;;  %v507_v4 = vld [vmem:[#allocation7 + $0x290] sm:$0xff] }
 0x3e1   : > { %2272 = vst [vmem:[%s3286_s23 + $0x420] sm:$0xff] %v880_v1  ;;  %927 = vmatmul.f32.gmra.mxu0 %v507_v4  ;;  %1664 = vmatmul.f32.gmra.mxu1 %v507_v4 }
 0x3e2   : > { %2273 = vst.msk [vmem:[%s3286_s23 + $0x428] sm:$0xff] %vm2140_vm1, %v1617_v2 }
 0x3e3   : > { %1269 = vmatmul.f32.gmra.mxu2 %v621_v7  ;;  %2006 = vmatmul.f32.gmra.mxu3 %v621_v7 }
 0x3e6   : > { %v1222_v9 = vpop.f32.mrf.mxu2  ;;  %v1959_v10 = vpop.f32.mrf.mxu3 }
 0x3e7   : > { %2500 = vst [vmem:[%s3286_s23 + $0xb40] sm:$0xff] %v1222_v9  ;;  %v883_v7 = vpop.f32.mrf.mxu0  ;;  %v1620_v8 = vpop.f32.mrf.mxu1  ;;  %v632_v9 = vld [vmem:[#allocation7 + $0x678] sm:$0xff] }
 0x3e8   : > { %2501 = vst.msk [vmem:[%s3286_s23 + $0xb48] sm:$0xff] %vm2140_vm1, %v1959_v10  ;;  %v508_v10 = vld [vmem:[#allocation7 + $0x298] sm:$0xff] }
 0x3e9   : > { %2274 = vst [vmem:[%s3286_s23 + $0x430] sm:$0xff] %v883_v7  ;;  %930 = vmatmul.f32.gmra.mxu0 %v508_v10  ;;  %1667 = vmatmul.f32.gmra.mxu1 %v508_v10 }
 0x3ea   : > { %2275 = vst.msk [vmem:[%s3286_s23 + $0x438] sm:$0xff] %vm2140_vm1, %v1620_v8 }
 0x3eb   : > { %1272 = vmatmul.f32.gmra.mxu2 %v622_v13  ;;  %2009 = vmatmul.f32.gmra.mxu3 %v622_v13 }
 0x3ee   : > { %v1225_v15 = vpop.f32.mrf.mxu2  ;;  %v1962_v16 = vpop.f32.mrf.mxu3 }
 0x3ef   : > { %2502 = vst [vmem:[%s3286_s23 + $0xb50] sm:$0xff] %v1225_v15  ;;  %v886_v13 = vpop.f32.mrf.mxu0  ;;  %v1623_v14 = vpop.f32.mrf.mxu1  ;;  %v633_v15 = vld [vmem:[#allocation7 + $0x680] sm:$0xff] }
 0x3f0   : > { %2503 = vst.msk [vmem:[%s3286_s23 + $0xb58] sm:$0xff] %vm2140_vm1, %v1962_v16  ;;  %v509_v16 = vld [vmem:[#allocation7 + $0x2a0] sm:$0xff] }
 0x3f1   : > { %2276 = vst [vmem:[%s3286_s23 + $0x440] sm:$0xff] %v886_v13  ;;  %933 = vmatmul.f32.gmra.mxu0 %v509_v16  ;;  %1670 = vmatmul.f32.gmra.mxu1 %v509_v16 }
 0x3f2   : > { %2277 = vst.msk [vmem:[%s3286_s23 + $0x448] sm:$0xff] %vm2140_vm1, %v1623_v14 }
 0x3f3   : > { %1275 = vmatmul.f32.gmra.mxu2 %v623_v19  ;;  %2012 = vmatmul.f32.gmra.mxu3 %v623_v19 }
 0x3f6   : > { %v1228_v21 = vpop.f32.mrf.mxu2  ;;  %v1965_v22 = vpop.f32.mrf.mxu3 }
 0x3f7   : > { %2504 = vst [vmem:[%s3286_s23 + $0xb60] sm:$0xff] %v1228_v21  ;;  %v889_v19 = vpop.f32.mrf.mxu0  ;;  %v1626_v20 = vpop.f32.mrf.mxu1  ;;  %v634_v21 = vld [vmem:[#allocation7 + $0x688] sm:$0xff] }
 0x3f8   : > { %2505 = vst.msk [vmem:[%s3286_s23 + $0xb68] sm:$0xff] %vm2140_vm1, %v1965_v22  ;;  %v510_v22 = vld [vmem:[#allocation7 + $0x2a8] sm:$0xff] }
 0x3f9   : > { %2278 = vst [vmem:[%s3286_s23 + $0x450] sm:$0xff] %v889_v19  ;;  %936 = vmatmul.f32.gmra.mxu0 %v510_v22  ;;  %1673 = vmatmul.f32.gmra.mxu1 %v510_v22 }
 0x3fa   : > { %2279 = vst.msk [vmem:[%s3286_s23 + $0x458] sm:$0xff] %vm2140_vm1, %v1626_v20 }
 0x3fb   : > { %1278 = vmatmul.f32.gmra.mxu2 %v624_v25  ;;  %2015 = vmatmul.f32.gmra.mxu3 %v624_v25 }
 0x3fe   : > { %v1231_v27 = vpop.f32.mrf.mxu2  ;;  %v1968_v28 = vpop.f32.mrf.mxu3 }
 0x3ff   : > { %2506 = vst [vmem:[%s3286_s23 + $0xb70] sm:$0xff] %v1231_v27  ;;  %v892_v25 = vpop.f32.mrf.mxu0  ;;  %v1629_v26 = vpop.f32.mrf.mxu1  ;;  %v635_v27 = vld [vmem:[#allocation7 + $0x690] sm:$0xff] }
 0x400   : > { %2507 = vst.msk [vmem:[%s3286_s23 + $0xb78] sm:$0xff] %vm2140_vm1, %v1968_v28  ;;  %v511_v28 = vld [vmem:[#allocation7 + $0x2b0] sm:$0xff] }
 0x401   : > { %2280 = vst [vmem:[%s3286_s23 + $0x460] sm:$0xff] %v892_v25  ;;  %939 = vmatmul.f32.gmra.mxu0 %v511_v28  ;;  %1676 = vmatmul.f32.gmra.mxu1 %v511_v28 }
 0x402   : > { %2281 = vst.msk [vmem:[%s3286_s23 + $0x468] sm:$0xff] %vm2140_vm1, %v1629_v26 }
 0x403   : > { %1281 = vmatmul.f32.gmra.mxu2 %v625_v31  ;;  %2018 = vmatmul.f32.gmra.mxu3 %v625_v31 }
 0x406   : > { %v1234_v33 = vpop.f32.mrf.mxu2  ;;  %v1971_v34 = vpop.f32.mrf.mxu3 }
 0x407   : > { %2508 = vst [vmem:[%s3286_s23 + $0xb80] sm:$0xff] %v1234_v33  ;;  %v895_v31 = vpop.f32.mrf.mxu0  ;;  %v1632_v32 = vpop.f32.mrf.mxu1  ;;  %v636_v33 = vld [vmem:[#allocation7 + $0x698] sm:$0xff] }
 0x408   : > { %2509 = vst.msk [vmem:[%s3286_s23 + $0xb88] sm:$0xff] %vm2140_vm1, %v1971_v34  ;;  %v512_v34 = vld [vmem:[#allocation7 + $0x2b8] sm:$0xff] }
 0x409   : > { %2282 = vst [vmem:[%s3286_s23 + $0x470] sm:$0xff] %v895_v31  ;;  %942 = vmatmul.f32.gmra.mxu0 %v512_v34  ;;  %1679 = vmatmul.f32.gmra.mxu1 %v512_v34 }
 0x40a   : > { %2283 = vst.msk [vmem:[%s3286_s23 + $0x478] sm:$0xff] %vm2140_vm1, %v1632_v32 }
 0x40b   : > { %1284 = vmatmul.f32.gmra.mxu2 %v626_v37  ;;  %2021 = vmatmul.f32.gmra.mxu3 %v626_v37 }
 0x40e   : > { %v1237_v39 = vpop.f32.mrf.mxu2  ;;  %v1974_v40 = vpop.f32.mrf.mxu3 }
 0x40f   : > { %2510 = vst [vmem:[%s3286_s23 + $0xb90] sm:$0xff] %v1237_v39  ;;  %v898_v37 = vpop.f32.mrf.mxu0  ;;  %v1635_v38 = vpop.f32.mrf.mxu1  ;;  %v637_v39 = vld [vmem:[#allocation7 + $0x6a0] sm:$0xff] }
 0x410   : > { %2511 = vst.msk [vmem:[%s3286_s23 + $0xb98] sm:$0xff] %vm2140_vm1, %v1974_v40  ;;  %v513_v40 = vld [vmem:[#allocation7 + $0x2c0] sm:$0xff] }
 0x411   : > { %2284 = vst [vmem:[%s3286_s23 + $0x480] sm:$0xff] %v898_v37  ;;  %945 = vmatmul.f32.gmra.mxu0 %v513_v40  ;;  %1682 = vmatmul.f32.gmra.mxu1 %v513_v40 }
 0x412   : > { %2285 = vst.msk [vmem:[%s3286_s23 + $0x488] sm:$0xff] %vm2140_vm1, %v1635_v38 }
 0x413   : > { %1287 = vmatmul.f32.gmra.mxu2 %v627_v43  ;;  %2024 = vmatmul.f32.gmra.mxu3 %v627_v43 }
 0x416   : > { %v1240_v45 = vpop.f32.mrf.mxu2  ;;  %v1977_v46 = vpop.f32.mrf.mxu3 }
 0x417   : > { %2512 = vst [vmem:[%s3286_s23 + $0xba0] sm:$0xff] %v1240_v45  ;;  %v901_v43 = vpop.f32.mrf.mxu0  ;;  %v1638_v44 = vpop.f32.mrf.mxu1  ;;  %v638_v45 = vld [vmem:[#allocation7 + $0x6a8] sm:$0xff] }
 0x418   : > { %2513 = vst.msk [vmem:[%s3286_s23 + $0xba8] sm:$0xff] %vm2140_vm1, %v1977_v46  ;;  %v514_v46 = vld [vmem:[#allocation7 + $0x2c8] sm:$0xff] }
 0x419   : > { %2286 = vst [vmem:[%s3286_s23 + $0x490] sm:$0xff] %v901_v43  ;;  %948 = vmatmul.f32.gmra.mxu0 %v514_v46  ;;  %1685 = vmatmul.f32.gmra.mxu1 %v514_v46 }
 0x41a   : > { %2287 = vst.msk [vmem:[%s3286_s23 + $0x498] sm:$0xff] %vm2140_vm1, %v1638_v44 }
 0x41b   : > { %1290 = vmatmul.f32.gmra.mxu2 %v628_v49  ;;  %2027 = vmatmul.f32.gmra.mxu3 %v628_v49 }
 0x41e   : > { %v1243_v51 = vpop.f32.mrf.mxu2  ;;  %v1980_v52 = vpop.f32.mrf.mxu3 }
 0x41f   : > { %2514 = vst [vmem:[%s3286_s23 + $0xbb0] sm:$0xff] %v1243_v51  ;;  %v904_v49 = vpop.f32.mrf.mxu0  ;;  %v1641_v50 = vpop.f32.mrf.mxu1  ;;  %v639_v51 = vld [vmem:[#allocation7 + $0x6b0] sm:$0xff] }
 0x420   : > { %2515 = vst.msk [vmem:[%s3286_s23 + $0xbb8] sm:$0xff] %vm2140_vm1, %v1980_v52  ;;  %v515_v52 = vld [vmem:[#allocation7 + $0x2d0] sm:$0xff] }
 0x421   : > { %2288 = vst [vmem:[%s3286_s23 + $0x4a0] sm:$0xff] %v904_v49  ;;  %951 = vmatmul.f32.gmra.mxu0 %v515_v52  ;;  %1688 = vmatmul.f32.gmra.mxu1 %v515_v52 }
 0x422   : > { %2289 = vst.msk [vmem:[%s3286_s23 + $0x4a8] sm:$0xff] %vm2140_vm1, %v1641_v50 }
 0x423   : > { %1293 = vmatmul.f32.gmra.mxu2 %v629_v55  ;;  %2030 = vmatmul.f32.gmra.mxu3 %v629_v55 }
 0x426   : > { %v1246_v57 = vpop.f32.mrf.mxu2  ;;  %v1983_v58 = vpop.f32.mrf.mxu3 }
 0x427   : > { %2516 = vst [vmem:[%s3286_s23 + $0xbc0] sm:$0xff] %v1246_v57  ;;  %v907_v55 = vpop.f32.mrf.mxu0  ;;  %v1644_v56 = vpop.f32.mrf.mxu1  ;;  %v640_v57 = vld [vmem:[#allocation7 + $0x6b8] sm:$0xff] }
 0x428   : > { %2517 = vst.msk [vmem:[%s3286_s23 + $0xbc8] sm:$0xff] %vm2140_vm1, %v1983_v58  ;;  %v516_v58 = vld [vmem:[#allocation7 + $0x2d8] sm:$0xff] }
 0x429   : > { %2290 = vst [vmem:[%s3286_s23 + $0x4b0] sm:$0xff] %v907_v55  ;;  %954 = vmatmul.f32.gmra.mxu0 %v516_v58  ;;  %1691 = vmatmul.f32.gmra.mxu1 %v516_v58 }
 0x42a   : > { %2291 = vst.msk [vmem:[%s3286_s23 + $0x4b8] sm:$0xff] %vm2140_vm1, %v1644_v56 }
 0x42b   : > { %1296 = vmatmul.f32.gmra.mxu2 %v630_v61  ;;  %2033 = vmatmul.f32.gmra.mxu3 %v630_v61 }
 0x42e   : > { %v1249_v63 = vpop.f32.mrf.mxu2  ;;  %v1986_v0 = vpop.f32.mrf.mxu3 }
 0x42f   : > { %2518 = vst [vmem:[%s3286_s23 + $0xbd0] sm:$0xff] %v1249_v63  ;;  %v910_v61 = vpop.f32.mrf.mxu0  ;;  %v1647_v62 = vpop.f32.mrf.mxu1  ;;  %v641_v63 = vld [vmem:[#allocation7 + $0x6c0] sm:$0xff] }
 0x430   : > { %2519 = vst.msk [vmem:[%s3286_s23 + $0xbd8] sm:$0xff] %vm2140_vm1, %v1986_v0  ;;  %v517_v0 = vld [vmem:[#allocation7 + $0x2e0] sm:$0xff] }
 0x431   : > { %2292 = vst [vmem:[%s3286_s23 + $0x4c0] sm:$0xff] %v910_v61  ;;  %957 = vmatmul.f32.gmra.mxu0 %v517_v0  ;;  %1694 = vmatmul.f32.gmra.mxu1 %v517_v0 }
 0x432   : > { %2293 = vst.msk [vmem:[%s3286_s23 + $0x4c8] sm:$0xff] %vm2140_vm1, %v1647_v62 }
 0x433   : > { %1299 = vmatmul.f32.gmra.mxu2 %v631_v3  ;;  %2036 = vmatmul.f32.gmra.mxu3 %v631_v3 }
 0x436   : > { %v1252_v5 = vpop.f32.mrf.mxu2  ;;  %v1989_v6 = vpop.f32.mrf.mxu3 }
 0x437   : > { %2520 = vst [vmem:[%s3286_s23 + $0xbe0] sm:$0xff] %v1252_v5  ;;  %v913_v3 = vpop.f32.mrf.mxu0  ;;  %v1650_v4 = vpop.f32.mrf.mxu1  ;;  %v642_v5 = vld [vmem:[#allocation7 + $0x6c8] sm:$0xff] }
 0x438   : > { %2521 = vst.msk [vmem:[%s3286_s23 + $0xbe8] sm:$0xff] %vm2140_vm1, %v1989_v6  ;;  %v518_v6 = vld [vmem:[#allocation7 + $0x2e8] sm:$0xff] }
 0x439   : > { %2294 = vst [vmem:[%s3286_s23 + $0x4d0] sm:$0xff] %v913_v3  ;;  %960 = vmatmul.f32.gmra.mxu0 %v518_v6  ;;  %1697 = vmatmul.f32.gmra.mxu1 %v518_v6 }
 0x43a   : > { %2295 = vst.msk [vmem:[%s3286_s23 + $0x4d8] sm:$0xff] %vm2140_vm1, %v1650_v4 }
 0x43b   : > { %1302 = vmatmul.f32.gmra.mxu2 %v632_v9  ;;  %2039 = vmatmul.f32.gmra.mxu3 %v632_v9 }
 0x43e   : > { %v1255_v11 = vpop.f32.mrf.mxu2  ;;  %v1992_v12 = vpop.f32.mrf.mxu3 }
 0x43f   : > { %2522 = vst [vmem:[%s3286_s23 + $0xbf0] sm:$0xff] %v1255_v11  ;;  %v916_v9 = vpop.f32.mrf.mxu0  ;;  %v1653_v10 = vpop.f32.mrf.mxu1  ;;  %v643_v11 = vld [vmem:[#allocation7 + $0x6d0] sm:$0xff] }
 0x440   : > { %2523 = vst.msk [vmem:[%s3286_s23 + $0xbf8] sm:$0xff] %vm2140_vm1, %v1992_v12  ;;  %v519_v12 = vld [vmem:[#allocation7 + $0x2f0] sm:$0xff] }
 0x441   : > { %2296 = vst [vmem:[%s3286_s23 + $0x4e0] sm:$0xff] %v916_v9  ;;  %963 = vmatmul.f32.gmra.mxu0 %v519_v12  ;;  %1700 = vmatmul.f32.gmra.mxu1 %v519_v12 }
 0x442   : > { %2297 = vst.msk [vmem:[%s3286_s23 + $0x4e8] sm:$0xff] %vm2140_vm1, %v1653_v10 }
 0x443   : > { %1305 = vmatmul.f32.gmra.mxu2 %v633_v15  ;;  %2042 = vmatmul.f32.gmra.mxu3 %v633_v15 }
 0x446   : > { %v1258_v17 = vpop.f32.mrf.mxu2  ;;  %v1995_v18 = vpop.f32.mrf.mxu3 }
 0x447   : > { %2524 = vst [vmem:[%s3286_s23 + $0xc00] sm:$0xff] %v1258_v17  ;;  %v919_v15 = vpop.f32.mrf.mxu0  ;;  %v1656_v16 = vpop.f32.mrf.mxu1  ;;  %v644_v17 = vld [vmem:[#allocation7 + $0x6d8] sm:$0xff] }
 0x448   : > { %2525 = vst.msk [vmem:[%s3286_s23 + $0xc08] sm:$0xff] %vm2140_vm1, %v1995_v18  ;;  %v520_v18 = vld [vmem:[#allocation7 + $0x2f8] sm:$0xff] }
 0x449   : > { %2298 = vst [vmem:[%s3286_s23 + $0x4f0] sm:$0xff] %v919_v15  ;;  %966 = vmatmul.f32.gmra.mxu0 %v520_v18  ;;  %1703 = vmatmul.f32.gmra.mxu1 %v520_v18 }
 0x44a   : > { %2299 = vst.msk [vmem:[%s3286_s23 + $0x4f8] sm:$0xff] %vm2140_vm1, %v1656_v16 }
 0x44b   : > { %1308 = vmatmul.f32.gmra.mxu2 %v634_v21  ;;  %2045 = vmatmul.f32.gmra.mxu3 %v634_v21 }
 0x44e   : > { %v1261_v23 = vpop.f32.mrf.mxu2  ;;  %v1998_v24 = vpop.f32.mrf.mxu3 }
 0x44f   : > { %2526 = vst [vmem:[%s3286_s23 + $0xc10] sm:$0xff] %v1261_v23  ;;  %v922_v21 = vpop.f32.mrf.mxu0  ;;  %v1659_v22 = vpop.f32.mrf.mxu1  ;;  %v645_v23 = vld [vmem:[#allocation7 + $0x6e0] sm:$0xff] }
 0x450   : > { %2527 = vst.msk [vmem:[%s3286_s23 + $0xc18] sm:$0xff] %vm2140_vm1, %v1998_v24  ;;  %v521_v24 = vld [vmem:[#allocation7 + $0x300] sm:$0xff] }
 0x451   : > { %2300 = vst [vmem:[%s3286_s23 + $0x500] sm:$0xff] %v922_v21  ;;  %969 = vmatmul.f32.gmra.mxu0 %v521_v24  ;;  %1706 = vmatmul.f32.gmra.mxu1 %v521_v24 }
 0x452   : > { %2301 = vst.msk [vmem:[%s3286_s23 + $0x508] sm:$0xff] %vm2140_vm1, %v1659_v22 }
 0x453   : > { %1311 = vmatmul.f32.gmra.mxu2 %v635_v27  ;;  %2048 = vmatmul.f32.gmra.mxu3 %v635_v27 }
 0x456   : > { %v1264_v29 = vpop.f32.mrf.mxu2  ;;  %v2001_v30 = vpop.f32.mrf.mxu3 }
 0x457   : > { %2528 = vst [vmem:[%s3286_s23 + $0xc20] sm:$0xff] %v1264_v29  ;;  %v925_v27 = vpop.f32.mrf.mxu0  ;;  %v1662_v28 = vpop.f32.mrf.mxu1  ;;  %v646_v29 = vld [vmem:[#allocation7 + $0x6e8] sm:$0xff] }
 0x458   : > { %2529 = vst.msk [vmem:[%s3286_s23 + $0xc28] sm:$0xff] %vm2140_vm1, %v2001_v30  ;;  %v522_v30 = vld [vmem:[#allocation7 + $0x308] sm:$0xff] }
 0x459   : > { %2302 = vst [vmem:[%s3286_s23 + $0x510] sm:$0xff] %v925_v27  ;;  %972 = vmatmul.f32.gmra.mxu0 %v522_v30  ;;  %1709 = vmatmul.f32.gmra.mxu1 %v522_v30 }
 0x45a   : > { %2303 = vst.msk [vmem:[%s3286_s23 + $0x518] sm:$0xff] %vm2140_vm1, %v1662_v28 }
 0x45b   : > { %1314 = vmatmul.f32.gmra.mxu2 %v636_v33  ;;  %2051 = vmatmul.f32.gmra.mxu3 %v636_v33 }
 0x45e   : > { %v1267_v35 = vpop.f32.mrf.mxu2  ;;  %v2004_v36 = vpop.f32.mrf.mxu3 }
 0x45f   : > { %2530 = vst [vmem:[%s3286_s23 + $0xc30] sm:$0xff] %v1267_v35  ;;  %v928_v33 = vpop.f32.mrf.mxu0  ;;  %v1665_v34 = vpop.f32.mrf.mxu1  ;;  %v647_v35 = vld [vmem:[#allocation7 + $0x6f0] sm:$0xff] }
 0x460   : > { %2531 = vst.msk [vmem:[%s3286_s23 + $0xc38] sm:$0xff] %vm2140_vm1, %v2004_v36  ;;  %v523_v36 = vld [vmem:[#allocation7 + $0x310] sm:$0xff] }
 0x461   : > { %2304 = vst [vmem:[%s3286_s23 + $0x520] sm:$0xff] %v928_v33  ;;  %975 = vmatmul.f32.gmra.mxu0 %v523_v36  ;;  %1712 = vmatmul.f32.gmra.mxu1 %v523_v36 }
 0x462   : > { %2305 = vst.msk [vmem:[%s3286_s23 + $0x528] sm:$0xff] %vm2140_vm1, %v1665_v34 }
 0x463   : > { %1317 = vmatmul.f32.gmra.mxu2 %v637_v39  ;;  %2054 = vmatmul.f32.gmra.mxu3 %v637_v39 }
 0x466   : > { %v1270_v41 = vpop.f32.mrf.mxu2  ;;  %v2007_v42 = vpop.f32.mrf.mxu3 }
 0x467   : > { %2532 = vst [vmem:[%s3286_s23 + $0xc40] sm:$0xff] %v1270_v41  ;;  %v931_v39 = vpop.f32.mrf.mxu0  ;;  %v1668_v40 = vpop.f32.mrf.mxu1  ;;  %v648_v41 = vld [vmem:[#allocation7 + $0x6f8] sm:$0xff] }
 0x468   : > { %2533 = vst.msk [vmem:[%s3286_s23 + $0xc48] sm:$0xff] %vm2140_vm1, %v2007_v42  ;;  %v524_v42 = vld [vmem:[#allocation7 + $0x318] sm:$0xff] }
 0x469   : > { %2306 = vst [vmem:[%s3286_s23 + $0x530] sm:$0xff] %v931_v39  ;;  %978 = vmatmul.f32.gmra.mxu0 %v524_v42  ;;  %1715 = vmatmul.f32.gmra.mxu1 %v524_v42 }
 0x46a   : > { %2307 = vst.msk [vmem:[%s3286_s23 + $0x538] sm:$0xff] %vm2140_vm1, %v1668_v40 }
 0x46b   : > { %1320 = vmatmul.f32.gmra.mxu2 %v638_v45  ;;  %2057 = vmatmul.f32.gmra.mxu3 %v638_v45 }
 0x46e   : > { %v1273_v47 = vpop.f32.mrf.mxu2  ;;  %v2010_v48 = vpop.f32.mrf.mxu3 }
 0x46f   : > { %2534 = vst [vmem:[%s3286_s23 + $0xc50] sm:$0xff] %v1273_v47  ;;  %v934_v45 = vpop.f32.mrf.mxu0  ;;  %v1671_v46 = vpop.f32.mrf.mxu1  ;;  %v649_v47 = vld [vmem:[#allocation7 + $0x700] sm:$0xff] }
 0x470   : > { %2535 = vst.msk [vmem:[%s3286_s23 + $0xc58] sm:$0xff] %vm2140_vm1, %v2010_v48  ;;  %v525_v48 = vld [vmem:[#allocation7 + $0x320] sm:$0xff] }
 0x471   : > { %2308 = vst [vmem:[%s3286_s23 + $0x540] sm:$0xff] %v934_v45  ;;  %981 = vmatmul.f32.gmra.mxu0 %v525_v48  ;;  %1718 = vmatmul.f32.gmra.mxu1 %v525_v48 }
 0x472   : > { %2309 = vst.msk [vmem:[%s3286_s23 + $0x548] sm:$0xff] %vm2140_vm1, %v1671_v46 }
 0x473   : > { %1323 = vmatmul.f32.gmra.mxu2 %v639_v51  ;;  %2060 = vmatmul.f32.gmra.mxu3 %v639_v51 }
 0x476   : > { %v1276_v53 = vpop.f32.mrf.mxu2  ;;  %v2013_v54 = vpop.f32.mrf.mxu3 }
 0x477   : > { %2536 = vst [vmem:[%s3286_s23 + $0xc60] sm:$0xff] %v1276_v53  ;;  %v937_v51 = vpop.f32.mrf.mxu0  ;;  %v1674_v52 = vpop.f32.mrf.mxu1  ;;  %v650_v53 = vld [vmem:[#allocation7 + $0x708] sm:$0xff] }
 0x478   : > { %2537 = vst.msk [vmem:[%s3286_s23 + $0xc68] sm:$0xff] %vm2140_vm1, %v2013_v54  ;;  %v526_v54 = vld [vmem:[#allocation7 + $0x328] sm:$0xff] }
 0x479   : > { %2310 = vst [vmem:[%s3286_s23 + $0x550] sm:$0xff] %v937_v51  ;;  %984 = vmatmul.f32.gmra.mxu0 %v526_v54  ;;  %1721 = vmatmul.f32.gmra.mxu1 %v526_v54 }
 0x47a   : > { %2311 = vst.msk [vmem:[%s3286_s23 + $0x558] sm:$0xff] %vm2140_vm1, %v1674_v52 }
 0x47b   : > { %1326 = vmatmul.f32.gmra.mxu2 %v640_v57  ;;  %2063 = vmatmul.f32.gmra.mxu3 %v640_v57 }
 0x47e   : > { %v1279_v59 = vpop.f32.mrf.mxu2  ;;  %v2016_v60 = vpop.f32.mrf.mxu3 }
 0x47f   : > { %2538 = vst [vmem:[%s3286_s23 + $0xc70] sm:$0xff] %v1279_v59  ;;  %v940_v57 = vpop.f32.mrf.mxu0  ;;  %v1677_v58 = vpop.f32.mrf.mxu1  ;;  %v651_v59 = vld [vmem:[#allocation7 + $0x710] sm:$0xff] }
 0x480   : > { %2539 = vst.msk [vmem:[%s3286_s23 + $0xc78] sm:$0xff] %vm2140_vm1, %v2016_v60  ;;  %v527_v60 = vld [vmem:[#allocation7 + $0x330] sm:$0xff] }
 0x481   : > { %2312 = vst [vmem:[%s3286_s23 + $0x560] sm:$0xff] %v940_v57  ;;  %987 = vmatmul.f32.gmra.mxu0 %v527_v60  ;;  %1724 = vmatmul.f32.gmra.mxu1 %v527_v60 }
 0x482   : > { %2313 = vst.msk [vmem:[%s3286_s23 + $0x568] sm:$0xff] %vm2140_vm1, %v1677_v58 }
 0x483   : > { %1329 = vmatmul.f32.gmra.mxu2 %v641_v63  ;;  %2066 = vmatmul.f32.gmra.mxu3 %v641_v63 }
 0x486   : > { %v1282_v1 = vpop.f32.mrf.mxu2  ;;  %v2019_v2 = vpop.f32.mrf.mxu3 }
 0x487   : > { %2540 = vst [vmem:[%s3286_s23 + $0xc80] sm:$0xff] %v1282_v1  ;;  %v943_v63 = vpop.f32.mrf.mxu0  ;;  %v1680_v0 = vpop.f32.mrf.mxu1  ;;  %v652_v1 = vld [vmem:[#allocation7 + $0x718] sm:$0xff] }
 0x488   : > { %2541 = vst.msk [vmem:[%s3286_s23 + $0xc88] sm:$0xff] %vm2140_vm1, %v2019_v2  ;;  %v528_v2 = vld [vmem:[#allocation7 + $0x338] sm:$0xff] }
 0x489   : > { %2314 = vst [vmem:[%s3286_s23 + $0x570] sm:$0xff] %v943_v63  ;;  %990 = vmatmul.f32.gmra.mxu0 %v528_v2  ;;  %1727 = vmatmul.f32.gmra.mxu1 %v528_v2  ;;  %v663_v2 = vld [vmem:[#allocation7 + $0x770] sm:$0xff] }
 0x48a   : > { %2315 = vst.msk [vmem:[%s3286_s23 + $0x578] sm:$0xff] %vm2140_vm1, %v1680_v0 }
 0x48b   : > { %1332 = vmatmul.f32.gmra.mxu2 %v642_v5  ;;  %2069 = vmatmul.f32.gmra.mxu3 %v642_v5 }
 0x48e   : > { %v1285_v7 = vpop.f32.mrf.mxu2  ;;  %v2022_v8 = vpop.f32.mrf.mxu3 }
 0x48f   : > { %2542 = vst [vmem:[%s3286_s23 + $0xc90] sm:$0xff] %v1285_v7  ;;  %v946_v5 = vpop.f32.mrf.mxu0  ;;  %v1683_v6 = vpop.f32.mrf.mxu1  ;;  %v653_v7 = vld [vmem:[#allocation7 + $0x720] sm:$0xff] }
 0x490   : > { %2543 = vst.msk [vmem:[%s3286_s23 + $0xc98] sm:$0xff] %vm2140_vm1, %v2022_v8  ;;  %v529_v8 = vld [vmem:[#allocation7 + $0x340] sm:$0xff] }
 0x491   : > { %2316 = vst [vmem:[%s3286_s23 + $0x580] sm:$0xff] %v946_v5  ;;  %993 = vmatmul.f32.gmra.mxu0 %v529_v8  ;;  %1730 = vmatmul.f32.gmra.mxu1 %v529_v8 }
 0x492   : > { %2317 = vst.msk [vmem:[%s3286_s23 + $0x588] sm:$0xff] %vm2140_vm1, %v1683_v6 }
 0x493   : > { %1335 = vmatmul.f32.gmra.mxu2 %v643_v11  ;;  %2072 = vmatmul.f32.gmra.mxu3 %v643_v11 }
 0x496   : > { %v1288_v13 = vpop.f32.mrf.mxu2  ;;  %v2025_v14 = vpop.f32.mrf.mxu3 }
 0x497   : > { %2544 = vst [vmem:[%s3286_s23 + $0xca0] sm:$0xff] %v1288_v13  ;;  %v949_v11 = vpop.f32.mrf.mxu0  ;;  %v1686_v12 = vpop.f32.mrf.mxu1  ;;  %v654_v13 = vld [vmem:[#allocation7 + $0x728] sm:$0xff] }
 0x498   : > { %2545 = vst.msk [vmem:[%s3286_s23 + $0xca8] sm:$0xff] %vm2140_vm1, %v2025_v14  ;;  %v530_v14 = vld [vmem:[#allocation7 + $0x348] sm:$0xff] }
 0x499   : > { %2318 = vst [vmem:[%s3286_s23 + $0x590] sm:$0xff] %v949_v11  ;;  %996 = vmatmul.f32.gmra.mxu0 %v530_v14  ;;  %1733 = vmatmul.f32.gmra.mxu1 %v530_v14 }
 0x49a   : > { %2319 = vst.msk [vmem:[%s3286_s23 + $0x598] sm:$0xff] %vm2140_vm1, %v1686_v12 }
 0x49b   : > { %1338 = vmatmul.f32.gmra.mxu2 %v644_v17  ;;  %2075 = vmatmul.f32.gmra.mxu3 %v644_v17 }
 0x49e   : > { %v1291_v19 = vpop.f32.mrf.mxu2  ;;  %v2028_v20 = vpop.f32.mrf.mxu3 }
 0x49f   : > { %2546 = vst [vmem:[%s3286_s23 + $0xcb0] sm:$0xff] %v1291_v19  ;;  %v952_v17 = vpop.f32.mrf.mxu0  ;;  %v1689_v18 = vpop.f32.mrf.mxu1  ;;  %v655_v19 = vld [vmem:[#allocation7 + $0x730] sm:$0xff] }
 0x4a0   : > { %2547 = vst.msk [vmem:[%s3286_s23 + $0xcb8] sm:$0xff] %vm2140_vm1, %v2028_v20  ;;  %v531_v20 = vld [vmem:[#allocation7 + $0x350] sm:$0xff] }
 0x4a1   : > { %2320 = vst [vmem:[%s3286_s23 + $0x5a0] sm:$0xff] %v952_v17  ;;  %999 = vmatmul.f32.gmra.mxu0 %v531_v20  ;;  %1736 = vmatmul.f32.gmra.mxu1 %v531_v20 }
 0x4a2   : > { %2321 = vst.msk [vmem:[%s3286_s23 + $0x5a8] sm:$0xff] %vm2140_vm1, %v1689_v18 }
 0x4a3   : > { %1341 = vmatmul.f32.gmra.mxu2 %v645_v23  ;;  %2078 = vmatmul.f32.gmra.mxu3 %v645_v23 }
 0x4a6   : > { %v1294_v25 = vpop.f32.mrf.mxu2  ;;  %v2031_v26 = vpop.f32.mrf.mxu3 }
 0x4a7   : > { %2548 = vst [vmem:[%s3286_s23 + $0xcc0] sm:$0xff] %v1294_v25  ;;  %v955_v23 = vpop.f32.mrf.mxu0  ;;  %v1692_v24 = vpop.f32.mrf.mxu1  ;;  %v656_v25 = vld [vmem:[#allocation7 + $0x738] sm:$0xff] }
 0x4a8   : > { %2549 = vst.msk [vmem:[%s3286_s23 + $0xcc8] sm:$0xff] %vm2140_vm1, %v2031_v26  ;;  %v532_v26 = vld [vmem:[#allocation7 + $0x358] sm:$0xff] }
 0x4a9   : > { %2322 = vst [vmem:[%s3286_s23 + $0x5b0] sm:$0xff] %v955_v23  ;;  %1002 = vmatmul.f32.gmra.mxu0 %v532_v26  ;;  %1739 = vmatmul.f32.gmra.mxu1 %v532_v26 }
 0x4aa   : > { %2323 = vst.msk [vmem:[%s3286_s23 + $0x5b8] sm:$0xff] %vm2140_vm1, %v1692_v24 }
 0x4ab   : > { %1344 = vmatmul.f32.gmra.mxu2 %v646_v29  ;;  %2081 = vmatmul.f32.gmra.mxu3 %v646_v29 }
 0x4ae   : > { %v1297_v31 = vpop.f32.mrf.mxu2  ;;  %v2034_v32 = vpop.f32.mrf.mxu3 }
 0x4af   : > { %2550 = vst [vmem:[%s3286_s23 + $0xcd0] sm:$0xff] %v1297_v31  ;;  %v958_v29 = vpop.f32.mrf.mxu0  ;;  %v1695_v30 = vpop.f32.mrf.mxu1  ;;  %v657_v31 = vld [vmem:[#allocation7 + $0x740] sm:$0xff] }
 0x4b0   : > { %2551 = vst.msk [vmem:[%s3286_s23 + $0xcd8] sm:$0xff] %vm2140_vm1, %v2034_v32  ;;  %v533_v32 = vld [vmem:[#allocation7 + $0x360] sm:$0xff] }
 0x4b1   : > { %2324 = vst [vmem:[%s3286_s23 + $0x5c0] sm:$0xff] %v958_v29  ;;  %1005 = vmatmul.f32.gmra.mxu0 %v533_v32  ;;  %1742 = vmatmul.f32.gmra.mxu1 %v533_v32 }
 0x4b2   : > { %2325 = vst.msk [vmem:[%s3286_s23 + $0x5c8] sm:$0xff] %vm2140_vm1, %v1695_v30 }
 0x4b3   : > { %1347 = vmatmul.f32.gmra.mxu2 %v647_v35  ;;  %2084 = vmatmul.f32.gmra.mxu3 %v647_v35 }
 0x4b6   : > { %v1300_v37 = vpop.f32.mrf.mxu2  ;;  %v2037_v38 = vpop.f32.mrf.mxu3 }
 0x4b7   : > { %2552 = vst [vmem:[%s3286_s23 + $0xce0] sm:$0xff] %v1300_v37  ;;  %v961_v35 = vpop.f32.mrf.mxu0  ;;  %v1698_v36 = vpop.f32.mrf.mxu1  ;;  %v658_v37 = vld [vmem:[#allocation7 + $0x748] sm:$0xff] }
 0x4b8   : > { %2553 = vst.msk [vmem:[%s3286_s23 + $0xce8] sm:$0xff] %vm2140_vm1, %v2037_v38  ;;  %v534_v38 = vld [vmem:[#allocation7 + $0x368] sm:$0xff] }
 0x4b9   : > { %2326 = vst [vmem:[%s3286_s23 + $0x5d0] sm:$0xff] %v961_v35  ;;  %1008 = vmatmul.f32.gmra.mxu0 %v534_v38  ;;  %1745 = vmatmul.f32.gmra.mxu1 %v534_v38 }
 0x4ba   : > { %2327 = vst.msk [vmem:[%s3286_s23 + $0x5d8] sm:$0xff] %vm2140_vm1, %v1698_v36 }
 0x4bb   : > { %1350 = vmatmul.f32.gmra.mxu2 %v648_v41  ;;  %2087 = vmatmul.f32.gmra.mxu3 %v648_v41 }
 0x4be   : > { %v1303_v43 = vpop.f32.mrf.mxu2  ;;  %v2040_v44 = vpop.f32.mrf.mxu3 }
 0x4bf   : > { %2554 = vst [vmem:[%s3286_s23 + $0xcf0] sm:$0xff] %v1303_v43  ;;  %v964_v41 = vpop.f32.mrf.mxu0  ;;  %v1701_v42 = vpop.f32.mrf.mxu1  ;;  %v659_v43 = vld [vmem:[#allocation7 + $0x750] sm:$0xff] }
 0x4c0   : > { %2555 = vst.msk [vmem:[%s3286_s23 + $0xcf8] sm:$0xff] %vm2140_vm1, %v2040_v44  ;;  %v535_v44 = vld [vmem:[#allocation7 + $0x370] sm:$0xff] }
 0x4c1   : > { %2328 = vst [vmem:[%s3286_s23 + $0x5e0] sm:$0xff] %v964_v41  ;;  %1011 = vmatmul.f32.gmra.mxu0 %v535_v44  ;;  %1748 = vmatmul.f32.gmra.mxu1 %v535_v44 }
 0x4c2   : > { %2329 = vst.msk [vmem:[%s3286_s23 + $0x5e8] sm:$0xff] %vm2140_vm1, %v1701_v42 }
 0x4c3   : > { %1353 = vmatmul.f32.gmra.mxu2 %v649_v47  ;;  %2090 = vmatmul.f32.gmra.mxu3 %v649_v47 }
 0x4c6   : > { %v1306_v49 = vpop.f32.mrf.mxu2  ;;  %v2043_v50 = vpop.f32.mrf.mxu3 }
 0x4c7   : > { %2556 = vst [vmem:[%s3286_s23 + $0xd00] sm:$0xff] %v1306_v49  ;;  %v967_v47 = vpop.f32.mrf.mxu0  ;;  %v1704_v48 = vpop.f32.mrf.mxu1  ;;  %v660_v49 = vld [vmem:[#allocation7 + $0x758] sm:$0xff] }
 0x4c8   : > { %2557 = vst.msk [vmem:[%s3286_s23 + $0xd08] sm:$0xff] %vm2140_vm1, %v2043_v50  ;;  %v536_v50 = vld [vmem:[#allocation7 + $0x378] sm:$0xff] }
 0x4c9   : > { %2330 = vst [vmem:[%s3286_s23 + $0x5f0] sm:$0xff] %v967_v47  ;;  %1014 = vmatmul.f32.gmra.mxu0 %v536_v50  ;;  %1751 = vmatmul.f32.gmra.mxu1 %v536_v50 }
 0x4ca   : > { %2331 = vst.msk [vmem:[%s3286_s23 + $0x5f8] sm:$0xff] %vm2140_vm1, %v1704_v48 }
 0x4cb   : > { %1356 = vmatmul.f32.gmra.mxu2 %v650_v53  ;;  %2093 = vmatmul.f32.gmra.mxu3 %v650_v53 }
 0x4ce   : > { %v1309_v55 = vpop.f32.mrf.mxu2  ;;  %v2046_v56 = vpop.f32.mrf.mxu3 }
 0x4cf   : > { %2558 = vst [vmem:[%s3286_s23 + $0xd10] sm:$0xff] %v1309_v55  ;;  %v970_v53 = vpop.f32.mrf.mxu0  ;;  %v1707_v54 = vpop.f32.mrf.mxu1  ;;  %v661_v55 = vld [vmem:[#allocation7 + $0x760] sm:$0xff] }
 0x4d0   : > { %2559 = vst.msk [vmem:[%s3286_s23 + $0xd18] sm:$0xff] %vm2140_vm1, %v2046_v56  ;;  %v537_v56 = vld [vmem:[#allocation7 + $0x380] sm:$0xff] }
 0x4d1   : > { %2332 = vst [vmem:[%s3286_s23 + $0x600] sm:$0xff] %v970_v53  ;;  %1017 = vmatmul.f32.gmra.mxu0 %v537_v56  ;;  %1754 = vmatmul.f32.gmra.mxu1 %v537_v56 }
 0x4d2   : > { %2333 = vst.msk [vmem:[%s3286_s23 + $0x608] sm:$0xff] %vm2140_vm1, %v1707_v54 }
 0x4d3   : > { %1359 = vmatmul.f32.gmra.mxu2 %v651_v59  ;;  %2096 = vmatmul.f32.gmra.mxu3 %v651_v59 }
 0x4d6   : > { %v1312_v61 = vpop.f32.mrf.mxu2  ;;  %v2049_v62 = vpop.f32.mrf.mxu3 }
 0x4d7   : > { %2560 = vst [vmem:[%s3286_s23 + $0xd20] sm:$0xff] %v1312_v61  ;;  %v973_v59 = vpop.f32.mrf.mxu0  ;;  %v1710_v60 = vpop.f32.mrf.mxu1  ;;  %v662_v61 = vld [vmem:[#allocation7 + $0x768] sm:$0xff] }
 0x4d8   : > { %2561 = vst.msk [vmem:[%s3286_s23 + $0xd28] sm:$0xff] %vm2140_vm1, %v2049_v62 }
 0x4d9   : > { %2334 = vst [vmem:[%s3286_s23 + $0x610] sm:$0xff] %v973_v59 }
 0x4da   : > { %2335 = vst.msk [vmem:[%s3286_s23 + $0x618] sm:$0xff] %vm2140_vm1, %v1710_v60 }
 0x4db   : > { %1362 = vmatmul.f32.gmra.mxu2 %v652_v1  ;;  %2099 = vmatmul.f32.gmra.mxu3 %v652_v1 }
 0x4de   : > { %v1315_v3 = vpop.f32.mrf.mxu2  ;;  %v2052_v4 = vpop.f32.mrf.mxu3 }
 0x4df   : > { %2562 = vst [vmem:[%s3286_s23 + $0xd30] sm:$0xff] %v1315_v3  ;;  %v976_v0 = vpop.f32.mrf.mxu0  ;;  %v1713_v1 = vpop.f32.mrf.mxu1 }
 0x4e0   : > { %2563 = vst.msk [vmem:[%s3286_s23 + $0xd38] sm:$0xff] %vm2140_vm1, %v2052_v4 }
 0x4e1   : > { %2336 = vst [vmem:[%s3286_s23 + $0x620] sm:$0xff] %v976_v0 }
 0x4e2   : > { %2337 = vst.msk [vmem:[%s3286_s23 + $0x628] sm:$0xff] %vm2140_vm1, %v1713_v1 }
 0x4e3   : > { %1365 = vmatmul.f32.gmra.mxu2 %v653_v7  ;;  %2102 = vmatmul.f32.gmra.mxu3 %v653_v7  ;;  %v664_v7 = vld [vmem:[#allocation7 + $0x778] sm:$0xff] }
 0x4e6   : > { %v1318_v9 = vpop.f32.mrf.mxu2  ;;  %v2055_v10 = vpop.f32.mrf.mxu3 }
 0x4e7   : > { %2564 = vst [vmem:[%s3286_s23 + $0xd40] sm:$0xff] %v1318_v9  ;;  %v979_v5 = vpop.f32.mrf.mxu0  ;;  %v1716_v6 = vpop.f32.mrf.mxu1 }
 0x4e8   : > { %2565 = vst.msk [vmem:[%s3286_s23 + $0xd48] sm:$0xff] %vm2140_vm1, %v2055_v10 }
 0x4e9   : > { %2338 = vst [vmem:[%s3286_s23 + $0x630] sm:$0xff] %v979_v5 }
 0x4ea   : > { %2339 = vst.msk [vmem:[%s3286_s23 + $0x638] sm:$0xff] %vm2140_vm1, %v1716_v6 }
 0x4eb   : > { %1368 = vmatmul.f32.gmra.mxu2 %v654_v13  ;;  %2105 = vmatmul.f32.gmra.mxu3 %v654_v13 }
 0x4ee   : > { %v1321_v15 = vpop.f32.mrf.mxu2  ;;  %v2058_v16 = vpop.f32.mrf.mxu3 }
 0x4ef   : > { %2566 = vst [vmem:[%s3286_s23 + $0xd50] sm:$0xff] %v1321_v15  ;;  %v982_v10 = vpop.f32.mrf.mxu0  ;;  %v1719_v11 = vpop.f32.mrf.mxu1 }
 0x4f0   : > { %2567 = vst.msk [vmem:[%s3286_s23 + $0xd58] sm:$0xff] %vm2140_vm1, %v2058_v16 }
 0x4f1   : > { %2340 = vst [vmem:[%s3286_s23 + $0x640] sm:$0xff] %v982_v10 }
 0x4f2   : > { %2341 = vst.msk [vmem:[%s3286_s23 + $0x648] sm:$0xff] %vm2140_vm1, %v1719_v11 }
 0x4f3   : > { %1371 = vmatmul.f32.gmra.mxu2 %v655_v19  ;;  %2108 = vmatmul.f32.gmra.mxu3 %v655_v19 }
 0x4f6   : > { %v1324_v21 = vpop.f32.mrf.mxu2  ;;  %v2061_v22 = vpop.f32.mrf.mxu3 }
 0x4f7   : > { %2568 = vst [vmem:[%s3286_s23 + $0xd60] sm:$0xff] %v1324_v21  ;;  %v985_v14 = vpop.f32.mrf.mxu0  ;;  %v1722_v15 = vpop.f32.mrf.mxu1 }
 0x4f8   : > { %2569 = vst.msk [vmem:[%s3286_s23 + $0xd68] sm:$0xff] %vm2140_vm1, %v2061_v22 }
 0x4f9   : > { %2342 = vst [vmem:[%s3286_s23 + $0x650] sm:$0xff] %v985_v14 }
 0x4fa   : > { %2343 = vst.msk [vmem:[%s3286_s23 + $0x658] sm:$0xff] %vm2140_vm1, %v1722_v15 }
 0x4fb   : > { %1374 = vmatmul.f32.gmra.mxu2 %v656_v25  ;;  %2111 = vmatmul.f32.gmra.mxu3 %v656_v25 }
 0x4fe   : > { %v1327_v27 = vpop.f32.mrf.mxu2  ;;  %v2064_v28 = vpop.f32.mrf.mxu3 }
 0x4ff   : > { %2570 = vst [vmem:[%s3286_s23 + $0xd70] sm:$0xff] %v1327_v27  ;;  %v988_v18 = vpop.f32.mrf.mxu0  ;;  %v1725_v19 = vpop.f32.mrf.mxu1 }
 0x500   : > { %2571 = vst.msk [vmem:[%s3286_s23 + $0xd78] sm:$0xff] %vm2140_vm1, %v2064_v28 }
 0x501   : > { %2344 = vst [vmem:[%s3286_s23 + $0x660] sm:$0xff] %v988_v18 }
 0x502   : > { %2345 = vst.msk [vmem:[%s3286_s23 + $0x668] sm:$0xff] %vm2140_vm1, %v1725_v19 }
 0x503   : > { %1377 = vmatmul.f32.gmra.mxu2 %v657_v31  ;;  %2114 = vmatmul.f32.gmra.mxu3 %v657_v31 }
 0x506   : > { %v1330_v33 = vpop.f32.mrf.mxu2  ;;  %v2067_v34 = vpop.f32.mrf.mxu3 }
 0x507   : > { %2572 = vst [vmem:[%s3286_s23 + $0xd80] sm:$0xff] %v1330_v33  ;;  %v991_v22 = vpop.f32.mrf.mxu0  ;;  %v1728_v23 = vpop.f32.mrf.mxu1 }
 0x508   : > { %2573 = vst.msk [vmem:[%s3286_s23 + $0xd88] sm:$0xff] %vm2140_vm1, %v2067_v34 }
 0x509   : > { %2346 = vst [vmem:[%s3286_s23 + $0x670] sm:$0xff] %v991_v22 }
 0x50a   : > { %2347 = vst.msk [vmem:[%s3286_s23 + $0x678] sm:$0xff] %vm2140_vm1, %v1728_v23 }
 0x50b   : > { %1380 = vmatmul.f32.gmra.mxu2 %v658_v37  ;;  %2117 = vmatmul.f32.gmra.mxu3 %v658_v37 }
 0x50e   : > { %v1333_v39 = vpop.f32.mrf.mxu2  ;;  %v2070_v40 = vpop.f32.mrf.mxu3 }
 0x50f   : > { %2574 = vst [vmem:[%s3286_s23 + $0xd90] sm:$0xff] %v1333_v39  ;;  %v994_v26 = vpop.f32.mrf.mxu0  ;;  %v1731_v27 = vpop.f32.mrf.mxu1 }
 0x510   : > { %2575 = vst.msk [vmem:[%s3286_s23 + $0xd98] sm:$0xff] %vm2140_vm1, %v2070_v40 }
 0x511   : > { %2348 = vst [vmem:[%s3286_s23 + $0x680] sm:$0xff] %v994_v26 }
 0x512   : > { %2349 = vst.msk [vmem:[%s3286_s23 + $0x688] sm:$0xff] %vm2140_vm1, %v1731_v27 }
 0x513   : > { %1383 = vmatmul.f32.gmra.mxu2 %v659_v43  ;;  %2120 = vmatmul.f32.gmra.mxu3 %v659_v43 }
 0x516   : > { %v1336_v45 = vpop.f32.mrf.mxu2  ;;  %v2073_v46 = vpop.f32.mrf.mxu3 }
 0x517   : > { %2576 = vst [vmem:[%s3286_s23 + $0xda0] sm:$0xff] %v1336_v45  ;;  %v997_v30 = vpop.f32.mrf.mxu0  ;;  %v1734_v31 = vpop.f32.mrf.mxu1 }
 0x518   : > { %2577 = vst.msk [vmem:[%s3286_s23 + $0xda8] sm:$0xff] %vm2140_vm1, %v2073_v46 }
 0x519   : > { %2350 = vst [vmem:[%s3286_s23 + $0x690] sm:$0xff] %v997_v30 }
 0x51a   : > { %2351 = vst.msk [vmem:[%s3286_s23 + $0x698] sm:$0xff] %vm2140_vm1, %v1734_v31 }
 0x51b   : > { %1386 = vmatmul.f32.gmra.mxu2 %v660_v49  ;;  %2123 = vmatmul.f32.gmra.mxu3 %v660_v49 }
 0x51e   : > { %v1339_v51 = vpop.f32.mrf.mxu2  ;;  %v2076_v52 = vpop.f32.mrf.mxu3 }
 0x51f   : > { %2578 = vst [vmem:[%s3286_s23 + $0xdb0] sm:$0xff] %v1339_v51  ;;  %v1000_v34 = vpop.f32.mrf.mxu0  ;;  %v1737_v35 = vpop.f32.mrf.mxu1 }
 0x520   : > { %2579 = vst.msk [vmem:[%s3286_s23 + $0xdb8] sm:$0xff] %vm2140_vm1, %v2076_v52 }
 0x521   : > { %2352 = vst [vmem:[%s3286_s23 + $0x6a0] sm:$0xff] %v1000_v34 }
 0x522   : > { %2353 = vst.msk [vmem:[%s3286_s23 + $0x6a8] sm:$0xff] %vm2140_vm1, %v1737_v35 }
 0x523   : > { %1389 = vmatmul.f32.gmra.mxu2 %v661_v55  ;;  %2126 = vmatmul.f32.gmra.mxu3 %v661_v55 }
 0x526   : > { %v1342_v57 = vpop.f32.mrf.mxu2  ;;  %v2079_v58 = vpop.f32.mrf.mxu3 }
 0x527   : > { %2580 = vst [vmem:[%s3286_s23 + $0xdc0] sm:$0xff] %v1342_v57  ;;  %v1003_v38 = vpop.f32.mrf.mxu0  ;;  %v1740_v39 = vpop.f32.mrf.mxu1 }
 0x528   : > { %2581 = vst.msk [vmem:[%s3286_s23 + $0xdc8] sm:$0xff] %vm2140_vm1, %v2079_v58 }
 0x529   : > { %2354 = vst [vmem:[%s3286_s23 + $0x6b0] sm:$0xff] %v1003_v38 }
 0x52a   : > { %2355 = vst.msk [vmem:[%s3286_s23 + $0x6b8] sm:$0xff] %vm2140_vm1, %v1740_v39 }
 0x52b   : > { %1392 = vmatmul.f32.gmra.mxu2 %v662_v61  ;;  %2129 = vmatmul.f32.gmra.mxu3 %v662_v61 }
 0x52e   : > { %v1345_v62 = vpop.f32.mrf.mxu2  ;;  %v2082_v63 = vpop.f32.mrf.mxu3 }
 0x52f   : > { %2582 = vst [vmem:[%s3286_s23 + $0xdd0] sm:$0xff] %v1345_v62  ;;  %v1006_v42 = vpop.f32.mrf.mxu0  ;;  %v1743_v43 = vpop.f32.mrf.mxu1 }
 0x530   : > { %2583 = vst.msk [vmem:[%s3286_s23 + $0xdd8] sm:$0xff] %vm2140_vm1, %v2082_v63 }
 0x531   : > { %2356 = vst [vmem:[%s3286_s23 + $0x6c0] sm:$0xff] %v1006_v42 }
 0x532   : > { %2357 = vst.msk [vmem:[%s3286_s23 + $0x6c8] sm:$0xff] %vm2140_vm1, %v1743_v43 }
 0x533   : > { %1395 = vmatmul.f32.gmra.mxu2 %v663_v2  ;;  %2132 = vmatmul.f32.gmra.mxu3 %v663_v2 }
 0x536   : > { %v1348_v3 = vpop.f32.mrf.mxu2  ;;  %v2085_v4 = vpop.f32.mrf.mxu3 }
 0x537   : > { %2584 = vst [vmem:[%s3286_s23 + $0xde0] sm:$0xff] %v1348_v3  ;;  %v1009_v46 = vpop.f32.mrf.mxu0  ;;  %v1746_v47 = vpop.f32.mrf.mxu1 }
 0x538   : > { %2585 = vst.msk [vmem:[%s3286_s23 + $0xde8] sm:$0xff] %vm2140_vm1, %v2085_v4 }
 0x539   : > { %2358 = vst [vmem:[%s3286_s23 + $0x6d0] sm:$0xff] %v1009_v46 }
 0x53a   : > { %2359 = vst.msk [vmem:[%s3286_s23 + $0x6d8] sm:$0xff] %vm2140_vm1, %v1746_v47 }
 0x53b   : > { %1398 = vmatmul.f32.gmra.mxu2 %v664_v7  ;;  %2135 = vmatmul.f32.gmra.mxu3 %v664_v7 }
 0x53e   : > { %v1351_v8 = vpop.f32.mrf.mxu2  ;;  %v2088_v9 = vpop.f32.mrf.mxu3 }
 0x53f   : > { %2586 = vst [vmem:[%s3286_s23 + $0xdf0] sm:$0xff] %v1351_v8  ;;  %v1012_v50 = vpop.f32.mrf.mxu0  ;;  %v1749_v51 = vpop.f32.mrf.mxu1 }
 0x540   : > { %2587 = vst.msk [vmem:[%s3286_s23 + $0xdf8] sm:$0xff] %vm2140_vm1, %v2088_v9 }
 0x541   : > { %2360 = vst [vmem:[%s3286_s23 + $0x6e0] sm:$0xff] %v1012_v50 }
 0x542   : > { %2361 = vst.msk [vmem:[%s3286_s23 + $0x6e8] sm:$0xff] %vm2140_vm1, %v1749_v51 }
 0x546   : > { %v1354_v12 = vpop.f32.mrf.mxu2  ;;  %v2091_v13 = vpop.f32.mrf.mxu3 }
 0x547   : > { %2588 = vst [vmem:[%s3286_s23 + $0xe00] sm:$0xff] %v1354_v12  ;;  %v1015_v54 = vpop.f32.mrf.mxu0  ;;  %v1752_v55 = vpop.f32.mrf.mxu1 }
 0x548   : > { %2589 = vst.msk [vmem:[%s3286_s23 + $0xe08] sm:$0xff] %vm2140_vm1, %v2091_v13 }
 0x549   : > { %2362 = vst [vmem:[%s3286_s23 + $0x6f0] sm:$0xff] %v1015_v54 }
 0x54a   : > { %2363 = vst.msk [vmem:[%s3286_s23 + $0x6f8] sm:$0xff] %vm2140_vm1, %v1752_v55 }
 0x54e   : > { %v1357_v16 = vpop.f32.mrf.mxu2  ;;  %v2094_v17 = vpop.f32.mrf.mxu3 }
 0x54f   : > { %2590 = vst [vmem:[%s3286_s23 + $0xe10] sm:$0xff] %v1357_v16  ;;  %v1018_v58 = vpop.f32.mrf.mxu0  ;;  %v1755_v59 = vpop.f32.mrf.mxu1 }
 0x550   : > { %2591 = vst.msk [vmem:[%s3286_s23 + $0xe18] sm:$0xff] %vm2140_vm1, %v2094_v17 }
 0x551   : > { %2364 = vst [vmem:[%s3286_s23 + $0x700] sm:$0xff] %v1018_v58 }
 0x552   : > { %2365 = vst.msk [vmem:[%s3286_s23 + $0x708] sm:$0xff] %vm2140_vm1, %v1755_v59 }
 0x556   : > { %v1360_v20 = vpop.f32.mrf.mxu2  ;;  %v2097_v21 = vpop.f32.mrf.mxu3 }
 0x557   : > { %2592 = vst [vmem:[%s3286_s23 + $0xe20] sm:$0xff] %v1360_v20 }
 0x558   : > { %2593 = vst.msk [vmem:[%s3286_s23 + $0xe28] sm:$0xff] %vm2140_vm1, %v2097_v21 }
 0x55e   : > { %v1363_v24 = vpop.f32.mrf.mxu2  ;;  %v2100_v25 = vpop.f32.mrf.mxu3 }
 0x55f   : > { %2594 = vst [vmem:[%s3286_s23 + $0xe30] sm:$0xff] %v1363_v24 }
 0x560   : > { %2595 = vst.msk [vmem:[%s3286_s23 + $0xe38] sm:$0xff] %vm2140_vm1, %v2100_v25 }
 0x566   : > { %v1366_v28 = vpop.f32.mrf.mxu2  ;;  %v2103_v29 = vpop.f32.mrf.mxu3 }
 0x567   : > { %2596 = vst [vmem:[%s3286_s23 + $0xe40] sm:$0xff] %v1366_v28 }
 0x568   : > { %2597 = vst.msk [vmem:[%s3286_s23 + $0xe48] sm:$0xff] %vm2140_vm1, %v2103_v29 }
 0x56e   : > { %v1369_v32 = vpop.f32.mrf.mxu2  ;;  %v2106_v33 = vpop.f32.mrf.mxu3 }
 0x56f   : > { %2598 = vst [vmem:[%s3286_s23 + $0xe50] sm:$0xff] %v1369_v32 }
 0x570   : > { %2599 = vst.msk [vmem:[%s3286_s23 + $0xe58] sm:$0xff] %vm2140_vm1, %v2106_v33 }
 0x576   : > { %v1372_v36 = vpop.f32.mrf.mxu2  ;;  %v2109_v37 = vpop.f32.mrf.mxu3 }
 0x577   : > { %2600 = vst [vmem:[%s3286_s23 + $0xe60] sm:$0xff] %v1372_v36 }
 0x578   : > { %2601 = vst.msk [vmem:[%s3286_s23 + $0xe68] sm:$0xff] %vm2140_vm1, %v2109_v37 }
 0x57e   : > { %v1375_v40 = vpop.f32.mrf.mxu2  ;;  %v2112_v41 = vpop.f32.mrf.mxu3 }
 0x57f   : > { %2602 = vst [vmem:[%s3286_s23 + $0xe70] sm:$0xff] %v1375_v40 }
 0x580   : > { %2603 = vst.msk [vmem:[%s3286_s23 + $0xe78] sm:$0xff] %vm2140_vm1, %v2112_v41 }
 0x586   : > { %v1378_v44 = vpop.f32.mrf.mxu2  ;;  %v2115_v45 = vpop.f32.mrf.mxu3 }
 0x587   : > { %2604 = vst [vmem:[%s3286_s23 + $0xe80] sm:$0xff] %v1378_v44 }
 0x588   : > { %2605 = vst.msk [vmem:[%s3286_s23 + $0xe88] sm:$0xff] %vm2140_vm1, %v2115_v45 }
 0x58e   : > { %v1381_v48 = vpop.f32.mrf.mxu2  ;;  %v2118_v49 = vpop.f32.mrf.mxu3 }
 0x58f   : > { %2606 = vst [vmem:[%s3286_s23 + $0xe90] sm:$0xff] %v1381_v48 }
 0x590   : > { %2607 = vst.msk [vmem:[%s3286_s23 + $0xe98] sm:$0xff] %vm2140_vm1, %v2118_v49 }
 0x596   : > { %v1384_v52 = vpop.f32.mrf.mxu2  ;;  %v2121_v53 = vpop.f32.mrf.mxu3 }
 0x597   : > { %2608 = vst [vmem:[%s3286_s23 + $0xea0] sm:$0xff] %v1384_v52 }
 0x598   : > { %2609 = vst.msk [vmem:[%s3286_s23 + $0xea8] sm:$0xff] %vm2140_vm1, %v2121_v53 }
 0x59e   : > { %v1387_v56 = vpop.f32.mrf.mxu2  ;;  %v2124_v57 = vpop.f32.mrf.mxu3 }
 0x59f   : > { %2610 = vst [vmem:[%s3286_s23 + $0xeb0] sm:$0xff] %v1387_v56 }
 0x5a0   : > { %2611 = vst.msk [vmem:[%s3286_s23 + $0xeb8] sm:$0xff] %vm2140_vm1, %v2124_v57 }
 0x5a6   : > { %v1390_v60 = vpop.f32.mrf.mxu2  ;;  %v2127_v61 = vpop.f32.mrf.mxu3 }
 0x5a7   : > { %2612 = vst [vmem:[%s3286_s23 + $0xec0] sm:$0xff] %v1390_v60 }
 0x5a8   : > { %2613 = vst.msk [vmem:[%s3286_s23 + $0xec8] sm:$0xff] %vm2140_vm1, %v2127_v61 }
 0x5ae   : > { %v1393_v62 = vpop.f32.mrf.mxu2  ;;  %v2130_v63 = vpop.f32.mrf.mxu3 }
 0x5af   : > { %2614 = vst [vmem:[%s3286_s23 + $0xed0] sm:$0xff] %v1393_v62 }
 0x5b0   : > { %2615 = vst.msk [vmem:[%s3286_s23 + $0xed8] sm:$0xff] %vm2140_vm1, %v2130_v63 }
 0x5b6   : > { %v1396_v0 = vpop.f32.mrf.mxu2  ;;  %v2133_v1 = vpop.f32.mrf.mxu3 }
 0x5b7   : > { %2616 = vst [vmem:[%s3286_s23 + $0xee0] sm:$0xff] %v1396_v0 }
 0x5b8   : > { %2617 = vst.msk [vmem:[%s3286_s23 + $0xee8] sm:$0xff] %vm2140_vm1, %v2133_v1 }
 0x5be   : > { %v1399_v2 = vpop.f32.mrf.mxu2  ;;  %v2136_v3 = vpop.f32.mrf.mxu3 }
 0x5bf   : > { %2618 = vst [vmem:[%s3286_s23 + $0xef0] sm:$0xff] %v1399_v2 }
 0x5c0   : > { %2619 = vst.msk [vmem:[%s3286_s23 + $0xef8] sm:$0xff] %vm2140_vm1, %v2136_v3 }
 0x5c1   : > { %3004 = shalt.err (!%p3001_p10)
}
 0x5c2   : > { %s3055_s20 = smov 256   ;;  %s3056_s27 = smov 16  }
 0x5c3   : > { %2824 = dma.vmem_to_hbm [thread:$0]  (%p3149_p5), %s2635_s30, 61440, %s2637_s4, %s2621_s16, %s3055_s20, %s3055_s20, %s3056_s27  }
 0x5c4 PF: > { %s2651_s5 = sand.u32 1, %s3035_s12   ;;  %p4051_p12 = scmp.ge.s32.totalorder %s3047_s15, 2 }
 0x5c5   : > { %s2652_s18 = scalar_lea.sflag [#allocation4], %s2651_s5 }
 0x5c6   : > { %p2838_p13 = pnand %p4051_p12, %p3112_p6 }
 0x5c8   : > { %p2839_p0 = pneg %p2838_p13 }
 0x5ca   : > { %3030 = dma.done.wait (%p2839_p0), %s2652_s18, 61440  }
 0x5cb   : > { %3032 = vsyncadd (%p2839_p0), %s2652_s18, 4294905856  ;;  %p17_p3 = scmp.ge.s32.totalorder %s3136_s8, 4   ;;  %s4052_s12 = smov %s3039_s13 }
 0x5cc   : > { %s4053_s13 = smov %s3043_s14  ;;  %s4054_s14 = smov %s3145_s11 }
 0x5cd   : > { %s4055_s15 = smov %s3136_s8  ;;  %19 = sbr.rel (!%p17_p3) target bundleno = 6 (0x6), region = 85 }
 0x5d2   :  { %2658 = vsyncpa [#allocation3], 1 }
 0x5d3   :  { %2660 = vsyncpa [#allocation3 + $0x1], 1 }
 0x5d4   :  { %2661 = vsyncpa [#allocation6], 1 }
 0x5d5   :  { %2662 = vsyncpa [#allocation4], 1 }
 0x5d6   :  { %2664 = vsyncpa [#allocation4 + $0x1], 1 }

</bundles_post_ra>
